<compile_context>
chip_gen: v6e
topology: v6e:2x2x1
jax: 0.10.0
libtpu: 0.0.40
codegen_flags: <defaults>
</compile_context>

<pallas_src>
import functools
import math

import jax
import jax.numpy as jnp
from jax import lax
from jax.experimental import pallas as pl
from jax.experimental.pallas import tpu as pltpu

_LN_EPS = 1e-5
_LANE = 128


# ----------------------------- in-kernel helpers ---------------------------- #

def _linear(h, w, b):
    """f32 activation @ bf16 weight with f32 MXU accumulation, + f32 bias."""
    return jnp.dot(h.astype(w.dtype), w, preferred_element_type=jnp.float32) + b


def _layernorm(h, g, b):
    mu = jnp.mean(h, axis=-1, keepdims=True)
    c = h - mu
    var = jnp.mean(c * c, axis=-1, keepdims=True)
    return c * lax.rsqrt(var + _LN_EPS) * g + b


def _mha(xq, xkv, wqkv, bqkv, wo, bo, nhead, bias=None):
    """Multi-head attention for one batch element.

    xq: (Lq, d) f32, xkv: (Lkv, d) f32.
    wqkv: (3, d, d) bf16 (leading-axis Q/K/V selection -> no lane slicing of a
    (., 3d) projection output); bqkv: (3, 1, d) f32; wo: (d, d) bf16; bo: (1, d).
    """
    d = xq.shape[-1]
    hd = d // nhead
    scale = 1.0 / math.sqrt(hd)

    xq_b = xq.astype(wqkv.dtype)
    xkv_b = xkv.astype(wqkv.dtype)
    q = jnp.dot(xq_b, wqkv[0], preferred_element_type=jnp.float32) + bqkv[0]
    k = jnp.dot(xkv_b, wqkv[1], preferred_element_type=jnp.float32) + bqkv[1]
    v = jnp.dot(xkv_b, wqkv[2], preferred_element_type=jnp.float32) + bqkv[2]

    # Head-major (H, L, hd) stacks -> two leading-batch einsums for the whole
    # attention instead of 2*nhead per-head matmuls.
    def split_heads(t):
        return jnp.stack([t[:, h * hd:(h + 1) * hd] for h in range(nhead)],
                         axis=0).astype(jnp.bfloat16)

    qh, kh, vh = split_heads(q), split_heads(k), split_heads(v)

    s = jnp.einsum("hqd,hkd->hqk", qh, kh,
                   preferred_element_type=jnp.float32) * scale
    if bias is not None:
        s = s + bias                               # (Lq, Lk) f32, bcast over heads
    m = jnp.max(s, axis=-1, keepdims=True)
    p = jnp.exp(s - m)
    # softmax denominator reciprocal on the (otherwise idle) EUP slot
    p = p * pl.reciprocal(jnp.sum(p, axis=-1, keepdims=True), approx=True)

    o = jnp.einsum("hqk,hkd->hqd", p.astype(jnp.bfloat16), vh,
                   preferred_element_type=jnp.float32)         # (H, Lq, hd)
    attn = jnp.concatenate([o[h] for h in range(nhead)], axis=-1)  # (Lq, d)

    # ONE (Lq, d) @ (d, d) output projection — full-depth MXU contraction.
    return jnp.dot(attn.astype(wo.dtype), wo,
                   preferred_element_type=jnp.float32) + bo


# ------------------------------ encoder kernel ------------------------------ #
# grid = (batch "parallel", layer "arbitrary"); per-layer weights via BlockSpec.

def _encoder_kernel(src_ref,
                    wqkv, bqkv, wo, bo, ln1g, ln1b,
                    w1, b1, w2, b2, ln2g, ln2b,
                    fng, fnb,
                    mem_ref,
                    x_scr,
                    *, nhead, n_layers):
    l = pl.program_id(1)

    @pl.when(l == 0)
    def _():
        x_scr[...] = src_ref[...]

    x = x_scr[...]
    sa = _mha(x, x, wqkv[...], bqkv[...], wo[...], bo[...], nhead)
    x = _layernorm(x + sa, ln1g[...], ln1b[...])
    h1 = jnp.maximum(_linear(x, w1[...], b1[...]), 0.0)
    ff = _linear(h1, w2[...], b2[...])
    x = _layernorm(x + ff, ln2g[...], ln2b[...])
    x_scr[...] = x

    @pl.when(l == n_layers - 1)
    def _():
        mem_ref[...] = _layernorm(x, fng[...], fnb[...])   # final encoder norm


# ------------------------------ decoder kernel ------------------------------ #

def _decoder_kernel(tgt_ref, mem_ref,
                    sa_wqkv, sa_bqkv, sa_wo, sa_bo, ln1g, ln1b,
                    ca_wqkv, ca_bqkv, ca_wo, ca_bo, ln2g, ln2b,
                    w1, b1, w2, b2, ln3g, ln3b,
                    fng, fnb, cls_w, cls_b,
                    out_ref,
                    y_scr,
                    *, nhead, n_layers, causal):
    l = pl.program_id(1)

    @pl.when(l == 0)
    def _():
        y_scr[...] = tgt_ref[...]

    # Additive causal bias built in-kernel from iota (no HBM mask, no DMA);
    # eval path (causal=False) carries no mask at all.  Kept f32 on purpose.
    if causal:
        T = tgt_ref.shape[0]
        row = lax.broadcasted_iota(jnp.int32, (T, T), 0)
        col = lax.broadcasted_iota(jnp.int32, (T, T), 1)
        bias = jnp.where(col > row, jnp.float32(-1e30), jnp.float32(0.0))
    else:
        bias = None

    y = y_scr[...]
    mem = mem_ref[...]

    sa = _mha(y, y, sa_wqkv[...], sa_bqkv[...], sa_wo[...], sa_bo[...],
              nhead, bias=bias)
    y = _layernorm(y + sa, ln1g[...], ln1b[...])
    ca = _mha(y, mem, ca_wqkv[...], ca_bqkv[...], ca_wo[...], ca_bo[...], nhead)
    y = _layernorm(y + ca, ln2g[...], ln2b[...])
    h1 = jnp.maximum(_linear(y, w1[...], b1[...]), 0.0)
    ff = _linear(h1, w2[...], b2[...])
    y = _layernorm(y + ff, ln3g[...], ln3b[...])
    y_scr[...] = y

    @pl.when(l == n_layers - 1)
    def _():
        yn = _layernorm(y, fng[...], fnb[...])             # final decoder norm
        out_ref[...] = _linear(yn, cls_w[...], cls_b[...])  # lane-dense (T, Cpad)


# ------------------------------- BlockSpecs --------------------------------- #

def _layer_spec(tail):
    """Per-layer weight stack: select layer `l`, leading dim squeezed."""
    zeros = (0,) * len(tail)
    return pl.BlockSpec((None,) + tuple(tail), lambda b, l: (l,) + zeros)


def _batch_spec(tail):
    """Per-batch activation block, resident across the layer axis."""
    zeros = (0,) * len(tail)
    return pl.BlockSpec((None,) + tuple(tail), lambda b, l: (b,) + zeros)


def _shared_spec(shape):
    """Whole small array, fetched once."""
    zeros = (0,) * len(shape)
    return pl.BlockSpec(tuple(shape), lambda b, l: zeros)


# --------------------------------- wrapper ----------------------------------- #

def transformer_forward(params, x, y, *, nhead, num_classes, training=False):
    """Matches the PyTorch module's forward: nn.Transformer(src=x, tgt=y,
    tgt_mask=<causal iff training>) followed by the classifier Linear."""
    S, N, d = x.shape
    T = y.shape[0]
    n_enc = params["e_wqkv"].shape[0]
    n_dec = params["d_sa_wqkv"].shape[0]
    ff = params["e_w1"].shape[2]
    cpad = params["cls_w"].shape[1]
    H = nhead

    # Single tiny transpose per input so the kernel blocks are batch-major.
    # TODO(synk): fold these into BlockSpec index_maps once size-1 blocks on a
    #             non-minor batch axis are layout-friendly.
    xb = jnp.transpose(x, (1, 0, 2)).astype(jnp.float32)      # (N, S, d)
    yb = jnp.transpose(y, (1, 0, 2)).astype(jnp.float32)      # (N, T, d)

    cparams = pltpu.CompilerParams(
        dimension_semantics=("parallel", "arbitrary"),  # batch across TCs, layers pipelined
        vmem_limit_bytes=32 * 1024 * 1024)

    # ------------------------------ encoder ------------------------------ #
    enc_cost = pl.CostEstimate(
        flops=N * n_enc * (8 * S * d * d + 4 * S * S * d + 4 * S * d * ff),
        transcendentals=N * n_enc * H * S * S,
        bytes_accessed=N * (n_enc * (4 * d * d + 2 * d * ff) * 2 + 8 * S * d))

    mem = pl.pallas_call(
        functools.partial(_encoder_kernel, nhead=nhead, n_layers=n_enc),
        grid=(N, n_enc),
        in_specs=[
            _batch_spec((S, d)),                               # src
            _layer_spec((3, d, d)), _layer_spec((3, 1, d)),    # wqkv, bqkv
            _layer_spec((d, d)), _layer_spec((1, d)),          # wo, bo
            _layer_spec((1, d)), _layer_spec((1, d)),          # ln1 g/b
            _layer_spec((d, ff)), _layer_spec((1, ff)),        # w1, b1
            _layer_spec((ff, d)), _layer_spec((1, d)),         # w2, b2
            _layer_spec((1, d)), _layer_spec((1, d)),          # ln2 g/b
            _shared_spec((1, d)), _shared_spec((1, d)),        # final norm g/b
        ],
        out_specs=_batch_spec((S, d)),
        out_shape=jax.ShapeDtypeStruct((N, S, d), jnp.float32),
        scratch_shapes=[pltpu.VMEM((S, d), jnp.float32)],
        compiler_params=cparams,
        cost_estimate=enc_cost,
    )(xb,
      params["e_wqkv"], params["e_bqkv"], params["e_wo"], params["e_bo"],
      params["e_ln1g"], params["e_ln1b"],
      params["e_w1"], params["e_b1"], params["e_w2"], params["e_b2"],
      params["e_ln2g"], params["e_ln2b"],
      params["enc_ng"], params["enc_nb"])

    # ------------------------------ decoder ------------------------------ #
    dec_cost = pl.CostEstimate(
        flops=N * n_dec * (12 * T * d * d + 4 * S * d * d + 4 * T * T * d
                           + 4 * T * S * d + 4 * T * d * ff) + N * 2 * T * d * cpad,
        transcendentals=N * n_dec * H * (T * T + T * S),
        bytes_accessed=N * (n_dec * (8 * d * d + 2 * d * ff) * 2 + d * cpad * 2
                            + 4 * (T * d + S * d + T * cpad)))

    logits_padded = pl.pallas_call(
        functools.partial(_decoder_kernel, nhead=nhead, n_layers=n_dec,
                          causal=training),
        grid=(N, n_dec),
        in_specs=[
            _batch_spec((T, d)), _batch_spec((S, d)),          # tgt, memory
            _layer_spec((3, d, d)), _layer_spec((3, 1, d)),    # self-attn wqkv/b
            _layer_spec((d, d)), _layer_spec((1, d)),          # self-attn wo/bo
            _layer_spec((1, d)), _layer_spec((1, d)),          # ln1 g/b
            _layer_spec((3, d, d)), _layer_spec((3, 1, d)),    # cross-attn wqkv/b
            _layer_spec((d, d)), _layer_spec((1, d)),          # cross-attn wo/bo
            _layer_spec((1, d)), _layer_spec((1, d)),          # ln2 g/b
            _layer_spec((d, ff)), _layer_spec((1, ff)),        # w1, b1
            _layer_spec((ff, d)), _layer_spec((1, d)),         # w2, b2
            _layer_spec((1, d)), _layer_spec((1, d)),          # ln3 g/b
            _shared_spec((1, d)), _shared_spec((1, d)),        # final norm g/b
            _shared_spec((d, cpad)), _shared_spec((1, cpad)),  # classifier
        ],
        out_specs=_batch_spec((T, cpad)),
        out_shape=jax.ShapeDtypeStruct((N, T, cpad), jnp.float32),
        scratch_shapes=[pltpu.VMEM((T, d), jnp.float32)],
        compiler_params=cparams,
        cost_estimate=dec_cost,
    )(yb, mem,
      params["d_sa_wqkv"], params["d_sa_bqkv"], params["d_sa_wo"], params["d_sa_bo"],
      params["d_ln1g"], params["d_ln1b"],
      params["d_ca_wqkv"], params["d_ca_bqkv"], params["d_ca_wo"], params["d_ca_bo"],
      params["d_ln2g"], params["d_ln2b"],
      params["d_w1"], params["d_b1"], params["d_w2"], params["d_b2"],
      params["d_ln3g"], params["d_ln3b"],
      params["dec_ng"], params["dec_nb"],
      params["cls_w"], params["cls_b"])

    logits = logits_padded[:, :, :num_classes]                 # (N, T, C)
    return jnp.transpose(logits, (1, 0, 2))                    # (T, N, C)


# ------------------------------ initialization ------------------------------ #

def _uniform(key, shape, bound):
    return jax.random.uniform(key, shape, jnp.float32, -bound, bound)


def _init_mha(key, d):
    k1, k2 = jax.random.split(key)
    bound = 1.0 / math.sqrt(d)
    wqkv = _uniform(k1, (3, d, d), bound)          # leading-axis Q/K/V, (in, out)
    bqkv = jnp.zeros((3, 1, d), jnp.float32)
    wo = _uniform(k2, (d, d), bound)
    bo = jnp.zeros((1, d), jnp.float32)
    return wqkv, bqkv, wo, bo


def _init_linear(key, fan_in, fan_out):
    k1, k2 = jax.random.split(key)
    bound = 1.0 / math.sqrt(fan_in)
    return _uniform(k1, (fan_in, fan_out), bound), _uniform(k2, (1, fan_out), bound)


def init_transformer_params(key, num_classes, d_model, num_enc, num_dec, dim_ff):
    d = d_model
    cpad = ((num_classes + _LANE - 1) // _LANE) * _LANE        # lane-dense classifier
    ln_g = jnp.ones((1, d), jnp.float32)
    ln_b = jnp.zeros((1, d), jnp.float32)
    keys = jax.random.split(key, num_enc + num_dec + 1)

    def enc_layer(k):
        k1, k2, k3 = jax.random.split(k, 3)
        wqkv, bqkv, wo, bo = _init_mha(k1, d)
        w1, b1 = _init_linear(k2, d, dim_ff)
        w2, b2 = _init_linear(k3, dim_ff, d)
        return (wqkv, bqkv, wo, bo, ln_g, ln_b, w1, b1, w2, b2, ln_g, ln_b)

    def dec_layer(k):
        k1, k2, k3, k4 = jax.random.split(k, 4)
        sa = _init_mha(k1, d)
        ca = _init_mha(k2, d)
        w1, b1 = _init_linear(k3, d, dim_ff)
        w2, b2 = _init_linear(k4, dim_ff, d)
        return (*sa, ln_g, ln_b, *ca, ln_g, ln_b, w1, b1, w2, b2, ln_g, ln_b)

    enc_layers = [enc_layer(keys[i]) for i in range(num_enc)]
    dec_layers = [dec_layer(keys[num_enc + i]) for i in range(num_dec)]

    cls_w, cls_b = _init_linear(keys[-1], d, num_classes)
    cls_w_p = jnp.zeros((d, cpad), jnp.float32).at[:, :num_classes].set(cls_w)
    cls_b_p = jnp.zeros((1, cpad), jnp.float32).at[:, :num_classes].set(cls_b)

    enc_keys = ("e_wqkv", "e_bqkv", "e_wo", "e_bo", "e_ln1g", "e_ln1b",
                "e_w1", "e_b1", "e_w2", "e_b2", "e_ln2g", "e_ln2b")
    dec_keys = ("d_sa_wqkv", "d_sa_bqkv", "d_sa_wo", "d_sa_bo", "d_ln1g", "d_ln1b",
                "d_ca_wqkv", "d_ca_bqkv", "d_ca_wo", "d_ca_bo", "d_ln2g", "d_ln2b",
                "d_w1", "d_b1", "d_w2", "d_b2", "d_ln3g", "d_ln3b")
    matmul_weights = {"e_wqkv", "e_wo", "e_w1", "e_w2",
                      "d_sa_wqkv", "d_sa_wo", "d_ca_wqkv", "d_ca_wo",
                      "d_w1", "d_w2"}

    params = {}
    for j, name in enumerate(enc_keys):
        arr = jnp.stack([layer[j] for layer in enc_layers])
        params[name] = arr.astype(jnp.bfloat16) if name in matmul_weights else arr
    for j, name in enumerate(dec_keys):
        arr = jnp.stack([layer[j] for layer in dec_layers])
        params[name] = arr.astype(jnp.bfloat16) if name in matmul_weights else arr
    params.update(enc_ng=ln_g, enc_nb=ln_b, dec_ng=ln_g, dec_nb=ln_b,
                  cls_w=cls_w_p.astype(jnp.bfloat16), cls_b=cls_b_p)
    return params


# ----------------------------------- main ------------------------------------ #

if __name__ == "__main__":
    num_classes = 10
    d_model = 32
    nhead = 4
    num_encoder_layers = 2
    num_decoder_layers = 2
    dim_feedforward = 64
    S, T, N = 8, 8, 2  # src len, tgt len, batch

    key = jax.random.PRNGKey(0)
    kp, kx, ky = jax.random.split(key, 3)
    params = init_transformer_params(kp, num_classes, d_model,
                                     num_encoder_layers, num_decoder_layers,
                                     dim_feedforward)
    x = jax.random.normal(kx, (S, N, d_model), jnp.float32)   # src
    y = jax.random.normal(ky, (T, N, d_model), jnp.float32)   # tgt

    fwd = jax.jit(transformer_forward,
                  static_argnames=("nhead", "num_classes", "training"))

    # eval-mode forward (tgt_mask=None), as module.eval() forward
    out_eval = jax.block_until_ready(
        fwd(params, x, y, nhead=nhead, num_classes=num_classes, training=False))
    # training-mode forward: causal tgt_mask applied (dropout omitted, see TODO)
    out_train = jax.block_until_ready(
        fwd(params, x, y, nhead=nhead, num_classes=num_classes, training=True))

    assert out_eval.shape == (T, N, num_classes)
    assert out_train.shape == (T, N, num_classes)
    assert bool(jnp.all(jnp.isfinite(out_eval)))
    assert bool(jnp.all(jnp.isfinite(out_train)))

    print("KERNEL_OK")
</pallas_src>

<mosaic_0001>
module attributes {stable_mosaic.version = 11 : i64} {
  func.func @_encoder_kernel(%arg0: i32, %arg1: i32, %arg2: memref<1x8x32xf32, #tpu.memory_space<vmem>>, %arg3: memref<1x3x32x32xbf16, #tpu.memory_space<vmem>>, %arg4: memref<1x3x1x32xf32, #tpu.memory_space<vmem>>, %arg5: memref<1x32x32xbf16, #tpu.memory_space<vmem>>, %arg6: memref<1x1x32xf32, #tpu.memory_space<vmem>>, %arg7: memref<1x1x32xf32, #tpu.memory_space<vmem>>, %arg8: memref<1x1x32xf32, #tpu.memory_space<vmem>>, %arg9: memref<1x32x64xbf16, #tpu.memory_space<vmem>>, %arg10: memref<1x1x64xf32, #tpu.memory_space<vmem>>, %arg11: memref<1x64x32xbf16, #tpu.memory_space<vmem>>, %arg12: memref<1x1x32xf32, #tpu.memory_space<vmem>>, %arg13: memref<1x1x32xf32, #tpu.memory_space<vmem>>, %arg14: memref<1x1x32xf32, #tpu.memory_space<vmem>>, %arg15: memref<1x32xf32, #tpu.memory_space<vmem>>, %arg16: memref<1x32xf32, #tpu.memory_space<vmem>>, %arg17: memref<1x8x32xf32, #tpu.memory_space<vmem>>, %arg18: memref<8x32xf32, #tpu.memory_space<vmem>>) attributes {dimension_semantics = [#tpu.dimension_semantics<parallel>, #tpu.dimension_semantics<arbitrary>], iteration_bounds = array<i64: 2, 2>, scalar_prefetch = 0 : i64, scratch_operands = 1 : i64, tpu.core_type = #tpu.core_type<tc>, window_params = [{transform_indices = @transform_0, window_bounds = array<i64: 1, 8, 32>}, {transform_indices = @transform_1, window_bounds = array<i64: 1, 3, 32, 32>}, {transform_indices = @transform_2, window_bounds = array<i64: 1, 3, 1, 32>}, {transform_indices = @transform_3, window_bounds = array<i64: 1, 32, 32>}, {transform_indices = @transform_4, window_bounds = array<i64: 1, 1, 32>}, {transform_indices = @transform_5, window_bounds = array<i64: 1, 1, 32>}, {transform_indices = @transform_6, window_bounds = array<i64: 1, 1, 32>}, {transform_indices = @transform_7, window_bounds = array<i64: 1, 32, 64>}, {transform_indices = @transform_8, window_bounds = array<i64: 1, 1, 64>}, {transform_indices = @transform_9, window_bounds = array<i64: 1, 64, 32>}, {transform_indices = @transform_10, window_bounds = array<i64: 1, 1, 32>}, {transform_indices = @transform_11, window_bounds = array<i64: 1, 1, 32>}, {transform_indices = @transform_12, window_bounds = array<i64: 1, 1, 32>}, {pipeline_mode = #tpu.pipeline_mode<synchronous>, transform_indices = @transform_13, window_bounds = array<i64: 1, 32>}, {pipeline_mode = #tpu.pipeline_mode<synchronous>, transform_indices = @transform_14, window_bounds = array<i64: 1, 32>}, {transform_indices = @transform_15, window_bounds = array<i64: 1, 8, 32>}]} {
    %c0_i32 = arith.constant 0 : i32
    %0 = arith.cmpi eq, %arg1, %c0_i32 : i32
    %1 = arith.extui %0 : i1 to i32
    %c0_i32_0 = arith.constant 0 : i32
    %2 = arith.cmpi ne, %1, %c0_i32_0 : i32
    scf.if %2 {
      %c0_64 = arith.constant 0 : index
      %c0_65 = arith.constant 0 : index
      %c0_66 = arith.constant 0 : index
      %165 = vector.load %arg2[%c0_64, %c0_65, %c0_66] : memref<1x8x32xf32, #tpu.memory_space<vmem>>, vector<1x8x32xf32>
      %166 = vector.shape_cast %165 : vector<1x8x32xf32> to vector<8x32xf32>
      %c0_67 = arith.constant 0 : index
      %c0_68 = arith.constant 0 : index
      %167 = vector.load %arg18[%c0_67, %c0_68] : memref<8x32xf32, #tpu.memory_space<vmem>>, vector<8x32xf32>
      tpu.vector_store %arg18[%c0_67, %c0_68], %166 {strides = array<i32>} : memref<8x32xf32, #tpu.memory_space<vmem>>, vector<8x32xf32>,
    } else {
    }
    %c0 = arith.constant 0 : index
    %c0_1 = arith.constant 0 : index
    %3 = vector.load %arg18[%c0, %c0_1] : memref<8x32xf32, #tpu.memory_space<vmem>>, vector<8x32xf32>
    %c0_2 = arith.constant 0 : index
    %c0_3 = arith.constant 0 : index
    %c0_4 = arith.constant 0 : index
    %c0_5 = arith.constant 0 : index
    %4 = vector.load %arg3[%c0_2, %c0_3, %c0_4, %c0_5] : memref<1x3x32x32xbf16, #tpu.memory_space<vmem>>, vector<1x3x32x32xbf16>
    %5 = vector.shape_cast %4 : vector<1x3x32x32xbf16> to vector<3x32x32xbf16>
    %c0_6 = arith.constant 0 : index
    %c0_7 = arith.constant 0 : index
    %c0_8 = arith.constant 0 : index
    %c0_9 = arith.constant 0 : index
    %6 = vector.load %arg4[%c0_6, %c0_7, %c0_8, %c0_9] : memref<1x3x1x32xf32, #tpu.memory_space<vmem>>, vector<1x3x1x32xf32>
    %7 = vector.shape_cast %6 : vector<1x3x1x32xf32> to vector<3x1x32xf32>
    %c0_10 = arith.constant 0 : index
    %c0_11 = arith.constant 0 : index
    %c0_12 = arith.constant 0 : index
    %8 = vector.load %arg5[%c0_10, %c0_11, %c0_12] : memref<1x32x32xbf16, #tpu.memory_space<vmem>>, vector<1x32x32xbf16>
    %9 = vector.shape_cast %8 : vector<1x32x32xbf16> to vector<32x32xbf16>
    %c0_13 = arith.constant 0 : index
    %c0_14 = arith.constant 0 : index
    %c0_15 = arith.constant 0 : index
    %10 = vector.load %arg6[%c0_13, %c0_14, %c0_15] : memref<1x1x32xf32, #tpu.memory_space<vmem>>, vector<1x1x32xf32>
    %11 = vector.shape_cast %10 : vector<1x1x32xf32> to vector<1x32xf32>
    %12 = arith.truncf %3 : vector<8x32xf32> to vector<8x32xbf16>
    %13 = arith.truncf %3 : vector<8x32xf32> to vector<8x32xbf16>
    %14 = vector.extract_strided_slice %5 {offsets = [0, 0, 0], sizes = [1, 32, 32], strides = [1, 1, 1]} : vector<3x32x32xbf16> to vector<1x32x32xbf16>
    %15 = vector.shape_cast %14 : vector<1x32x32xbf16> to vector<32x32xbf16>
    %cst = arith.constant dense<0.000000e+00> : vector<8x32xf32>
    %16 = tpu.matmul %12, %15, %cst {dimension_numbers = #tpu.dot_dimension_numbers<[1], [0], [0], [1], [0, 0, 1, 1], [], []>} : vector<8x32xbf16>, vector<32x32xbf16>, vector<8x32xf32> -> vector<8x32xf32>
    %17 = vector.extract_strided_slice %7 {offsets = [0, 0, 0], sizes = [1, 1, 32], strides = [1, 1, 1]} : vector<3x1x32xf32> to vector<1x1x32xf32>
    %18 = vector.shape_cast %17 : vector<1x1x32xf32> to vector<1x32xf32>
    %19 = vector.broadcast %18 : vector<1x32xf32> to vector<8x32xf32>
    %20 = arith.addf %16, %19 : vector<8x32xf32>
    %21 = vector.extract_strided_slice %5 {offsets = [1, 0, 0], sizes = [1, 32, 32], strides = [1, 1, 1]} : vector<3x32x32xbf16> to vector<1x32x32xbf16>
    %22 = vector.shape_cast %21 : vector<1x32x32xbf16> to vector<32x32xbf16>
    %cst_16 = arith.constant dense<0.000000e+00> : vector<8x32xf32>
    %23 = tpu.matmul %13, %22, %cst_16 {dimension_numbers = #tpu.dot_dimension_numbers<[1], [0], [0], [1], [0, 0, 1, 1], [], []>} : vector<8x32xbf16>, vector<32x32xbf16>, vector<8x32xf32> -> vector<8x32xf32>
    %24 = vector.extract_strided_slice %7 {offsets = [1, 0, 0], sizes = [1, 1, 32], strides = [1, 1, 1]} : vector<3x1x32xf32> to vector<1x1x32xf32>
    %25 = vector.shape_cast %24 : vector<1x1x32xf32> to vector<1x32xf32>
    %26 = vector.broadcast %25 : vector<1x32xf32> to vector<8x32xf32>
    %27 = arith.addf %23, %26 : vector<8x32xf32>
    %28 = vector.extract_strided_slice %5 {offsets = [2, 0, 0], sizes = [1, 32, 32], strides = [1, 1, 1]} : vector<3x32x32xbf16> to vector<1x32x32xbf16>
    %29 = vector.shape_cast %28 : vector<1x32x32xbf16> to vector<32x32xbf16>
    %cst_17 = arith.constant dense<0.000000e+00> : vector<8x32xf32>
    %30 = tpu.matmul %13, %29, %cst_17 {dimension_numbers = #tpu.dot_dimension_numbers<[1], [0], [0], [1], [0, 0, 1, 1], [], []>} : vector<8x32xbf16>, vector<32x32xbf16>, vector<8x32xf32> -> vector<8x32xf32>
    %31 = vector.extract_strided_slice %7 {offsets = [2, 0, 0], sizes = [1, 1, 32], strides = [1, 1, 1]} : vector<3x1x32xf32> to vector<1x1x32xf32>
    %32 = vector.shape_cast %31 : vector<1x1x32xf32> to vector<1x32xf32>
    %33 = vector.broadcast %32 : vector<1x32xf32> to vector<8x32xf32>
    %34 = arith.addf %30, %33 : vector<8x32xf32>
    %35 = vector.extract_strided_slice %20 {offsets = [0, 0], sizes = [8, 8], strides = [1, 1]} : vector<8x32xf32> to vector<8x8xf32>
    %36 = vector.extract_strided_slice %20 {offsets = [0, 8], sizes = [8, 8], strides = [1, 1]} : vector<8x32xf32> to vector<8x8xf32>
    %37 = vector.extract_strided_slice %20 {offsets = [0, 16], sizes = [8, 8], strides = [1, 1]} : vector<8x32xf32> to vector<8x8xf32>
    %38 = vector.extract_strided_slice %20 {offsets = [0, 24], sizes = [8, 8], strides = [1, 1]} : vector<8x32xf32> to vector<8x8xf32>
    %39 = vector.shape_cast %35 : vector<8x8xf32> to vector<1x8x8xf32>
    %40 = vector.shape_cast %36 : vector<8x8xf32> to vector<1x8x8xf32>
    %41 = vector.shape_cast %37 : vector<8x8xf32> to vector<1x8x8xf32>
    %42 = vector.shape_cast %38 : vector<8x8xf32> to vector<1x8x8xf32>
    %43 = tpu.concatenate %39, %40, %41, %42 in 0 : vector<1x8x8xf32>, vector<1x8x8xf32>, vector<1x8x8xf32>, vector<1x8x8xf32> -> vector<4x8x8xf32>
    %44 = arith.truncf %43 : vector<4x8x8xf32> to vector<4x8x8xbf16>
    %45 = vector.extract_strided_slice %27 {offsets = [0, 0], sizes = [8, 8], strides = [1, 1]} : vector<8x32xf32> to vector<8x8xf32>
    %46 = vector.extract_strided_slice %27 {offsets = [0, 8], sizes = [8, 8], strides = [1, 1]} : vector<8x32xf32> to vector<8x8xf32>
    %47 = vector.extract_strided_slice %27 {offsets = [0, 16], sizes = [8, 8], strides = [1, 1]} : vector<8x32xf32> to vector<8x8xf32>
    %48 = vector.extract_strided_slice %27 {offsets = [0, 24], sizes = [8, 8], strides = [1, 1]} : vector<8x32xf32> to vector<8x8xf32>
    %49 = vector.shape_cast %45 : vector<8x8xf32> to vector<1x8x8xf32>
    %50 = vector.shape_cast %46 : vector<8x8xf32> to vector<1x8x8xf32>
    %51 = vector.shape_cast %47 : vector<8x8xf32> to vector<1x8x8xf32>
    %52 = vector.shape_cast %48 : vector<8x8xf32> to vector<1x8x8xf32>
    %53 = tpu.concatenate %49, %50, %51, %52 in 0 : vector<1x8x8xf32>, vector<1x8x8xf32>, vector<1x8x8xf32>, vector<1x8x8xf32> -> vector<4x8x8xf32>
    %54 = arith.truncf %53 : vector<4x8x8xf32> to vector<4x8x8xbf16>
    %55 = vector.extract_strided_slice %34 {offsets = [0, 0], sizes = [8, 8], strides = [1, 1]} : vector<8x32xf32> to vector<8x8xf32>
    %56 = vector.extract_strided_slice %34 {offsets = [0, 8], sizes = [8, 8], strides = [1, 1]} : vector<8x32xf32> to vector<8x8xf32>
    %57 = vector.extract_strided_slice %34 {offsets = [0, 16], sizes = [8, 8], strides = [1, 1]} : vector<8x32xf32> to vector<8x8xf32>
    %58 = vector.extract_strided_slice %34 {offsets = [0, 24], sizes = [8, 8], strides = [1, 1]} : vector<8x32xf32> to vector<8x8xf32>
    %59 = vector.shape_cast %55 : vector<8x8xf32> to vector<1x8x8xf32>
    %60 = vector.shape_cast %56 : vector<8x8xf32> to vector<1x8x8xf32>
    %61 = vector.shape_cast %57 : vector<8x8xf32> to vector<1x8x8xf32>
    %62 = vector.shape_cast %58 : vector<8x8xf32> to vector<1x8x8xf32>
    %63 = tpu.concatenate %59, %60, %61, %62 in 0 : vector<1x8x8xf32>, vector<1x8x8xf32>, vector<1x8x8xf32>, vector<1x8x8xf32> -> vector<4x8x8xf32>
    %64 = arith.truncf %63 : vector<4x8x8xf32> to vector<4x8x8xbf16>
    "tpu.trace_start"() <{level = 10 : i32, message = "hqd,hkd->hqk"}> : () -> ()
    %cst_18 = arith.constant dense<0.000000e+00> : vector<4x8x8xf32>
    %65 = tpu.matmul %44, %54, %cst_18 {dimension_numbers = #tpu.dot_dimension_numbers<[2], [2], [1], [1], [0, 0, 0, 1, 1, 1], [0], [0]>} : vector<4x8x8xbf16>, vector<4x8x8xbf16>, vector<4x8x8xf32> -> vector<4x8x8xf32>
    "tpu.trace_stop"() : () -> ()
    %cst_19 = arith.constant 0.353553385 : f32
    %66 = vector.broadcast %cst_19 : f32 to vector<4x8x8xf32>
    %67 = arith.mulf %65, %66 : vector<4x8x8xf32>
    %cst_20 = arith.constant dense<0xFF800000> : vector<4x8xf32>
    %68 = vector.multi_reduction <maximumf>, %67, %cst_20 [2] : vector<4x8x8xf32> to vector<4x8xf32>
    %69 = vector.shape_cast %68 : vector<4x8xf32> to vector<4x8x1xf32>
    %70 = vector.broadcast %69 : vector<4x8x1xf32> to vector<4x8x8xf32>
    %71 = arith.subf %67, %70 : vector<4x8x8xf32>
    %72 = math.exp %71 : vector<4x8x8xf32>
    %cst_21 = arith.constant dense<0.000000e+00> : vector<4x8xf32>
    %73 = vector.multi_reduction <add>, %72, %cst_21 [2] : vector<4x8x8xf32> to vector<4x8xf32>
    %74 = vector.shape_cast %73 : vector<4x8xf32> to vector<4x8x1xf32>
    %75 = tpu.reciprocal %74 {approx = true} : vector<4x8x1xf32> -> vector<4x8x1xf32>
    %76 = vector.broadcast %75 : vector<4x8x1xf32> to vector<4x8x8xf32>
    %77 = arith.mulf %72, %76 : vector<4x8x8xf32>
    %78 = arith.truncf %77 : vector<4x8x8xf32> to vector<4x8x8xbf16>
    "tpu.trace_start"() <{level = 10 : i32, message = "hqk,hkd->hqd"}> : () -> ()
    %cst_22 = arith.constant dense<0.000000e+00> : vector<4x8x8xf32>
    %79 = tpu.matmul %78, %64, %cst_22 {dimension_numbers = #tpu.dot_dimension_numbers<[2], [1], [1], [2], [0, 0, 0, 1, 1, 2], [0], [0]>} : vector<4x8x8xbf16>, vector<4x8x8xbf16>, vector<4x8x8xf32> -> vector<4x8x8xf32>
    "tpu.trace_stop"() : () -> ()
    %80 = vector.extract_strided_slice %79 {offsets = [0, 0, 0], sizes = [1, 8, 8], strides = [1, 1, 1]} : vector<4x8x8xf32> to vector<1x8x8xf32>
    %81 = vector.shape_cast %80 : vector<1x8x8xf32> to vector<8x8xf32>
    %82 = vector.extract_strided_slice %79 {offsets = [1, 0, 0], sizes = [1, 8, 8], strides = [1, 1, 1]} : vector<4x8x8xf32> to vector<1x8x8xf32>
    %83 = vector.shape_cast %82 : vector<1x8x8xf32> to vector<8x8xf32>
    %84 = vector.extract_strided_slice %79 {offsets = [2, 0, 0], sizes = [1, 8, 8], strides = [1, 1, 1]} : vector<4x8x8xf32> to vector<1x8x8xf32>
    %85 = vector.shape_cast %84 : vector<1x8x8xf32> to vector<8x8xf32>
    %86 = vector.extract_strided_slice %79 {offsets = [3, 0, 0], sizes = [1, 8, 8], strides = [1, 1, 1]} : vector<4x8x8xf32> to vector<1x8x8xf32>
    %87 = vector.shape_cast %86 : vector<1x8x8xf32> to vector<8x8xf32>
    %88 = tpu.concatenate %81, %83, %85, %87 in 1 : vector<8x8xf32>, vector<8x8xf32>, vector<8x8xf32>, vector<8x8xf32> -> vector<8x32xf32>
    %89 = arith.truncf %88 : vector<8x32xf32> to vector<8x32xbf16>
    %cst_23 = arith.constant dense<0.000000e+00> : vector<8x32xf32>
    %90 = tpu.matmul %89, %9, %cst_23 {dimension_numbers = #tpu.dot_dimension_numbers<[1], [0], [0], [1], [0, 0, 1, 1], [], []>} : vector<8x32xbf16>, vector<32x32xbf16>, vector<8x32xf32> -> vector<8x32xf32>
    %91 = vector.broadcast %11 : vector<1x32xf32> to vector<8x32xf32>
    %92 = arith.addf %90, %91 : vector<8x32xf32>
    %93 = arith.addf %3, %92 : vector<8x32xf32>
    %c0_24 = arith.constant 0 : index
    %c0_25 = arith.constant 0 : index
    %c0_26 = arith.constant 0 : index
    %94 = vector.load %arg7[%c0_24, %c0_25, %c0_26] : memref<1x1x32xf32, #tpu.memory_space<vmem>>, vector<1x1x32xf32>
    %95 = vector.shape_cast %94 : vector<1x1x32xf32> to vector<1x32xf32>
    %c0_27 = arith.constant 0 : index
    %c0_28 = arith.constant 0 : index
    %c0_29 = arith.constant 0 : index
    %96 = vector.load %arg8[%c0_27, %c0_28, %c0_29] : memref<1x1x32xf32, #tpu.memory_space<vmem>>, vector<1x1x32xf32>
    %97 = vector.shape_cast %96 : vector<1x1x32xf32> to vector<1x32xf32>
    %cst_30 = arith.constant dense<0.000000e+00> : vector<8xf32>
    %98 = vector.multi_reduction <add>, %93, %cst_30 [1] : vector<8x32xf32> to vector<8xf32>
    %99 = vector.shape_cast %98 : vector<8xf32> to vector<8x1xf32>
    %cst_31 = arith.constant 3.200000e+01 : f32
    %100 = vector.broadcast %cst_31 : f32 to vector<8x1xf32>
    %101 = arith.divf %99, %100 : vector<8x1xf32>
    %102 = vector.broadcast %101 : vector<8x1xf32> to vector<8x32xf32>
    %103 = arith.subf %93, %102 : vector<8x32xf32>
    %104 = arith.mulf %103, %103 : vector<8x32xf32>
    %cst_32 = arith.constant dense<0.000000e+00> : vector<8xf32>
    %105 = vector.multi_reduction <add>, %104, %cst_32 [1] : vector<8x32xf32> to vector<8xf32>
    %106 = vector.shape_cast %105 : vector<8xf32> to vector<8x1xf32>
    %cst_33 = arith.constant 3.200000e+01 : f32
    %107 = vector.broadcast %cst_33 : f32 to vector<8x1xf32>
    %108 = arith.divf %106, %107 : vector<8x1xf32>
    %cst_34 = arith.constant 9.99999974E-6 : f32
    %109 = vector.broadcast %cst_34 : f32 to vector<8x1xf32>
    %110 = arith.addf %108, %109 : vector<8x1xf32>
    %111 = math.rsqrt %110 : vector<8x1xf32>
    %112 = vector.broadcast %111 : vector<8x1xf32> to vector<8x32xf32>
    %113 = arith.mulf %103, %112 : vector<8x32xf32>
    %114 = vector.broadcast %95 : vector<1x32xf32> to vector<8x32xf32>
    %115 = arith.mulf %113, %114 : vector<8x32xf32>
    %116 = vector.broadcast %97 : vector<1x32xf32> to vector<8x32xf32>
    %117 = arith.addf %115, %116 : vector<8x32xf32>
    %c0_35 = arith.constant 0 : index
    %c0_36 = arith.constant 0 : index
    %c0_37 = arith.constant 0 : index
    %118 = vector.load %arg9[%c0_35, %c0_36, %c0_37] : memref<1x32x64xbf16, #tpu.memory_space<vmem>>, vector<1x32x64xbf16>
    %119 = vector.shape_cast %118 : vector<1x32x64xbf16> to vector<32x64xbf16>
    %c0_38 = arith.constant 0 : index
    %c0_39 = arith.constant 0 : index
    %c0_40 = arith.constant 0 : index
    %120 = vector.load %arg10[%c0_38, %c0_39, %c0_40] : memref<1x1x64xf32, #tpu.memory_space<vmem>>, vector<1x1x64xf32>
    %121 = vector.shape_cast %120 : vector<1x1x64xf32> to vector<1x64xf32>
    %122 = arith.truncf %117 : vector<8x32xf32> to vector<8x32xbf16>
    %cst_41 = arith.constant dense<0.000000e+00> : vector<8x64xf32>
    %123 = tpu.matmul %122, %119, %cst_41 {dimension_numbers = #tpu.dot_dimension_numbers<[1], [0], [0], [1], [0, 0, 1, 1], [], []>} : vector<8x32xbf16>, vector<32x64xbf16>, vector<8x64xf32> -> vector<8x64xf32>
    %124 = vector.broadcast %121 : vector<1x64xf32> to vector<8x64xf32>
    %125 = arith.addf %123, %124 : vector<8x64xf32>
    %cst_42 = arith.constant 0.000000e+00 : f32
    %126 = vector.broadcast %cst_42 : f32 to vector<8x64xf32>
    %127 = arith.maximumf %125, %126 : vector<8x64xf32>
    %c0_43 = arith.constant 0 : index
    %c0_44 = arith.constant 0 : index
    %c0_45 = arith.constant 0 : index
    %128 = vector.load %arg11[%c0_43, %c0_44, %c0_45] : memref<1x64x32xbf16, #tpu.memory_space<vmem>>, vector<1x64x32xbf16>
    %129 = vector.shape_cast %128 : vector<1x64x32xbf16> to vector<64x32xbf16>
    %c0_46 = arith.constant 0 : index
    %c0_47 = arith.constant 0 : index
    %c0_48 = arith.constant 0 : index
    %130 = vector.load %arg12[%c0_46, %c0_47, %c0_48] : memref<1x1x32xf32, #tpu.memory_space<vmem>>, vector<1x1x32xf32>
    %131 = vector.shape_cast %130 : vector<1x1x32xf32> to vector<1x32xf32>
    %132 = arith.truncf %127 : vector<8x64xf32> to vector<8x64xbf16>
    %cst_49 = arith.constant dense<0.000000e+00> : vector<8x32xf32>
    %133 = tpu.matmul %132, %129, %cst_49 {dimension_numbers = #tpu.dot_dimension_numbers<[1], [0], [0], [1], [0, 0, 1, 1], [], []>} : vector<8x64xbf16>, vector<64x32xbf16>, vector<8x32xf32> -> vector<8x32xf32>
    %134 = vector.broadcast %131 : vector<1x32xf32> to vector<8x32xf32>
    %135 = arith.addf %133, %134 : vector<8x32xf32>
    %136 = arith.addf %117, %135 : vector<8x32xf32>
    %c0_50 = arith.constant 0 : index
    %c0_51 = arith.constant 0 : index
    %c0_52 = arith.constant 0 : index
    %137 = vector.load %arg13[%c0_50, %c0_51, %c0_52] : memref<1x1x32xf32, #tpu.memory_space<vmem>>, vector<1x1x32xf32>
    %138 = vector.shape_cast %137 : vector<1x1x32xf32> to vector<1x32xf32>
    %c0_53 = arith.constant 0 : index
    %c0_54 = arith.constant 0 : index
    %c0_55 = arith.constant 0 : index
    %139 = vector.load %arg14[%c0_53, %c0_54, %c0_55] : memref<1x1x32xf32, #tpu.memory_space<vmem>>, vector<1x1x32xf32>
    %140 = vector.shape_cast %139 : vector<1x1x32xf32> to vector<1x32xf32>
    %cst_56 = arith.constant dense<0.000000e+00> : vector<8xf32>
    %141 = vector.multi_reduction <add>, %136, %cst_56 [1] : vector<8x32xf32> to vector<8xf32>
    %142 = vector.shape_cast %141 : vector<8xf32> to vector<8x1xf32>
    %cst_57 = arith.constant 3.200000e+01 : f32
    %143 = vector.broadcast %cst_57 : f32 to vector<8x1xf32>
    %144 = arith.divf %142, %143 : vector<8x1xf32>
    %145 = vector.broadcast %144 : vector<8x1xf32> to vector<8x32xf32>
    %146 = arith.subf %136, %145 : vector<8x32xf32>
    %147 = arith.mulf %146, %146 : vector<8x32xf32>
    %cst_58 = arith.constant dense<0.000000e+00> : vector<8xf32>
    %148 = vector.multi_reduction <add>, %147, %cst_58 [1] : vector<8x32xf32> to vector<8xf32>
    %149 = vector.shape_cast %148 : vector<8xf32> to vector<8x1xf32>
    %cst_59 = arith.constant 3.200000e+01 : f32
    %150 = vector.broadcast %cst_59 : f32 to vector<8x1xf32>
    %151 = arith.divf %149, %150 : vector<8x1xf32>
    %cst_60 = arith.constant 9.99999974E-6 : f32
    %152 = vector.broadcast %cst_60 : f32 to vector<8x1xf32>
    %153 = arith.addf %151, %152 : vector<8x1xf32>
    %154 = math.rsqrt %153 : vector<8x1xf32>
    %155 = vector.broadcast %154 : vector<8x1xf32> to vector<8x32xf32>
    %156 = arith.mulf %146, %155 : vector<8x32xf32>
    %157 = vector.broadcast %138 : vector<1x32xf32> to vector<8x32xf32>
    %158 = arith.mulf %156, %157 : vector<8x32xf32>
    %159 = vector.broadcast %140 : vector<1x32xf32> to vector<8x32xf32>
    %160 = arith.addf %158, %159 : vector<8x32xf32>
    %c0_61 = arith.constant 0 : index
    %c0_62 = arith.constant 0 : index
    %161 = vector.load %arg18[%c0_61, %c0_62] : memref<8x32xf32, #tpu.memory_space<vmem>>, vector<8x32xf32>
    tpu.vector_store %arg18[%c0_61, %c0_62], %160 {strides = array<i32>} : memref<8x32xf32, #tpu.memory_space<vmem>>, vector<8x32xf32>,
    %c1_i32 = arith.constant 1 : i32
    %162 = arith.cmpi eq, %arg1, %c1_i32 : i32
    %163 = arith.extui %162 : i1 to i32
    %c0_i32_63 = arith.constant 0 : i32
    %164 = arith.cmpi ne, %163, %c0_i32_63 : i32
    scf.if %164 {
      %c0_64 = arith.constant 0 : index
      %c0_65 = arith.constant 0 : index
      %165 = vector.load %arg15[%c0_64, %c0_65] : memref<1x32xf32, #tpu.memory_space<vmem>>, vector<1x32xf32>
      %c0_66 = arith.constant 0 : index
      %c0_67 = arith.constant 0 : index
      %166 = vector.load %arg16[%c0_66, %c0_67] : memref<1x32xf32, #tpu.memory_space<vmem>>, vector<1x32xf32>
      %cst_68 = arith.constant dense<0.000000e+00> : vector<8xf32>
      %167 = vector.multi_reduction <add>, %160, %cst_68 [1] : vector<8x32xf32> to vector<8xf32>
      %168 = vector.shape_cast %167 : vector<8xf32> to vector<8x1xf32>
      %cst_69 = arith.constant 3.200000e+01 : f32
      %169 = vector.broadcast %cst_69 : f32 to vector<8x1xf32>
      %170 = arith.divf %168, %169 : vector<8x1xf32>
      %171 = vector.broadcast %170 : vector<8x1xf32> to vector<8x32xf32>
      %172 = arith.subf %160, %171 : vector<8x32xf32>
      %173 = arith.mulf %172, %172 : vector<8x32xf32>
      %cst_70 = arith.constant dense<0.000000e+00> : vector<8xf32>
      %174 = vector.multi_reduction <add>, %173, %cst_70 [1] : vector<8x32xf32> to vector<8xf32>
      %175 = vector.shape_cast %174 : vector<8xf32> to vector<8x1xf32>
      %cst_71 = arith.constant 3.200000e+01 : f32
      %176 = vector.broadcast %cst_71 : f32 to vector<8x1xf32>
      %177 = arith.divf %175, %176 : vector<8x1xf32>
      %cst_72 = arith.constant 9.99999974E-6 : f32
      %178 = vector.broadcast %cst_72 : f32 to vector<8x1xf32>
      %179 = arith.addf %177, %178 : vector<8x1xf32>
      %180 = math.rsqrt %179 : vector<8x1xf32>
      %181 = vector.broadcast %180 : vector<8x1xf32> to vector<8x32xf32>
      %182 = arith.mulf %172, %181 : vector<8x32xf32>
      %183 = vector.broadcast %165 : vector<1x32xf32> to vector<8x32xf32>
      %184 = arith.mulf %182, %183 : vector<8x32xf32>
      %185 = vector.broadcast %166 : vector<1x32xf32> to vector<8x32xf32>
      %186 = arith.addf %184, %185 : vector<8x32xf32>
      %c0_73 = arith.constant 0 : index
      %c0_74 = arith.constant 0 : index
      %c0_75 = arith.constant 0 : index
      %187 = vector.load %arg17[%c0_73, %c0_74, %c0_75] : memref<1x8x32xf32, #tpu.memory_space<vmem>>, vector<1x8x32xf32>
      %188 = vector.shape_cast %187 : vector<1x8x32xf32> to vector<8x32xf32>
      %189 = vector.shape_cast %186 : vector<8x32xf32> to vector<1x8x32xf32>
      tpu.vector_store %arg17[%c0_73, %c0_74, %c0_75], %189 {strides = array<i32>} : memref<1x8x32xf32, #tpu.memory_space<vmem>>, vector<1x8x32xf32>,
    } else {
    }
    return
  }
  func.func @transform_0(%arg0: i32, %arg1: i32) -> (i32, i32, i32) {
    %c0_i32 = arith.constant 0 : i32
    %c0_i32_0 = arith.constant 0 : i32
    %c0_i32_1 = arith.constant 0 : i32
    return %arg0, %c0_i32, %c0_i32_0 : i32, i32, i32
  }
  func.func @transform_1(%arg0: i32, %arg1: i32) -> (i32, i32, i32, i32) {
    %c0_i32 = arith.constant 0 : i32
    %c0_i32_0 = arith.constant 0 : i32
    %c0_i32_1 = arith.constant 0 : i32
    %c0_i32_2 = arith.constant 0 : i32
    return %arg1, %c0_i32, %c0_i32_0, %c0_i32_1 : i32, i32, i32, i32
  }
  func.func @transform_2(%arg0: i32, %arg1: i32) -> (i32, i32, i32, i32) {
    %c0_i32 = arith.constant 0 : i32
    %c0_i32_0 = arith.constant 0 : i32
    %c0_i32_1 = arith.constant 0 : i32
    %c0_i32_2 = arith.constant 0 : i32
    return %arg1, %c0_i32, %c0_i32_0, %c0_i32_1 : i32, i32, i32, i32
  }
  func.func @transform_3(%arg0: i32, %arg1: i32) -> (i32, i32, i32) {
    %c0_i32 = arith.constant 0 : i32
    %c0_i32_0 = arith.constant 0 : i32
    %c0_i32_1 = arith.constant 0 : i32
    return %arg1, %c0_i32, %c0_i32_0 : i32, i32, i32
  }
  func.func @transform_4(%arg0: i32, %arg1: i32) -> (i32, i32, i32) {
    %c0_i32 = arith.constant 0 : i32
    %c0_i32_0 = arith.constant 0 : i32
    %c0_i32_1 = arith.constant 0 : i32
    return %arg1, %c0_i32, %c0_i32_0 : i32, i32, i32
  }
  func.func @transform_5(%arg0: i32, %arg1: i32) -> (i32, i32, i32) {
    %c0_i32 = arith.constant 0 : i32
    %c0_i32_0 = arith.constant 0 : i32
    %c0_i32_1 = arith.constant 0 : i32
    return %arg1, %c0_i32, %c0_i32_0 : i32, i32, i32
  }
  func.func @transform_6(%arg0: i32, %arg1: i32) -> (i32, i32, i32) {
    %c0_i32 = arith.constant 0 : i32
    %c0_i32_0 = arith.constant 0 : i32
    %c0_i32_1 = arith.constant 0 : i32
    return %arg1, %c0_i32, %c0_i32_0 : i32, i32, i32
  }
  func.func @transform_7(%arg0: i32, %arg1: i32) -> (i32, i32, i32) {
    %c0_i32 = arith.constant 0 : i32
    %c0_i32_0 = arith.constant 0 : i32
    %c0_i32_1 = arith.constant 0 : i32
    return %arg1, %c0_i32, %c0_i32_0 : i32, i32, i32
  }
  func.func @transform_8(%arg0: i32, %arg1: i32) -> (i32, i32, i32) {
    %c0_i32 = arith.constant 0 : i32
    %c0_i32_0 = arith.constant 0 : i32
    %c0_i32_1 = arith.constant 0 : i32
    return %arg1, %c0_i32, %c0_i32_0 : i32, i32, i32
  }
  func.func @transform_9(%arg0: i32, %arg1: i32) -> (i32, i32, i32) {
    %c0_i32 = arith.constant 0 : i32
    %c0_i32_0 = arith.constant 0 : i32
    %c0_i32_1 = arith.constant 0 : i32
    return %arg1, %c0_i32, %c0_i32_0 : i32, i32, i32
  }
  func.func @transform_10(%arg0: i32, %arg1: i32) -> (i32, i32, i32) {
    %c0_i32 = arith.constant 0 : i32
    %c0_i32_0 = arith.constant 0 : i32
    %c0_i32_1 = arith.constant 0 : i32
    return %arg1, %c0_i32, %c0_i32_0 : i32, i32, i32
  }
  func.func @transform_11(%arg0: i32, %arg1: i32) -> (i32, i32, i32) {
    %c0_i32 = arith.constant 0 : i32
    %c0_i32_0 = arith.constant 0 : i32
    %c0_i32_1 = arith.constant 0 : i32
    return %arg1, %c0_i32, %c0_i32_0 : i32, i32, i32
  }
  func.func @transform_12(%arg0: i32, %arg1: i32) -> (i32, i32, i32) {
    %c0_i32 = arith.constant 0 : i32
    %c0_i32_0 = arith.constant 0 : i32
    %c0_i32_1 = arith.constant 0 : i32
    return %arg1, %c0_i32, %c0_i32_0 : i32, i32, i32
  }
  func.func @transform_13(%arg0: i32, %arg1: i32) -> (i32, i32) {
    %c0_i32 = arith.constant 0 : i32
    %c0_i32_0 = arith.constant 0 : i32
    %c0_i32_1 = arith.constant 0 : i32
    return %c0_i32, %c0_i32_0 : i32, i32
  }
  func.func @transform_14(%arg0: i32, %arg1: i32) -> (i32, i32) {
    %c0_i32 = arith.constant 0 : i32
    %c0_i32_0 = arith.constant 0 : i32
    %c0_i32_1 = arith.constant 0 : i32
    return %c0_i32, %c0_i32_0 : i32, i32
  }
  func.func @transform_15(%arg0: i32, %arg1: i32) -> (i32, i32, i32) {
    %c0_i32 = arith.constant 0 : i32
    %c0_i32_0 = arith.constant 0 : i32
    %c0_i32_1 = arith.constant 0 : i32
    return %arg0, %c0_i32, %c0_i32_0 : i32, i32, i32
  }
}

module attributes {stable_mosaic.version = 11 : i64} {
  func.func @_decoder_kernel(%arg0: i32, %arg1: i32, %arg2: memref<1x8x32xf32, #tpu.memory_space<vmem>>, %arg3: memref<1x8x32xf32, #tpu.memory_space<vmem>>, %arg4: memref<1x3x32x32xbf16, #tpu.memory_space<vmem>>, %arg5: memref<1x3x1x32xf32, #tpu.memory_space<vmem>>, %arg6: memref<1x32x32xbf16, #tpu.memory_space<vmem>>, %arg7: memref<1x1x32xf32, #tpu.memory_space<vmem>>, %arg8: memref<1x1x32xf32, #tpu.memory_space<vmem>>, %arg9: memref<1x1x32xf32, #tpu.memory_space<vmem>>, %arg10: memref<1x3x32x32xbf16, #tpu.memory_space<vmem>>, %arg11: memref<1x3x1x32xf32, #tpu.memory_space<vmem>>, %arg12: memref<1x32x32xbf16, #tpu.memory_space<vmem>>, %arg13: memref<1x1x32xf32, #tpu.memory_space<vmem>>, %arg14: memref<1x1x32xf32, #tpu.memory_space<vmem>>, %arg15: memref<1x1x32xf32, #tpu.memory_space<vmem>>, %arg16: memref<1x32x64xbf16, #tpu.memory_space<vmem>>, %arg17: memref<1x1x64xf32, #tpu.memory_space<vmem>>, %arg18: memref<1x64x32xbf16, #tpu.memory_space<vmem>>, %arg19: memref<1x1x32xf32, #tpu.memory_space<vmem>>, %arg20: memref<1x1x32xf32, #tpu.memory_space<vmem>>, %arg21: memref<1x1x32xf32, #tpu.memory_space<vmem>>, %arg22: memref<1x32xf32, #tpu.memory_space<vmem>>, %arg23: memref<1x32xf32, #tpu.memory_space<vmem>>, %arg24: memref<32x128xbf16, #tpu.memory_space<vmem>>, %arg25: memref<1x128xf32, #tpu.memory_space<vmem>>, %arg26: memref<1x8x128xf32, #tpu.memory_space<vmem>>, %arg27: memref<8x32xf32, #tpu.memory_space<vmem>>) attributes {dimension_semantics = [#tpu.dimension_semantics<parallel>, #tpu.dimension_semantics<arbitrary>], iteration_bounds = array<i64: 2, 2>, scalar_prefetch = 0 : i64, scratch_operands = 1 : i64, tpu.core_type = #tpu.core_type<tc>, window_params = [{transform_indices = @transform_0, window_bounds = array<i64: 1, 8, 32>}, {transform_indices = @transform_1, window_bounds = array<i64: 1, 8, 32>}, {transform_indices = @transform_2, window_bounds = array<i64: 1, 3, 32, 32>}, {transform_indices = @transform_3, window_bounds = array<i64: 1, 3, 1, 32>}, {transform_indices = @transform_4, window_bounds = array<i64: 1, 32, 32>}, {transform_indices = @transform_5, window_bounds = array<i64: 1, 1, 32>}, {transform_indices = @transform_6, window_bounds = array<i64: 1, 1, 32>}, {transform_indices = @transform_7, window_bounds = array<i64: 1, 1, 32>}, {transform_indices = @transform_8, window_bounds = array<i64: 1, 3, 32, 32>}, {transform_indices = @transform_9, window_bounds = array<i64: 1, 3, 1, 32>}, {transform_indices = @transform_10, window_bounds = array<i64: 1, 32, 32>}, {transform_indices = @transform_11, window_bounds = array<i64: 1, 1, 32>}, {transform_indices = @transform_12, window_bounds = array<i64: 1, 1, 32>}, {transform_indices = @transform_13, window_bounds = array<i64: 1, 1, 32>}, {transform_indices = @transform_14, window_bounds = array<i64: 1, 32, 64>}, {transform_indices = @transform_15, window_bounds = array<i64: 1, 1, 64>}, {transform_indices = @transform_16, window_bounds = array<i64: 1, 64, 32>}, {transform_indices = @transform_17, window_bounds = array<i64: 1, 1, 32>}, {transform_indices = @transform_18, window_bounds = array<i64: 1, 1, 32>}, {transform_indices = @transform_19, window_bounds = array<i64: 1, 1, 32>}, {pipeline_mode = #tpu.pipeline_mode<synchronous>, transform_indices = @transform_20, window_bounds = array<i64: 1, 32>}, {pipeline_mode = #tpu.pipeline_mode<synchronous>, transform_indices = @transform_21, window_bounds = array<i64: 1, 32>}, {pipeline_mode = #tpu.pipeline_mode<synchronous>, transform_indices = @transform_22, window_bounds = array<i64: 32, 128>}, {pipeline_mode = #tpu.pipeline_mode<synchronous>, transform_indices = @transform_23, window_bounds = array<i64: 1, 128>}, {transform_indices = @transform_24, window_bounds = array<i64: 1, 8, 128>}]} {
    %c0_i32 = arith.constant 0 : i32
    %0 = arith.cmpi eq, %arg1, %c0_i32 : i32
    %1 = arith.extui %0 : i1 to i32
    %c0_i32_0 = arith.constant 0 : i32
    %2 = arith.cmpi ne, %1, %c0_i32_0 : i32
    scf.if %2 {
      %c0_101 = arith.constant 0 : index
      %c0_102 = arith.constant 0 : index
      %c0_103 = arith.constant 0 : index
      %281 = vector.load %arg2[%c0_101, %c0_102, %c0_103] : memref<1x8x32xf32, #tpu.memory_space<vmem>>, vector<1x8x32xf32>
      %282 = vector.shape_cast %281 : vector<1x8x32xf32> to vector<8x32xf32>
      %c0_104 = arith.constant 0 : index
      %c0_105 = arith.constant 0 : index
      %283 = vector.load %arg27[%c0_104, %c0_105] : memref<8x32xf32, #tpu.memory_space<vmem>>, vector<8x32xf32>
      tpu.vector_store %arg27[%c0_104, %c0_105], %282 {strides = array<i32>} : memref<8x32xf32, #tpu.memory_space<vmem>>, vector<8x32xf32>,
    } else {
    }
    %c0 = arith.constant 0 : index
    %c0_1 = arith.constant 0 : index
    %3 = vector.load %arg27[%c0, %c0_1] : memref<8x32xf32, #tpu.memory_space<vmem>>, vector<8x32xf32>
    %c0_2 = arith.constant 0 : index
    %c0_3 = arith.constant 0 : index
    %c0_4 = arith.constant 0 : index
    %4 = vector.load %arg3[%c0_2, %c0_3, %c0_4] : memref<1x8x32xf32, #tpu.memory_space<vmem>>, vector<1x8x32xf32>
    %5 = vector.shape_cast %4 : vector<1x8x32xf32> to vector<8x32xf32>
    %c0_5 = arith.constant 0 : index
    %c0_6 = arith.constant 0 : index
    %c0_7 = arith.constant 0 : index
    %c0_8 = arith.constant 0 : index
    %6 = vector.load %arg4[%c0_5, %c0_6, %c0_7, %c0_8] : memref<1x3x32x32xbf16, #tpu.memory_space<vmem>>, vector<1x3x32x32xbf16>
    %7 = vector.shape_cast %6 : vector<1x3x32x32xbf16> to vector<3x32x32xbf16>
    %c0_9 = arith.constant 0 : index
    %c0_10 = arith.constant 0 : index
    %c0_11 = arith.constant 0 : index
    %c0_12 = arith.constant 0 : index
    %8 = vector.load %arg5[%c0_9, %c0_10, %c0_11, %c0_12] : memref<1x3x1x32xf32, #tpu.memory_space<vmem>>, vector<1x3x1x32xf32>
    %9 = vector.shape_cast %8 : vector<1x3x1x32xf32> to vector<3x1x32xf32>
    %c0_13 = arith.constant 0 : index
    %c0_14 = arith.constant 0 : index
    %c0_15 = arith.constant 0 : index
    %10 = vector.load %arg6[%c0_13, %c0_14, %c0_15] : memref<1x32x32xbf16, #tpu.memory_space<vmem>>, vector<1x32x32xbf16>
    %11 = vector.shape_cast %10 : vector<1x32x32xbf16> to vector<32x32xbf16>
    %c0_16 = arith.constant 0 : index
    %c0_17 = arith.constant 0 : index
    %c0_18 = arith.constant 0 : index
    %12 = vector.load %arg7[%c0_16, %c0_17, %c0_18] : memref<1x1x32xf32, #tpu.memory_space<vmem>>, vector<1x1x32xf32>
    %13 = vector.shape_cast %12 : vector<1x1x32xf32> to vector<1x32xf32>
    %14 = arith.truncf %3 : vector<8x32xf32> to vector<8x32xbf16>
    %15 = arith.truncf %3 : vector<8x32xf32> to vector<8x32xbf16>
    %16 = vector.extract_strided_slice %7 {offsets = [0, 0, 0], sizes = [1, 32, 32], strides = [1, 1, 1]} : vector<3x32x32xbf16> to vector<1x32x32xbf16>
    %17 = vector.shape_cast %16 : vector<1x32x32xbf16> to vector<32x32xbf16>
    %cst = arith.constant dense<0.000000e+00> : vector<8x32xf32>
    %18 = tpu.matmul %14, %17, %cst {dimension_numbers = #tpu.dot_dimension_numbers<[1], [0], [0], [1], [0, 0, 1, 1], [], []>} : vector<8x32xbf16>, vector<32x32xbf16>, vector<8x32xf32> -> vector<8x32xf32>
    %19 = vector.extract_strided_slice %9 {offsets = [0, 0, 0], sizes = [1, 1, 32], strides = [1, 1, 1]} : vector<3x1x32xf32> to vector<1x1x32xf32>
    %20 = vector.shape_cast %19 : vector<1x1x32xf32> to vector<1x32xf32>
    %21 = vector.broadcast %20 : vector<1x32xf32> to vector<8x32xf32>
    %22 = arith.addf %18, %21 : vector<8x32xf32>
    %23 = vector.extract_strided_slice %7 {offsets = [1, 0, 0], sizes = [1, 32, 32], strides = [1, 1, 1]} : vector<3x32x32xbf16> to vector<1x32x32xbf16>
    %24 = vector.shape_cast %23 : vector<1x32x32xbf16> to vector<32x32xbf16>
    %cst_19 = arith.constant dense<0.000000e+00> : vector<8x32xf32>
    %25 = tpu.matmul %15, %24, %cst_19 {dimension_numbers = #tpu.dot_dimension_numbers<[1], [0], [0], [1], [0, 0, 1, 1], [], []>} : vector<8x32xbf16>, vector<32x32xbf16>, vector<8x32xf32> -> vector<8x32xf32>
    %26 = vector.extract_strided_slice %9 {offsets = [1, 0, 0], sizes = [1, 1, 32], strides = [1, 1, 1]} : vector<3x1x32xf32> to vector<1x1x32xf32>
    %27 = vector.shape_cast %26 : vector<1x1x32xf32> to vector<1x32xf32>
    %28 = vector.broadcast %27 : vector<1x32xf32> to vector<8x32xf32>
    %29 = arith.addf %25, %28 : vector<8x32xf32>
    %30 = vector.extract_strided_slice %7 {offsets = [2, 0, 0], sizes = [1, 32, 32], strides = [1, 1, 1]} : vector<3x32x32xbf16> to vector<1x32x32xbf16>
    %31 = vector.shape_cast %30 : vector<1x32x32xbf16> to vector<32x32xbf16>
    %cst_20 = arith.constant dense<0.000000e+00> : vector<8x32xf32>
    %32 = tpu.matmul %15, %31, %cst_20 {dimension_numbers = #tpu.dot_dimension_numbers<[1], [0], [0], [1], [0, 0, 1, 1], [], []>} : vector<8x32xbf16>, vector<32x32xbf16>, vector<8x32xf32> -> vector<8x32xf32>
    %33 = vector.extract_strided_slice %9 {offsets = [2, 0, 0], sizes = [1, 1, 32], strides = [1, 1, 1]} : vector<3x1x32xf32> to vector<1x1x32xf32>
    %34 = vector.shape_cast %33 : vector<1x1x32xf32> to vector<1x32xf32>
    %35 = vector.broadcast %34 : vector<1x32xf32> to vector<8x32xf32>
    %36 = arith.addf %32, %35 : vector<8x32xf32>
    %37 = vector.extract_strided_slice %22 {offsets = [0, 0], sizes = [8, 8], strides = [1, 1]} : vector<8x32xf32> to vector<8x8xf32>
    %38 = vector.extract_strided_slice %22 {offsets = [0, 8], sizes = [8, 8], strides = [1, 1]} : vector<8x32xf32> to vector<8x8xf32>
    %39 = vector.extract_strided_slice %22 {offsets = [0, 16], sizes = [8, 8], strides = [1, 1]} : vector<8x32xf32> to vector<8x8xf32>
    %40 = vector.extract_strided_slice %22 {offsets = [0, 24], sizes = [8, 8], strides = [1, 1]} : vector<8x32xf32> to vector<8x8xf32>
    %41 = vector.shape_cast %37 : vector<8x8xf32> to vector<1x8x8xf32>
    %42 = vector.shape_cast %38 : vector<8x8xf32> to vector<1x8x8xf32>
    %43 = vector.shape_cast %39 : vector<8x8xf32> to vector<1x8x8xf32>
    %44 = vector.shape_cast %40 : vector<8x8xf32> to vector<1x8x8xf32>
    %45 = tpu.concatenate %41, %42, %43, %44 in 0 : vector<1x8x8xf32>, vector<1x8x8xf32>, vector<1x8x8xf32>, vector<1x8x8xf32> -> vector<4x8x8xf32>
    %46 = arith.truncf %45 : vector<4x8x8xf32> to vector<4x8x8xbf16>
    %47 = vector.extract_strided_slice %29 {offsets = [0, 0], sizes = [8, 8], strides = [1, 1]} : vector<8x32xf32> to vector<8x8xf32>
    %48 = vector.extract_strided_slice %29 {offsets = [0, 8], sizes = [8, 8], strides = [1, 1]} : vector<8x32xf32> to vector<8x8xf32>
    %49 = vector.extract_strided_slice %29 {offsets = [0, 16], sizes = [8, 8], strides = [1, 1]} : vector<8x32xf32> to vector<8x8xf32>
    %50 = vector.extract_strided_slice %29 {offsets = [0, 24], sizes = [8, 8], strides = [1, 1]} : vector<8x32xf32> to vector<8x8xf32>
    %51 = vector.shape_cast %47 : vector<8x8xf32> to vector<1x8x8xf32>
    %52 = vector.shape_cast %48 : vector<8x8xf32> to vector<1x8x8xf32>
    %53 = vector.shape_cast %49 : vector<8x8xf32> to vector<1x8x8xf32>
    %54 = vector.shape_cast %50 : vector<8x8xf32> to vector<1x8x8xf32>
    %55 = tpu.concatenate %51, %52, %53, %54 in 0 : vector<1x8x8xf32>, vector<1x8x8xf32>, vector<1x8x8xf32>, vector<1x8x8xf32> -> vector<4x8x8xf32>
    %56 = arith.truncf %55 : vector<4x8x8xf32> to vector<4x8x8xbf16>
    %57 = vector.extract_strided_slice %36 {offsets = [0, 0], sizes = [8, 8], strides = [1, 1]} : vector<8x32xf32> to vector<8x8xf32>
    %58 = vector.extract_strided_slice %36 {offsets = [0, 8], sizes = [8, 8], strides = [1, 1]} : vector<8x32xf32> to vector<8x8xf32>
    %59 = vector.extract_strided_slice %36 {offsets = [0, 16], sizes = [8, 8], strides = [1, 1]} : vector<8x32xf32> to vector<8x8xf32>
    %60 = vector.extract_strided_slice %36 {offsets = [0, 24], sizes = [8, 8], strides = [1, 1]} : vector<8x32xf32> to vector<8x8xf32>
    %61 = vector.shape_cast %57 : vector<8x8xf32> to vector<1x8x8xf32>
    %62 = vector.shape_cast %58 : vector<8x8xf32> to vector<1x8x8xf32>
    %63 = vector.shape_cast %59 : vector<8x8xf32> to vector<1x8x8xf32>
    %64 = vector.shape_cast %60 : vector<8x8xf32> to vector<1x8x8xf32>
    %65 = tpu.concatenate %61, %62, %63, %64 in 0 : vector<1x8x8xf32>, vector<1x8x8xf32>, vector<1x8x8xf32>, vector<1x8x8xf32> -> vector<4x8x8xf32>
    %66 = arith.truncf %65 : vector<4x8x8xf32> to vector<4x8x8xbf16>
    "tpu.trace_start"() <{level = 10 : i32, message = "hqd,hkd->hqk"}> : () -> ()
    %cst_21 = arith.constant dense<0.000000e+00> : vector<4x8x8xf32>
    %67 = tpu.matmul %46, %56, %cst_21 {dimension_numbers = #tpu.dot_dimension_numbers<[2], [2], [1], [1], [0, 0, 0, 1, 1, 1], [0], [0]>} : vector<4x8x8xbf16>, vector<4x8x8xbf16>, vector<4x8x8xf32> -> vector<4x8x8xf32>
    "tpu.trace_stop"() : () -> ()
    %cst_22 = arith.constant 0.353553385 : f32
    %68 = vector.broadcast %cst_22 : f32 to vector<4x8x8xf32>
    %69 = arith.mulf %67, %68 : vector<4x8x8xf32>
    %cst_23 = arith.constant dense<0xFF800000> : vector<4x8xf32>
    %70 = vector.multi_reduction <maximumf>, %69, %cst_23 [2] : vector<4x8x8xf32> to vector<4x8xf32>
    %71 = vector.shape_cast %70 : vector<4x8xf32> to vector<4x8x1xf32>
    %72 = vector.broadcast %71 : vector<4x8x1xf32> to vector<4x8x8xf32>
    %73 = arith.subf %69, %72 : vector<4x8x8xf32>
    %74 = math.exp %73 : vector<4x8x8xf32>
    %cst_24 = arith.constant dense<0.000000e+00> : vector<4x8xf32>
    %75 = vector.multi_reduction <add>, %74, %cst_24 [2] : vector<4x8x8xf32> to vector<4x8xf32>
    %76 = vector.shape_cast %75 : vector<4x8xf32> to vector<4x8x1xf32>
    %77 = tpu.reciprocal %76 {approx = true} : vector<4x8x1xf32> -> vector<4x8x1xf32>
    %78 = vector.broadcast %77 : vector<4x8x1xf32> to vector<4x8x8xf32>
    %79 = arith.mulf %74, %78 : vector<4x8x8xf32>
    %80 = arith.truncf %79 : vector<4x8x8xf32> to vector<4x8x8xbf16>
    "tpu.trace_start"() <{level = 10 : i32, message = "hqk,hkd->hqd"}> : () -> ()
    %cst_25 = arith.constant dense<0.000000e+00> : vector<4x8x8xf32>
    %81 = tpu.matmul %80, %66, %cst_25 {dimension_numbers = #tpu.dot_dimension_numbers<[2], [1], [1], [2], [0, 0, 0, 1, 1, 2], [0], [0]>} : vector<4x8x8xbf16>, vector<4x8x8xbf16>, vector<4x8x8xf32> -> vector<4x8x8xf32>
    "tpu.trace_stop"() : () -> ()
    %82 = vector.extract_strided_slice %81 {offsets = [0, 0, 0], sizes = [1, 8, 8], strides = [1, 1, 1]} : vector<4x8x8xf32> to vector<1x8x8xf32>
    %83 = vector.shape_cast %82 : vector<1x8x8xf32> to vector<8x8xf32>
    %84 = vector.extract_strided_slice %81 {offsets = [1, 0, 0], sizes = [1, 8, 8], strides = [1, 1, 1]} : vector<4x8x8xf32> to vector<1x8x8xf32>
    %85 = vector.shape_cast %84 : vector<1x8x8xf32> to vector<8x8xf32>
    %86 = vector.extract_strided_slice %81 {offsets = [2, 0, 0], sizes = [1, 8, 8], strides = [1, 1, 1]} : vector<4x8x8xf32> to vector<1x8x8xf32>
    %87 = vector.shape_cast %86 : vector<1x8x8xf32> to vector<8x8xf32>
    %88 = vector.extract_strided_slice %81 {offsets = [3, 0, 0], sizes = [1, 8, 8], strides = [1, 1, 1]} : vector<4x8x8xf32> to vector<1x8x8xf32>
    %89 = vector.shape_cast %88 : vector<1x8x8xf32> to vector<8x8xf32>
    %90 = tpu.concatenate %83, %85, %87, %89 in 1 : vector<8x8xf32>, vector<8x8xf32>, vector<8x8xf32>, vector<8x8xf32> -> vector<8x32xf32>
    %91 = arith.truncf %90 : vector<8x32xf32> to vector<8x32xbf16>
    %cst_26 = arith.constant dense<0.000000e+00> : vector<8x32xf32>
    %92 = tpu.matmul %91, %11, %cst_26 {dimension_numbers = #tpu.dot_dimension_numbers<[1], [0], [0], [1], [0, 0, 1, 1], [], []>} : vector<8x32xbf16>, vector<32x32xbf16>, vector<8x32xf32> -> vector<8x32xf32>
    %93 = vector.broadcast %13 : vector<1x32xf32> to vector<8x32xf32>
    %94 = arith.addf %92, %93 : vector<8x32xf32>
    %95 = arith.addf %3, %94 : vector<8x32xf32>
    %c0_27 = arith.constant 0 : index
    %c0_28 = arith.constant 0 : index
    %c0_29 = arith.constant 0 : index
    %96 = vector.load %arg8[%c0_27, %c0_28, %c0_29] : memref<1x1x32xf32, #tpu.memory_space<vmem>>, vector<1x1x32xf32>
    %97 = vector.shape_cast %96 : vector<1x1x32xf32> to vector<1x32xf32>
    %c0_30 = arith.constant 0 : index
    %c0_31 = arith.constant 0 : index
    %c0_32 = arith.constant 0 : index
    %98 = vector.load %arg9[%c0_30, %c0_31, %c0_32] : memref<1x1x32xf32, #tpu.memory_space<vmem>>, vector<1x1x32xf32>
    %99 = vector.shape_cast %98 : vector<1x1x32xf32> to vector<1x32xf32>
    %cst_33 = arith.constant dense<0.000000e+00> : vector<8xf32>
    %100 = vector.multi_reduction <add>, %95, %cst_33 [1] : vector<8x32xf32> to vector<8xf32>
    %101 = vector.shape_cast %100 : vector<8xf32> to vector<8x1xf32>
    %cst_34 = arith.constant 3.200000e+01 : f32
    %102 = vector.broadcast %cst_34 : f32 to vector<8x1xf32>
    %103 = arith.divf %101, %102 : vector<8x1xf32>
    %104 = vector.broadcast %103 : vector<8x1xf32> to vector<8x32xf32>
    %105 = arith.subf %95, %104 : vector<8x32xf32>
    %106 = arith.mulf %105, %105 : vector<8x32xf32>
    %cst_35 = arith.constant dense<0.000000e+00> : vector<8xf32>
    %107 = vector.multi_reduction <add>, %106, %cst_35 [1] : vector<8x32xf32> to vector<8xf32>
    %108 = vector.shape_cast %107 : vector<8xf32> to vector<8x1xf32>
    %cst_36 = arith.constant 3.200000e+01 : f32
    %109 = vector.broadcast %cst_36 : f32 to vector<8x1xf32>
    %110 = arith.divf %108, %109 : vector<8x1xf32>
    %cst_37 = arith.constant 9.99999974E-6 : f32
    %111 = vector.broadcast %cst_37 : f32 to vector<8x1xf32>
    %112 = arith.addf %110, %111 : vector<8x1xf32>
    %113 = math.rsqrt %112 : vector<8x1xf32>
    %114 = vector.broadcast %113 : vector<8x1xf32> to vector<8x32xf32>
    %115 = arith.mulf %105, %114 : vector<8x32xf32>
    %116 = vector.broadcast %97 : vector<1x32xf32> to vector<8x32xf32>
    %117 = arith.mulf %115, %116 : vector<8x32xf32>
    %118 = vector.broadcast %99 : vector<1x32xf32> to vector<8x32xf32>
    %119 = arith.addf %117, %118 : vector<8x32xf32>
    %c0_38 = arith.constant 0 : index
    %c0_39 = arith.constant 0 : index
    %c0_40 = arith.constant 0 : index
    %c0_41 = arith.constant 0 : index
    %120 = vector.load %arg10[%c0_38, %c0_39, %c0_40, %c0_41] : memref<1x3x32x32xbf16, #tpu.memory_space<vmem>>, vector<1x3x32x32xbf16>
    %121 = vector.shape_cast %120 : vector<1x3x32x32xbf16> to vector<3x32x32xbf16>
    %c0_42 = arith.constant 0 : index
    %c0_43 = arith.constant 0 : index
    %c0_44 = arith.constant 0 : index
    %c0_45 = arith.constant 0 : index
    %122 = vector.load %arg11[%c0_42, %c0_43, %c0_44, %c0_45] : memref<1x3x1x32xf32, #tpu.memory_space<vmem>>, vector<1x3x1x32xf32>
    %123 = vector.shape_cast %122 : vector<1x3x1x32xf32> to vector<3x1x32xf32>
    %c0_46 = arith.constant 0 : index
    %c0_47 = arith.constant 0 : index
    %c0_48 = arith.constant 0 : index
    %124 = vector.load %arg12[%c0_46, %c0_47, %c0_48] : memref<1x32x32xbf16, #tpu.memory_space<vmem>>, vector<1x32x32xbf16>
    %125 = vector.shape_cast %124 : vector<1x32x32xbf16> to vector<32x32xbf16>
    %c0_49 = arith.constant 0 : index
    %c0_50 = arith.constant 0 : index
    %c0_51 = arith.constant 0 : index
    %126 = vector.load %arg13[%c0_49, %c0_50, %c0_51] : memref<1x1x32xf32, #tpu.memory_space<vmem>>, vector<1x1x32xf32>
    %127 = vector.shape_cast %126 : vector<1x1x32xf32> to vector<1x32xf32>
    %128 = arith.truncf %119 : vector<8x32xf32> to vector<8x32xbf16>
    %129 = arith.truncf %5 : vector<8x32xf32> to vector<8x32xbf16>
    %130 = vector.extract_strided_slice %121 {offsets = [0, 0, 0], sizes = [1, 32, 32], strides = [1, 1, 1]} : vector<3x32x32xbf16> to vector<1x32x32xbf16>
    %131 = vector.shape_cast %130 : vector<1x32x32xbf16> to vector<32x32xbf16>
    %cst_52 = arith.constant dense<0.000000e+00> : vector<8x32xf32>
    %132 = tpu.matmul %128, %131, %cst_52 {dimension_numbers = #tpu.dot_dimension_numbers<[1], [0], [0], [1], [0, 0, 1, 1], [], []>} : vector<8x32xbf16>, vector<32x32xbf16>, vector<8x32xf32> -> vector<8x32xf32>
    %133 = vector.extract_strided_slice %123 {offsets = [0, 0, 0], sizes = [1, 1, 32], strides = [1, 1, 1]} : vector<3x1x32xf32> to vector<1x1x32xf32>
    %134 = vector.shape_cast %133 : vector<1x1x32xf32> to vector<1x32xf32>
    %135 = vector.broadcast %134 : vector<1x32xf32> to vector<8x32xf32>
    %136 = arith.addf %132, %135 : vector<8x32xf32>
    %137 = vector.extract_strided_slice %121 {offsets = [1, 0, 0], sizes = [1, 32, 32], strides = [1, 1, 1]} : vector<3x32x32xbf16> to vector<1x32x32xbf16>
    %138 = vector.shape_cast %137 : vector<1x32x32xbf16> to vector<32x32xbf16>
    %cst_53 = arith.constant dense<0.000000e+00> : vector<8x32xf32>
    %139 = tpu.matmul %129, %138, %cst_53 {dimension_numbers = #tpu.dot_dimension_numbers<[1], [0], [0], [1], [0, 0, 1, 1], [], []>} : vector<8x32xbf16>, vector<32x32xbf16>, vector<8x32xf32> -> vector<8x32xf32>
    %140 = vector.extract_strided_slice %123 {offsets = [1, 0, 0], sizes = [1, 1, 32], strides = [1, 1, 1]} : vector<3x1x32xf32> to vector<1x1x32xf32>
    %141 = vector.shape_cast %140 : vector<1x1x32xf32> to vector<1x32xf32>
    %142 = vector.broadcast %141 : vector<1x32xf32> to vector<8x32xf32>
    %143 = arith.addf %139, %142 : vector<8x32xf32>
    %144 = vector.extract_strided_slice %121 {offsets = [2, 0, 0], sizes = [1, 32, 32], strides = [1, 1, 1]} : vector<3x32x32xbf16> to vector<1x32x32xbf16>
    %145 = vector.shape_cast %144 : vector<1x32x32xbf16> to vector<32x32xbf16>
    %cst_54 = arith.constant dense<0.000000e+00> : vector<8x32xf32>
    %146 = tpu.matmul %129, %145, %cst_54 {dimension_numbers = #tpu.dot_dimension_numbers<[1], [0], [0], [1], [0, 0, 1, 1], [], []>} : vector<8x32xbf16>, vector<32x32xbf16>, vector<8x32xf32> -> vector<8x32xf32>
    %147 = vector.extract_strided_slice %123 {offsets = [2, 0, 0], sizes = [1, 1, 32], strides = [1, 1, 1]} : vector<3x1x32xf32> to vector<1x1x32xf32>
    %148 = vector.shape_cast %147 : vector<1x1x32xf32> to vector<1x32xf32>
    %149 = vector.broadcast %148 : vector<1x32xf32> to vector<8x32xf32>
    %150 = arith.addf %146, %149 : vector<8x32xf32>
    %151 = vector.extract_strided_slice %136 {offsets = [0, 0], sizes = [8, 8], strides = [1, 1]} : vector<8x32xf32> to vector<8x8xf32>
    %152 = vector.extract_strided_slice %136 {offsets = [0, 8], sizes = [8, 8], strides = [1, 1]} : vector<8x32xf32> to vector<8x8xf32>
    %153 = vector.extract_strided_slice %136 {offsets = [0, 16], sizes = [8, 8], strides = [1, 1]} : vector<8x32xf32> to vector<8x8xf32>
    %154 = vector.extract_strided_slice %136 {offsets = [0, 24], sizes = [8, 8], strides = [1, 1]} : vector<8x32xf32> to vector<8x8xf32>
    %155 = vector.shape_cast %151 : vector<8x8xf32> to vector<1x8x8xf32>
    %156 = vector.shape_cast %152 : vector<8x8xf32> to vector<1x8x8xf32>
    %157 = vector.shape_cast %153 : vector<8x8xf32> to vector<1x8x8xf32>
    %158 = vector.shape_cast %154 : vector<8x8xf32> to vector<1x8x8xf32>
    %159 = tpu.concatenate %155, %156, %157, %158 in 0 : vector<1x8x8xf32>, vector<1x8x8xf32>, vector<1x8x8xf32>, vector<1x8x8xf32> -> vector<4x8x8xf32>
    %160 = arith.truncf %159 : vector<4x8x8xf32> to vector<4x8x8xbf16>
    %161 = vector.extract_strided_slice %143 {offsets = [0, 0], sizes = [8, 8], strides = [1, 1]} : vector<8x32xf32> to vector<8x8xf32>
    %162 = vector.extract_strided_slice %143 {offsets = [0, 8], sizes = [8, 8], strides = [1, 1]} : vector<8x32xf32> to vector<8x8xf32>
    %163 = vector.extract_strided_slice %143 {offsets = [0, 16], sizes = [8, 8], strides = [1, 1]} : vector<8x32xf32> to vector<8x8xf32>
    %164 = vector.extract_strided_slice %143 {offsets = [0, 24], sizes = [8, 8], strides = [1, 1]} : vector<8x32xf32> to vector<8x8xf32>
    %165 = vector.shape_cast %161 : vector<8x8xf32> to vector<1x8x8xf32>
    %166 = vector.shape_cast %162 : vector<8x8xf32> to vector<1x8x8xf32>
    %167 = vector.shape_cast %163 : vector<8x8xf32> to vector<1x8x8xf32>
    %168 = vector.shape_cast %164 : vector<8x8xf32> to vector<1x8x8xf32>
    %169 = tpu.concatenate %165, %166, %167, %168 in 0 : vector<1x8x8xf32>, vector<1x8x8xf32>, vector<1x8x8xf32>, vector<1x8x8xf32> -> vector<4x8x8xf32>
    %170 = arith.truncf %169 : vector<4x8x8xf32> to vector<4x8x8xbf16>
    %171 = vector.extract_strided_slice %150 {offsets = [0, 0], sizes = [8, 8], strides = [1, 1]} : vector<8x32xf32> to vector<8x8xf32>
    %172 = vector.extract_strided_slice %150 {offsets = [0, 8], sizes = [8, 8], strides = [1, 1]} : vector<8x32xf32> to vector<8x8xf32>
    %173 = vector.extract_strided_slice %150 {offsets = [0, 16], sizes = [8, 8], strides = [1, 1]} : vector<8x32xf32> to vector<8x8xf32>
    %174 = vector.extract_strided_slice %150 {offsets = [0, 24], sizes = [8, 8], strides = [1, 1]} : vector<8x32xf32> to vector<8x8xf32>
    %175 = vector.shape_cast %171 : vector<8x8xf32> to vector<1x8x8xf32>
    %176 = vector.shape_cast %172 : vector<8x8xf32> to vector<1x8x8xf32>
    %177 = vector.shape_cast %173 : vector<8x8xf32> to vector<1x8x8xf32>
    %178 = vector.shape_cast %174 : vector<8x8xf32> to vector<1x8x8xf32>
    %179 = tpu.concatenate %175, %176, %177, %178 in 0 : vector<1x8x8xf32>, vector<1x8x8xf32>, vector<1x8x8xf32>, vector<1x8x8xf32> -> vector<4x8x8xf32>
    %180 = arith.truncf %179 : vector<4x8x8xf32> to vector<4x8x8xbf16>
    "tpu.trace_start"() <{level = 10 : i32, message = "hqd,hkd->hqk"}> : () -> ()
    %cst_55 = arith.constant dense<0.000000e+00> : vector<4x8x8xf32>
    %181 = tpu.matmul %160, %170, %cst_55 {dimension_numbers = #tpu.dot_dimension_numbers<[2], [2], [1], [1], [0, 0, 0, 1, 1, 1], [0], [0]>} : vector<4x8x8xbf16>, vector<4x8x8xbf16>, vector<4x8x8xf32> -> vector<4x8x8xf32>
    "tpu.trace_stop"() : () -> ()
    %cst_56 = arith.constant 0.353553385 : f32
    %182 = vector.broadcast %cst_56 : f32 to vector<4x8x8xf32>
    %183 = arith.mulf %181, %182 : vector<4x8x8xf32>
    %cst_57 = arith.constant dense<0xFF800000> : vector<4x8xf32>
    %184 = vector.multi_reduction <maximumf>, %183, %cst_57 [2] : vector<4x8x8xf32> to vector<4x8xf32>
    %185 = vector.shape_cast %184 : vector<4x8xf32> to vector<4x8x1xf32>
    %186 = vector.broadcast %185 : vector<4x8x1xf32> to vector<4x8x8xf32>
    %187 = arith.subf %183, %186 : vector<4x8x8xf32>
    %188 = math.exp %187 : vector<4x8x8xf32>
    %cst_58 = arith.constant dense<0.000000e+00> : vector<4x8xf32>
    %189 = vector.multi_reduction <add>, %188, %cst_58 [2] : vector<4x8x8xf32> to vector<4x8xf32>
    %190 = vector.shape_cast %189 : vector<4x8xf32> to vector<4x8x1xf32>
    %191 = tpu.reciprocal %190 {approx = true} : vector<4x8x1xf32> -> vector<4x8x1xf32>
    %192 = vector.broadcast %191 : vector<4x8x1xf32> to vector<4x8x8xf32>
    %193 = arith.mulf %188, %192 : vector<4x8x8xf32>
    %194 = arith.truncf %193 : vector<4x8x8xf32> to vector<4x8x8xbf16>
    "tpu.trace_start"() <{level = 10 : i32, message = "hqk,hkd->hqd"}> : () -> ()
    %cst_59 = arith.constant dense<0.000000e+00> : vector<4x8x8xf32>
    %195 = tpu.matmul %194, %180, %cst_59 {dimension_numbers = #tpu.dot_dimension_numbers<[2], [1], [1], [2], [0, 0, 0, 1, 1, 2], [0], [0]>} : vector<4x8x8xbf16>, vector<4x8x8xbf16>, vector<4x8x8xf32> -> vector<4x8x8xf32>
    "tpu.trace_stop"() : () -> ()
    %196 = vector.extract_strided_slice %195 {offsets = [0, 0, 0], sizes = [1, 8, 8], strides = [1, 1, 1]} : vector<4x8x8xf32> to vector<1x8x8xf32>
    %197 = vector.shape_cast %196 : vector<1x8x8xf32> to vector<8x8xf32>
    %198 = vector.extract_strided_slice %195 {offsets = [1, 0, 0], sizes = [1, 8, 8], strides = [1, 1, 1]} : vector<4x8x8xf32> to vector<1x8x8xf32>
    %199 = vector.shape_cast %198 : vector<1x8x8xf32> to vector<8x8xf32>
    %200 = vector.extract_strided_slice %195 {offsets = [2, 0, 0], sizes = [1, 8, 8], strides = [1, 1, 1]} : vector<4x8x8xf32> to vector<1x8x8xf32>
    %201 = vector.shape_cast %200 : vector<1x8x8xf32> to vector<8x8xf32>
    %202 = vector.extract_strided_slice %195 {offsets = [3, 0, 0], sizes = [1, 8, 8], strides = [1, 1, 1]} : vector<4x8x8xf32> to vector<1x8x8xf32>
    %203 = vector.shape_cast %202 : vector<1x8x8xf32> to vector<8x8xf32>
    %204 = tpu.concatenate %197, %199, %201, %203 in 1 : vector<8x8xf32>, vector<8x8xf32>, vector<8x8xf32>, vector<8x8xf32> -> vector<8x32xf32>
    %205 = arith.truncf %204 : vector<8x32xf32> to vector<8x32xbf16>
    %cst_60 = arith.constant dense<0.000000e+00> : vector<8x32xf32>
    %206 = tpu.matmul %205, %125, %cst_60 {dimension_numbers = #tpu.dot_dimension_numbers<[1], [0], [0], [1], [0, 0, 1, 1], [], []>} : vector<8x32xbf16>, vector<32x32xbf16>, vector<8x32xf32> -> vector<8x32xf32>
    %207 = vector.broadcast %127 : vector<1x32xf32> to vector<8x32xf32>
    %208 = arith.addf %206, %207 : vector<8x32xf32>
    %209 = arith.addf %119, %208 : vector<8x32xf32>
    %c0_61 = arith.constant 0 : index
    %c0_62 = arith.constant 0 : index
    %c0_63 = arith.constant 0 : index
    %210 = vector.load %arg14[%c0_61, %c0_62, %c0_63] : memref<1x1x32xf32, #tpu.memory_space<vmem>>, vector<1x1x32xf32>
    %211 = vector.shape_cast %210 : vector<1x1x32xf32> to vector<1x32xf32>
    %c0_64 = arith.constant 0 : index
    %c0_65 = arith.constant 0 : index
    %c0_66 = arith.constant 0 : index
    %212 = vector.load %arg15[%c0_64, %c0_65, %c0_66] : memref<1x1x32xf32, #tpu.memory_space<vmem>>, vector<1x1x32xf32>
    %213 = vector.shape_cast %212 : vector<1x1x32xf32> to vector<1x32xf32>
    %cst_67 = arith.constant dense<0.000000e+00> : vector<8xf32>
    %214 = vector.multi_reduction <add>, %209, %cst_67 [1] : vector<8x32xf32> to vector<8xf32>
    %215 = vector.shape_cast %214 : vector<8xf32> to vector<8x1xf32>
    %cst_68 = arith.constant 3.200000e+01 : f32
    %216 = vector.broadcast %cst_68 : f32 to vector<8x1xf32>
    %217 = arith.divf %215, %216 : vector<8x1xf32>
    %218 = vector.broadcast %217 : vector<8x1xf32> to vector<8x32xf32>
    %219 = arith.subf %209, %218 : vector<8x32xf32>
    %220 = arith.mulf %219, %219 : vector<8x32xf32>
    %cst_69 = arith.constant dense<0.000000e+00> : vector<8xf32>
    %221 = vector.multi_reduction <add>, %220, %cst_69 [1] : vector<8x32xf32> to vector<8xf32>
    %222 = vector.shape_cast %221 : vector<8xf32> to vector<8x1xf32>
    %cst_70 = arith.constant 3.200000e+01 : f32
    %223 = vector.broadcast %cst_70 : f32 to vector<8x1xf32>
    %224 = arith.divf %222, %223 : vector<8x1xf32>
    %cst_71 = arith.constant 9.99999974E-6 : f32
    %225 = vector.broadcast %cst_71 : f32 to vector<8x1xf32>
    %226 = arith.addf %224, %225 : vector<8x1xf32>
    %227 = math.rsqrt %226 : vector<8x1xf32>
    %228 = vector.broadcast %227 : vector<8x1xf32> to vector<8x32xf32>
    %229 = arith.mulf %219, %228 : vector<8x32xf32>
    %230 = vector.broadcast %211 : vector<1x32xf32> to vector<8x32xf32>
    %231 = arith.mulf %229, %230 : vector<8x32xf32>
    %232 = vector.broadcast %213 : vector<1x32xf32> to vector<8x32xf32>
    %233 = arith.addf %231, %232 : vector<8x32xf32>
    %c0_72 = arith.constant 0 : index
    %c0_73 = arith.constant 0 : index
    %c0_74 = arith.constant 0 : index
    %234 = vector.load %arg16[%c0_72, %c0_73, %c0_74] : memref<1x32x64xbf16, #tpu.memory_space<vmem>>, vector<1x32x64xbf16>
    %235 = vector.shape_cast %234 : vector<1x32x64xbf16> to vector<32x64xbf16>
    %c0_75 = arith.constant 0 : index
    %c0_76 = arith.constant 0 : index
    %c0_77 = arith.constant 0 : index
    %236 = vector.load %arg17[%c0_75, %c0_76, %c0_77] : memref<1x1x64xf32, #tpu.memory_space<vmem>>, vector<1x1x64xf32>
    %237 = vector.shape_cast %236 : vector<1x1x64xf32> to vector<1x64xf32>
    %238 = arith.truncf %233 : vector<8x32xf32> to vector<8x32xbf16>
    %cst_78 = arith.constant dense<0.000000e+00> : vector<8x64xf32>
    %239 = tpu.matmul %238, %235, %cst_78 {dimension_numbers = #tpu.dot_dimension_numbers<[1], [0], [0], [1], [0, 0, 1, 1], [], []>} : vector<8x32xbf16>, vector<32x64xbf16>, vector<8x64xf32> -> vector<8x64xf32>
    %240 = vector.broadcast %237 : vector<1x64xf32> to vector<8x64xf32>
    %241 = arith.addf %239, %240 : vector<8x64xf32>
    %cst_79 = arith.constant 0.000000e+00 : f32
    %242 = vector.broadcast %cst_79 : f32 to vector<8x64xf32>
    %243 = arith.maximumf %241, %242 : vector<8x64xf32>
    %c0_80 = arith.constant 0 : index
    %c0_81 = arith.constant 0 : index
    %c0_82 = arith.constant 0 : index
    %244 = vector.load %arg18[%c0_80, %c0_81, %c0_82] : memref<1x64x32xbf16, #tpu.memory_space<vmem>>, vector<1x64x32xbf16>
    %245 = vector.shape_cast %244 : vector<1x64x32xbf16> to vector<64x32xbf16>
    %c0_83 = arith.constant 0 : index
    %c0_84 = arith.constant 0 : index
    %c0_85 = arith.constant 0 : index
    %246 = vector.load %arg19[%c0_83, %c0_84, %c0_85] : memref<1x1x32xf32, #tpu.memory_space<vmem>>, vector<1x1x32xf32>
    %247 = vector.shape_cast %246 : vector<1x1x32xf32> to vector<1x32xf32>
    %248 = arith.truncf %243 : vector<8x64xf32> to vector<8x64xbf16>
    %cst_86 = arith.constant dense<0.000000e+00> : vector<8x32xf32>
    %249 = tpu.matmul %248, %245, %cst_86 {dimension_numbers = #tpu.dot_dimension_numbers<[1], [0], [0], [1], [0, 0, 1, 1], [], []>} : vector<8x64xbf16>, vector<64x32xbf16>, vector<8x32xf32> -> vector<8x32xf32>
    %250 = vector.broadcast %247 : vector<1x32xf32> to vector<8x32xf32>
    %251 = arith.addf %249, %250 : vector<8x32xf32>
    %252 = arith.addf %233, %251 : vector<8x32xf32>
    %c0_87 = arith.constant 0 : index
    %c0_88 = arith.constant 0 : index
    %c0_89 = arith.constant 0 : index
    %253 = vector.load %arg20[%c0_87, %c0_88, %c0_89] : memref<1x1x32xf32, #tpu.memory_space<vmem>>, vector<1x1x32xf32>
    %254 = vector.shape_cast %253 : vector<1x1x32xf32> to vector<1x32xf32>
    %c0_90 = arith.constant 0 : index
    %c0_91 = arith.constant 0 : index
    %c0_92 = arith.constant 0 : index
    %255 = vector.load %arg21[%c0_90, %c0_91, %c0_92] : memref<1x1x32xf32, #tpu.memory_space<vmem>>, vector<1x1x32xf32>
    %256 = vector.shape_cast %255 : vector<1x1x32xf32> to vector<1x32xf32>
    %cst_93 = arith.constant dense<0.000000e+00> : vector<8xf32>
    %257 = vector.multi_reduction <add>, %252, %cst_93 [1] : vector<8x32xf32> to vector<8xf32>
    %258 = vector.shape_cast %257 : vector<8xf32> to vector<8x1xf32>
    %cst_94 = arith.constant 3.200000e+01 : f32
    %259 = vector.broadcast %cst_94 : f32 to vector<8x1xf32>
    %260 = arith.divf %258, %259 : vector<8x1xf32>
    %261 = vector.broadcast %260 : vector<8x1xf32> to vector<8x32xf32>
    %262 = arith.subf %252, %261 : vector<8x32xf32>
    %263 = arith.mulf %262, %262 : vector<8x32xf32>
    %cst_95 = arith.constant dense<0.000000e+00> : vector<8xf32>
    %264 = vector.multi_reduction <add>, %263, %cst_95 [1] : vector<8x32xf32> to vector<8xf32>
    %265 = vector.shape_cast %264 : vector<8xf32> to vector<8x1xf32>
    %cst_96 = arith.constant 3.200000e+01 : f32
    %266 = vector.broadcast %cst_96 : f32 to vector<8x1xf32>
    %267 = arith.divf %265, %266 : vector<8x1xf32>
    %cst_97 = arith.constant 9.99999974E-6 : f32
    %268 = vector.broadcast %cst_97 : f32 to vector<8x1xf32>
    %269 = arith.addf %267, %268 : vector<8x1xf32>
    %270 = math.rsqrt %269 : vector<8x1xf32>
    %271 = vector.broadcast %270 : vector<8x1xf32> to vector<8x32xf32>
    %272 = arith.mulf %262, %271 : vector<8x32xf32>
    %273 = vector.broadcast %254 : vector<1x32xf32> to vector<8x32xf32>
    %274 = arith.mulf %272, %273 : vector<8x32xf32>
    %275 = vector.broadcast %256 : vector<1x32xf32> to vector<8x32xf32>
    %276 = arith.addf %274, %275 : vector<8x32xf32>
    %c0_98 = arith.constant 0 : index
    %c0_99 = arith.constant 0 : index
    %277 = vector.load %arg27[%c0_98, %c0_99] : memref<8x32xf32, #tpu.memory_space<vmem>>, vector<8x32xf32>
    tpu.vector_store %arg27[%c0_98, %c0_99], %276 {strides = array<i32>} : memref<8x32xf32, #tpu.memory_space<vmem>>, vector<8x32xf32>,
    %c1_i32 = arith.constant 1 : i32
    %278 = arith.cmpi eq, %arg1, %c1_i32 : i32
    %279 = arith.extui %278 : i1 to i32
    %c0_i32_100 = arith.constant 0 : i32
    %280 = arith.cmpi ne, %279, %c0_i32_100 : i32
    scf.if %280 {
      %c0_101 = arith.constant 0 : index
      %c0_102 = arith.constant 0 : index
      %281 = vector.load %arg22[%c0_101, %c0_102] : memref<1x32xf32, #tpu.memory_space<vmem>>, vector<1x32xf32>
      %c0_103 = arith.constant 0 : index
      %c0_104 = arith.constant 0 : index
      %282 = vector.load %arg23[%c0_103, %c0_104] : memref<1x32xf32, #tpu.memory_space<vmem>>, vector<1x32xf32>
      %cst_105 = arith.constant dense<0.000000e+00> : vector<8xf32>
      %283 = vector.multi_reduction <add>, %276, %cst_105 [1] : vector<8x32xf32> to vector<8xf32>
      %284 = vector.shape_cast %283 : vector<8xf32> to vector<8x1xf32>
      %cst_106 = arith.constant 3.200000e+01 : f32
      %285 = vector.broadcast %cst_106 : f32 to vector<8x1xf32>
      %286 = arith.divf %284, %285 : vector<8x1xf32>
      %287 = vector.broadcast %286 : vector<8x1xf32> to vector<8x32xf32>
      %288 = arith.subf %276, %287 : vector<8x32xf32>
      %289 = arith.mulf %288, %288 : vector<8x32xf32>
      %cst_107 = arith.constant dense<0.000000e+00> : vector<8xf32>
      %290 = vector.multi_reduction <add>, %289, %cst_107 [1] : vector<8x32xf32> to vector<8xf32>
      %291 = vector.shape_cast %290 : vector<8xf32> to vector<8x1xf32>
      %cst_108 = arith.constant 3.200000e+01 : f32
      %292 = vector.broadcast %cst_108 : f32 to vector<8x1xf32>
      %293 = arith.divf %291, %292 : vector<8x1xf32>
      %cst_109 = arith.constant 9.99999974E-6 : f32
      %294 = vector.broadcast %cst_109 : f32 to vector<8x1xf32>
      %295 = arith.addf %293, %294 : vector<8x1xf32>
      %296 = math.rsqrt %295 : vector<8x1xf32>
      %297 = vector.broadcast %296 : vector<8x1xf32> to vector<8x32xf32>
      %298 = arith.mulf %288, %297 : vector<8x32xf32>
      %299 = vector.broadcast %281 : vector<1x32xf32> to vector<8x32xf32>
      %300 = arith.mulf %298, %299 : vector<8x32xf32>
      %301 = vector.broadcast %282 : vector<1x32xf32> to vector<8x32xf32>
      %302 = arith.addf %300, %301 : vector<8x32xf32>
      %c0_110 = arith.constant 0 : index
      %c0_111 = arith.constant 0 : index
      %303 = vector.load %arg24[%c0_110, %c0_111] : memref<32x128xbf16, #tpu.memory_space<vmem>>, vector<32x128xbf16>
      %c0_112 = arith.constant 0 : index
      %c0_113 = arith.constant 0 : index
      %304 = vector.load %arg25[%c0_112, %c0_113] : memref<1x128xf32, #tpu.memory_space<vmem>>, vector<1x128xf32>
      %305 = arith.truncf %302 : vector<8x32xf32> to vector<8x32xbf16>
      %cst_114 = arith.constant dense<0.000000e+00> : vector<8x128xf32>
      %306 = tpu.matmul %305, %303, %cst_114 {dimension_numbers = #tpu.dot_dimension_numbers<[1], [0], [0], [1], [0, 0, 1, 1], [], []>} : vector<8x32xbf16>, vector<32x128xbf16>, vector<8x128xf32> -> vector<8x128xf32>
      %307 = vector.broadcast %304 : vector<1x128xf32> to vector<8x128xf32>
      %308 = arith.addf %306, %307 : vector<8x128xf32>
      %c0_115 = arith.constant 0 : index
      %c0_116 = arith.constant 0 : index
      %c0_117 = arith.constant 0 : index
      %309 = vector.load %arg26[%c0_115, %c0_116, %c0_117] : memref<1x8x128xf32, #tpu.memory_space<vmem>>, vector<1x8x128xf32>
      %310 = vector.shape_cast %309 : vector<1x8x128xf32> to vector<8x128xf32>
      %311 = vector.shape_cast %308 : vector<8x128xf32> to vector<1x8x128xf32>
      tpu.vector_store %arg26[%c0_115, %c0_116, %c0_117], %311 {strides = array<i32>} : memref<1x8x128xf32, #tpu.memory_space<vmem>>, vector<1x8x128xf32>,
    } else {
    }
    return
  }
  func.func @transform_0(%arg0: i32, %arg1: i32) -> (i32, i32, i32) {
    %c0_i32 = arith.constant 0 : i32
    %c0_i32_0 = arith.constant 0 : i32
    %c0_i32_1 = arith.constant 0 : i32
    return %arg0, %c0_i32, %c0_i32_0 : i32, i32, i32
  }
  func.func @transform_1(%arg0: i32, %arg1: i32) -> (i32, i32, i32) {
    %c0_i32 = arith.constant 0 : i32
    %c0_i32_0 = arith.constant 0 : i32
    %c0_i32_1 = arith.constant 0 : i32
    return %arg0, %c0_i32, %c0_i32_0 : i32, i32, i32
  }
  func.func @transform_2(%arg0: i32, %arg1: i32) -> (i32, i32, i32, i32) {
    %c0_i32 = arith.constant 0 : i32
    %c0_i32_0 = arith.constant 0 : i32
    %c0_i32_1 = arith.constant 0 : i32
    %c0_i32_2 = arith.constant 0 : i32
    return %arg1, %c0_i32, %c0_i32_0, %c0_i32_1 : i32, i32, i32, i32
  }
  func.func @transform_3(%arg0: i32, %arg1: i32) -> (i32, i32, i32, i32) {
    %c0_i32 = arith.constant 0 : i32
    %c0_i32_0 = arith.constant 0 : i32
    %c0_i32_1 = arith.constant 0 : i32
    %c0_i32_2 = arith.constant 0 : i32
    return %arg1, %c0_i32, %c0_i32_0, %c0_i32_1 : i32, i32, i32, i32
  }
  func.func @transform_4(%arg0: i32, %arg1: i32) -> (i32, i32, i32) {
    %c0_i32 = arith.constant 0 : i32
    %c0_i32_0 = arith.constant 0 : i32
    %c0_i32_1 = arith.constant 0 : i32
    return %arg1, %c0_i32, %c0_i32_0 : i32, i32, i32
  }
  func.func @transform_5(%arg0: i32, %arg1: i32) -> (i32, i32, i32) {
    %c0_i32 = arith.constant 0 : i32
    %c0_i32_0 = arith.constant 0 : i32
    %c0_i32_1 = arith.constant 0 : i32
    return %arg1, %c0_i32, %c0_i32_0 : i32, i32, i32
  }
  func.func @transform_6(%arg0: i32, %arg1: i32) -> (i32, i32, i32) {
    %c0_i32 = arith.constant 0 : i32
    %c0_i32_0 = arith.constant 0 : i32
    %c0_i32_1 = arith.constant 0 : i32
    return %arg1, %c0_i32, %c0_i32_0 : i32, i32, i32
  }
  func.func @transform_7(%arg0: i32, %arg1: i32) -> (i32, i32, i32) {
    %c0_i32 = arith.constant 0 : i32
    %c0_i32_0 = arith.constant 0 : i32
    %c0_i32_1 = arith.constant 0 : i32
    return %arg1, %c0_i32, %c0_i32_0 : i32, i32, i32
  }
  func.func @transform_8(%arg0: i32, %arg1: i32) -> (i32, i32, i32, i32) {
    %c0_i32 = arith.constant 0 : i32
    %c0_i32_0 = arith.constant 0 : i32
    %c0_i32_1 = arith.constant 0 : i32
    %c0_i32_2 = arith.constant 0 : i32
    return %arg1, %c0_i32, %c0_i32_0, %c0_i32_1 : i32, i32, i32, i32
  }
  func.func @transform_9(%arg0: i32, %arg1: i32) -> (i32, i32, i32, i32) {
    %c0_i32 = arith.constant 0 : i32
    %c0_i32_0 = arith.constant 0 : i32
    %c0_i32_1 = arith.constant 0 : i32
    %c0_i32_2 = arith.constant 0 : i32
    return %arg1, %c0_i32, %c0_i32_0, %c0_i32_1 : i32, i32, i32, i32
  }
  func.func @transform_10(%arg0: i32, %arg1: i32) -> (i32, i32, i32) {
    %c0_i32 = arith.constant 0 : i32
    %c0_i32_0 = arith.constant 0 : i32
    %c0_i32_1 = arith.constant 0 : i32
    return %arg1, %c0_i32, %c0_i32_0 : i32, i32, i32
  }
  func.func @transform_11(%arg0: i32, %arg1: i32) -> (i32, i32, i32) {
    %c0_i32 = arith.constant 0 : i32
    %c0_i32_0 = arith.constant 0 : i32
    %c0_i32_1 = arith.constant 0 : i32
    return %arg1, %c0_i32, %c0_i32_0 : i32, i32, i32
  }
  func.func @transform_12(%arg0: i32, %arg1: i32) -> (i32, i32, i32) {
    %c0_i32 = arith.constant 0 : i32
    %c0_i32_0 = arith.constant 0 : i32
    %c0_i32_1 = arith.constant 0 : i32
    return %arg1, %c0_i32, %c0_i32_0 : i32, i32, i32
  }
  func.func @transform_13(%arg0: i32, %arg1: i32) -> (i32, i32, i32) {
    %c0_i32 = arith.constant 0 : i32
    %c0_i32_0 = arith.constant 0 : i32
    %c0_i32_1 = arith.constant 0 : i32
    return %arg1, %c0_i32, %c0_i32_0 : i32, i32, i32
  }
  func.func @transform_14(%arg0: i32, %arg1: i32) -> (i32, i32, i32) {
    %c0_i32 = arith.constant 0 : i32
    %c0_i32_0 = arith.constant 0 : i32
    %c0_i32_1 = arith.constant 0 : i32
    return %arg1, %c0_i32, %c0_i32_0 : i32, i32, i32
  }
  func.func @transform_15(%arg0: i32, %arg1: i32) -> (i32, i32, i32) {
    %c0_i32 = arith.constant 0 : i32
    %c0_i32_0 = arith.constant 0 : i32
    %c0_i32_1 = arith.constant 0 : i32
    return %arg1, %c0_i32, %c0_i32_0 : i32, i32, i32
  }
  func.func @transform_16(%arg0: i32, %arg1: i32) -> (i32, i32, i32) {
    %c0_i32 = arith.constant 0 : i32
    %c0_i32_0 = arith.constant 0 : i32
    %c0_i32_1 = arith.constant 0 : i32
    return %arg1, %c0_i32, %c0_i32_0 : i32, i32, i32
  }
  func.func @transform_17(%arg0: i32, %arg1: i32) -> (i32, i32, i32) {
    %c0_i32 = arith.constant 0 : i32
    %c0_i32_0 = arith.constant 0 : i32
    %c0_i32_1 = arith.constant 0 : i32
    return %arg1, %c0_i32, %c0_i32_0 : i32, i32, i32
  }
  func.func @transform_18(%arg0: i32, %arg1: i32) -> (i32, i32, i32) {
    %c0_i32 = arith.constant 0 : i32
    %c0_i32_0 = arith.constant 0 : i32
    %c0_i32_1 = arith.constant 0 : i32
    return %arg1, %c0_i32, %c0_i32_0 : i32, i32, i32
  }
  func.func @transform_19(%arg0: i32, %arg1: i32) -> (i32, i32, i32) {
    %c0_i32 = arith.constant 0 : i32
    %c0_i32_0 = arith.constant 0 : i32
    %c0_i32_1 = arith.constant 0 : i32
    return %arg1, %c0_i32, %c0_i32_0 : i32, i32, i32
  }
  func.func @transform_20(%arg0: i32, %arg1: i32) -> (i32, i32) {
    %c0_i32 = arith.constant 0 : i32
    %c0_i32_0 = arith.constant 0 : i32
    %c0_i32_1 = arith.constant 0 : i32
    return %c0_i32, %c0_i32_0 : i32, i32
  }
  func.func @transform_21(%arg0: i32, %arg1: i32) -> (i32, i32) {
    %c0_i32 = arith.constant 0 : i32
    %c0_i32_0 = arith.constant 0 : i32
    %c0_i32_1 = arith.constant 0 : i32
    return %c0_i32, %c0_i32_0 : i32, i32
  }
  func.func @transform_22(%arg0: i32, %arg1: i32) -> (i32, i32) {
    %c0_i32 = arith.constant 0 : i32
    %c0_i32_0 = arith.constant 0 : i32
    %c0_i32_1 = arith.constant 0 : i32
    return %c0_i32, %c0_i32_0 : i32, i32
  }
  func.func @transform_23(%arg0: i32, %arg1: i32) -> (i32, i32) {
    %c0_i32 = arith.constant 0 : i32
    %c0_i32_0 = arith.constant 0 : i32
    %c0_i32_1 = arith.constant 0 : i32
    return %c0_i32, %c0_i32_0 : i32, i32
  }
  func.func @transform_24(%arg0: i32, %arg1: i32) -> (i32, i32, i32) {
    %c0_i32 = arith.constant 0 : i32
    %c0_i32_0 = arith.constant 0 : i32
    %c0_i32_1 = arith.constant 0 : i32
    return %arg0, %c0_i32, %c0_i32_0 : i32, i32, i32
  }
}

</mosaic_0001>

<bundles_post_ra>
// kernel: transformer_forward.2
= control target key start
LH: loop header
LB: loop body
LE: loop exit
PB: predicated region body
PF: predicated region fallthrough
CT: control target
= control target key end

     0   :  { %s3389_s0 = inlined_call_operand.vmem [shape: f32[2,8,32], index: 0, kind: input, shape index: {}]   ;;  %s3390_s1 = inlined_call_operand.vmem [shape: bf16[2,3,32,32], index: 1, kind: input, shape index: {}]   ;;  %s3391_s2 = inlined_call_operand.hbm [shape: f32[2,3,1,32], index: 2, kind: input, shape index: {}]   ;;  %s3392_s3 = inlined_call_operand.vmem [shape: bf16[2,32,32], index: 3, kind: input, shape index: {}]   ;;  %s3393_s4 = inlined_call_operand.hbm [shape: f32[2,1,32], index: 4, kind: input, shape index: {}]   ;;  %s3394_s5 = inlined_call_operand.hbm [shape: f32[2,1,32], index: 5, kind: input, shape index: {}]   ;;  %s3395_s6 = inlined_call_operand.hbm [shape: f32[2,1,32], index: 6, kind: input, shape index: {}]   ;;  %s3396_s7 = inlined_call_operand.vmem [shape: bf16[2,32,64], index: 7, kind: input, shape index: {}]   ;;  %s3397_s8 = inlined_call_operand.hbm [shape: f32[2,1,64], index: 8, kind: input, shape index: {}]   ;;  %s3398_s9 = inlined_call_operand.vmem [shape: bf16[2,64,32], index: 9, kind: input, shape index: {}]   ;;  %s3399_s10 = inlined_call_operand.hbm [shape: f32[2,1,32], index: 10, kind: input, shape index: {}]   ;;  %s3400_s11 = inlined_call_operand.hbm [shape: f32[2,1,32], index: 11, kind: input, shape index: {}]   ;;  %s3401_s12 = inlined_call_operand.hbm [shape: f32[2,1,32], index: 12, kind: input, shape index: {}]   ;;  %s3402_s13 = inlined_call_operand.vmem [shape: f32[1,32], index: 13, kind: input, shape index: {}]   ;;  %s3403_s14 = inlined_call_operand.hbm [shape: f32[1,32], index: 14, kind: input, shape index: {}]   ;;  %s3404_s15 = inlined_call_operand.vmem [shape: f32[2,8,32], index: 15, kind: output, shape index: {}]  }
   0x1   :  { %3415 = sst [smem:[#allocation30_spill]] %s3389_s0 }
   0x2   :  { %3416 = sst [smem:[#allocation31_spill]] %s3390_s1 }
   0x3   :  { %3417 = sst [smem:[#allocation32_spill]] %s3391_s2 }
   0x4   :  { %3418 = sst [smem:[#allocation33_spill]] %s3392_s3 }
   0x5   :  { %3419 = sst [smem:[#allocation34_spill]] %s3393_s4 }
   0x6   :  { %3420 = sst [smem:[#allocation35_spill]] %s3394_s5 }
   0x7   :  { %3421 = sst [smem:[#allocation36_spill]] %s3395_s6 }
   0x8   :  { %3422 = sst [smem:[#allocation37_spill]] %s3396_s7 }
   0x9   :  { %3423 = sst [smem:[#allocation38_spill]] %s3397_s8 }
   0xa   :  { %3424 = sst [smem:[#allocation39_spill]] %s3398_s9 }
   0xb   :  { %3425 = sst [smem:[#allocation40_spill]] %s3399_s10 }
   0xc   :  { %3426 = sst [smem:[#allocation41_spill]] %s3402_s13 }
   0xd   :  { %3427 = sst [smem:[#allocation42_spill]] %s3403_s14 }
   0xe   :  { %3428 = sst [smem:[#allocation43_spill]] %s3404_s15 }
   0xf   :  { %20 = vsyncpa [#allocation4], 0 }
  0x10   :  { %22 = vsyncpa [#allocation4 + $0x1], 0 }
  0x11   :  { %23 = vsyncpa [#allocation6], 0 }
  0x12   :  { %25 = vsyncpa [#allocation6 + $0x1], 0 }
  0x13   :  { %26 = vsyncpa [#allocation9], 0 }
  0x14   :  { %28 = vsyncpa [#allocation9 + $0x1], 0 }
  0x15   :  { %29 = vsyncpa [#allocation12], 0 }
  0x16   :  { %31 = vsyncpa [#allocation12 + $0x1], 0 }
  0x17   :  { %32 = vsyncpa [#allocation15], 0 }
  0x18   :  { %34 = vsyncpa [#allocation15 + $0x1], 0  ;;  %s2949_s18 = smov 0   ;;  %s2951_s19 = smov 0  }
  0x19   :  { %s2953_s20 = smov 0   ;;  %s2955_s21 = smov 0  }
  0x1a   :  { %s2957_s22 = smov 0   ;;  %s2959_s23 = smov 0  }
  0x1b   :  { %s2961_s24 = smov 0   ;;  %s2963_s25 = smov 0  }
  0x1c LB: > { %3429 = sst [smem:[#allocation23_spill]] %s2828_s20  ;;  %s3406_s26 = sadd.s32 4294967295, %s2848_s25   ;;  %s2848_s25 = sphi %s2963_s25, %s40_s25   ;;  %s2844_s24 = sphi %s2961_s24, %s3481_s24   ;;  %s2840_s23 = sphi %s2959_s23, %s3480_s23   ;;  %s2836_s22 = sphi %s2957_s22, %s3473_s22   ;;  %s2832_s21 = sphi %s2955_s21, %s3479_s21   ;;  %s2828_s20 = sphi %s2953_s20, %s3478_s20   ;;  %s2824_s19 = sphi %s2951_s19, %s3477_s19   ;;  %s2820_s18 = sphi %s2949_s18, %s3476_s18  }
  0x1d   : > { %3430 = sst [smem:[#allocation24_spill]] %s2832_s21  ;;  %s49_s27 = sadd.s32 1, %s2840_s23 }
  0x1e   : > { %3431 = sst [smem:[#allocation25_spill]] %s2836_s22  ;;  %p50_p0 = scmp.ge.s32.totalorder %s49_s27, 2 }
  0x1f   : > { %3432 = sst [smem:[#allocation26_spill]] %s2844_s24  ;;  %s52_s28 = sadd.s32 1, %s2844_s24 }
  0x20   : > { %s111_s29 = sadd.s32 1, %s2828_s20  ;;  %p118_p1 = scmp.ne.s32.totalorder %s2828_s20, %s2824_s19 }
  0x21   : > { %s3483_s27 = smov (%p50_p0, %s49_s27), 0  ;;  %s3485_s28 = smov (!%p50_p0, %s52_s28), %s2844_s24 }
  0x22   : > { %3433 = sst [smem:[#allocation27_spill]] %s3483_s27  ;;  %s108_s30 = ssub.s32 %s2840_s23, %s3483_s27 }
  0x23   : > { %p119_p2 = scmp.eq.s32.totalorder %s2848_s25, 0  ;;  %p54_p3 = scmp.ge.s32.totalorder %s3485_s28, 2 }
  0x24   : > { %p109_p4 = scmp.eq.s32.totalorder %s108_s30, 0  ;;  %p124_p6 = scmp.ne.s32.totalorder %s2824_s19, %s2820_s18 }
  0x25   : > { %p2999_p5 = por %p119_p2, %p118_p1  ;;  %s3487_s28 = smov (%p54_p3, %s3485_s28), 0 }
  0x26   : > { %3435 = sst [smem:[#allocation28_spill]] %s3487_s28  ;;  %p3011_p7 = scmp.eq.s32.totalorder %s3406_s26, 0 }
  0x27   : > { %s3007_s17 = scalar_select %p109_p4, %s2828_s20, %s111_s29  }
  0x28   : > { %p2140_p8 = scmp.ge.s32.totalorder %s2848_s25, 1  ;;  %p463_p9 = scmp.lt.s32.totalorder %s2848_s25, 5 }
  0x29   : > { %3436 = sst [smem:[#allocation29_spill]] %s3007_s17  ;;  %p3019_p10 = por %p3011_p7, %p124_p6 }
  0x2a   : > { %p3023_p11 = pnand %p2140_p8, %p463_p9  ;;  %s2850_s29 = smov [#allocation16]  }
  0x2b   : > { %s3438_s30 = scalar_select %p3019_p10, 1, 0 }
  0x2c   : > { %s3439_s18 = scalar_select %p3023_p11, 1, 0 }
  0x2d   : > { %s479_s28 = sshll.u32 %s2850_s29, 4  ;;  %p2369_p12 = pneg %p3023_p11  ;;  %s480_s28 = int_to_ptr.vmem [resolvable:$true] %s479_s28 }
  0x2e   : > { %p2399_p13 = scmp.lt.s32.totalorder %s2848_s25, 4  ;;  %s3031_s26 = sand.u32 1, %s2828_s20  }
  0x2f   : > { %s3034_s27 = sand.u32 1, %s2848_s25   ;;  %p2370_p0 = pnand %p2369_p12, %p3011_p7 }
  0x30   : > { %p3040_p1 = pnand %p2399_p13, %p2999_p5  ;;  %s2523_s13 = scalar_lea.vmem %s480_s28, 16 }
  0x31   : > { %p2514_p2 = pneg %p2370_p0  ;;  %p2524_p3 = scmp.ne.s32.totalorder %s480_s28, %s2523_s13 }
  0x32   : > { %s2530_s29 = scalar_lea.vmem %s480_s28, 32  ;;  %p2531_p8 = scmp.lt.s32.totalorder %s480_s28, %s480_s28 }
  0x33   : > { %p2526_p4 = pnand %p2524_p3, %p2514_p2  ;;  %p2532_p9 = scmp.lt.s32.totalorder %s2530_s29, %s2523_s13 }
  0x35   : > { %p2527_p6 = pneg %p2526_p4  ;;  %p2533_p10 = por %p2532_p9, %p2531_p8 }
  0x37   : > { %p2534_p11 = pnand %p2533_p10, %p2527_p6 }
  0x39   : > { %2537 = shalt.err (!%p2534_p11)
}
  0x3a   : > { %s3441_s14 = sld [smem:[#allocation42_spill]]  ;;  %s3048_s16 = sshll.u32 %s2840_s23, 4 }
  0x3b   : > { %s537_s9 = scalar_lea.vmem [#allocation5], %s3031_s26  ;;  %s3442_s4 = sld [smem:[#allocation34_spill]] }
  0x3c   : > { %s544_s7 = sshll.u32 %s537_s9, 4  ;;  %s3413_s29 = scalar_lea.sflag [#allocation6], %s3034_s27  ;;  %s545_s7 = int_to_ptr.vmem [resolvable:$true] %s544_s7 }
  0x3d   : > { %p3058_p5 = pneg %p3040_p1  ;;  %s2551_s15 = scalar_lea.vmem %s545_s7, 16 }
  0x3e   : > { %p2552_p10 = scmp.ne.s32.totalorder %s545_s7, %s2551_s15  ;;  %s2851_s20 = smov [#allocation5]  }
  0x40   : > { %2372 = dma.hbm_to_vmem [thread:$0]  (!%p2370_p0), %s3441_s14, 16, %s480_s28, [#allocation15]  }
  0x41   : > { %s542_s13 = scalar_lea.hbm %s3442_s4, %s3048_s16  ;;  %p2554_p11 = pnand %p2552_p10, %p3058_p5 }
  0x42   : > { %s2556_s28 = sshll.u32 %s2851_s20, 4  ;;  %s2557_s28 = int_to_ptr.vmem [resolvable:$false] %s2556_s28 }
  0x43   : > { %p2555_p12 = pneg %p2554_p11  ;;  %s2558_s9 = scalar_lea.vmem %s2557_s28, 32 }
  0x44   : > { %p2559_p13 = scmp.lt.s32.totalorder %s545_s7, %s2557_s28  ;;  %p2560_p0 = scmp.lt.s32.totalorder %s2558_s9, %s2551_s15 }
  0x46   : > { %p2561_p2 = por %p2560_p0, %p2559_p13 }
  0x48   : > { %p2562_p3 = pnand %p2561_p2, %p2555_p12 }
  0x4a   : > { %2565 = shalt.err (!%p2562_p3)
}
  0x4b   : > { %2379 = dma.hbm_to_vmem [thread:$0]  (!%p3040_p1), %s542_s13, 16, %s545_s7, %s3413_s29  }
  0x4c   : > { %s3444_s6 = sld [smem:[#allocation36_spill]]  ;;  %s571_s4 = scalar_lea.vmem [#allocation8], %s3031_s26 }
  0x4d   : > { %s578_s14 = sshll.u32 %s571_s4, 4  ;;  %s3414_s15 = scalar_lea.sflag [#allocation9], %s3034_s27  ;;  %s579_s14 = int_to_ptr.vmem [resolvable:$true] %s578_s14 }
  0x4e   : > { %s2579_s28 = scalar_lea.vmem %s579_s14, 16  ;;  %s2852_s9 = smov [#allocation8]  }
  0x4f   : > { %p2580_p4 = scmp.ne.s32.totalorder %s579_s14, %s2579_s28  ;;  %s2584_s21 = sshll.u32 %s2852_s9, 4  ;;  %s2585_s21 = int_to_ptr.vmem [resolvable:$false] %s2584_s21 }
  0x50   : > { %s2586_s22 = scalar_lea.vmem %s2585_s21, 32  ;;  %p2587_p9 = scmp.lt.s32.totalorder %s579_s14, %s2585_s21 }
  0x51   : > { %p2582_p6 = pnand %p2580_p4, %p3058_p5  ;;  %p2588_p10 = scmp.lt.s32.totalorder %s2586_s22, %s2579_s28 }
  0x52   : > { %s576_s20 = scalar_lea.hbm %s3444_s6, %s3048_s16 }
  0x53   : > { %p2583_p8 = pneg %p2582_p6  ;;  %p2589_p11 = por %p2588_p10, %p2587_p9 }
  0x55   : > { %p2590_p12 = pnand %p2589_p11, %p2583_p8 }
  0x57   : > { %2593 = shalt.err (!%p2590_p12)
}
  0x58   : > { %2385 = dma.hbm_to_vmem [thread:$0]  (!%p3040_p1), %s576_s20, 16, %s579_s14, %s3414_s15  }
  0x59   : > { %s3445_s10 = sld [smem:[#allocation40_spill]]  ;;  %s621_s1 = scalar_lea.vmem [#allocation11], %s3031_s26 }
  0x5a   : > { %s628_s21 = sshll.u32 %s621_s1, 4  ;;  %s2345_s22 = smul.u32 3, %s3031_s26  ;;  %s629_s21 = int_to_ptr.vmem [resolvable:$true] %s628_s21 }
  0x5b   : > { %s619_s3 = scalar_lea.sflag [#allocation12], %s3034_s27  ;;  %s2607_s28 = scalar_lea.vmem %s629_s21, 16 }
  0x5c   : > { %p2608_p13 = scmp.ne.s32.totalorder %s629_s21, %s2607_s28  ;;  %s2853_s9 = smov [#allocation11]  }
  0x5d   : > { %s2612_s29 = sshll.u32 %s2853_s9, 4  ;;  %s2613_s29 = int_to_ptr.vmem [resolvable:$false] %s2612_s29 }
  0x5e   : > { %p2610_p0 = pnand %p2608_p13, %p3058_p5  ;;  %s2614_s6 = scalar_lea.vmem %s2613_s29, 32 }
  0x5f   : > { %s626_s13 = scalar_lea.hbm %s3445_s10, %s3048_s16  ;;  %p2615_p3 = scmp.lt.s32.totalorder %s629_s21, %s2613_s29 }
  0x60   : > { %p2611_p2 = pneg %p2610_p0  ;;  %p2616_p4 = scmp.lt.s32.totalorder %s2614_s6, %s2607_s28 }
  0x62   : > { %p2617_p6 = por %p2616_p4, %p2615_p3 }
  0x64   : > { %p2618_p8 = pnand %p2617_p6, %p2611_p2 }
  0x66   : > { %2621 = shalt.err (!%p2618_p8)
}
  0x67   : > { %2391 = dma.hbm_to_vmem [thread:$0]  (!%p3040_p1), %s626_s13, 16, %s629_s21, %s619_s3  }
  0x68   : > { %s2346_s14 = smul.u32 48, %s2840_s23  ;;  %s509_s20 = scalar_lea.vmem [#allocation3], %s2345_s22 }
  0x69   : > { %s516_s4 = sshll.u32 %s509_s20, 4  ;;  %s3446_s2 = sld [smem:[#allocation32_spill]]  ;;  %s517_s4 = int_to_ptr.vmem [resolvable:$true] %s516_s4 }
  0x6a   : > { %s506_s6 = scalar_lea.sflag [#allocation4], %s3031_s26  ;;  %s2635_s29 = scalar_lea.vmem %s517_s4, 48 }
  0x6b   : > { %p2636_p9 = scmp.ne.s32.totalorder %s517_s4, %s2635_s29  ;;  %s2854_s28 = smov [#allocation3]  }
  0x6c   : > { %s2640_s15 = sshll.u32 %s2854_s28, 4  ;;  %s2641_s15 = int_to_ptr.vmem [resolvable:$false] %s2640_s15 }
  0x6d   : > { %p2638_p10 = pnand %p2636_p9, %p3058_p5  ;;  %s2642_s10 = scalar_lea.vmem %s2641_s15, 96 }
  0x6e   : > { %p2643_p12 = scmp.lt.s32.totalorder %s517_s4, %s2641_s15  ;;  %p2644_p13 = scmp.lt.s32.totalorder %s2642_s10, %s2635_s29 }
  0x6f   : > { %s515_s9 = scalar_lea.hbm %s3446_s2, %s2346_s14  ;;  %p2639_p11 = pneg %p2638_p10 }
  0x70   : > { %p2645_p0 = por %p2644_p13, %p2643_p12 }
  0x72   : > { %p2646_p2 = pnand %p2645_p0, %p2639_p11 }
  0x74   : > { %2649 = shalt.err (!%p2646_p2)
}
  0x75   : > { %s2855_s13 = smov 16   ;;  %s2856_s21 = smov 1  }
  0x76   : > { %2376 = dma.hbm_to_vmem [thread:$0]  (!%p3040_p1), %s515_s9, 48, %s517_s4, %s506_s6, %s2855_s13, %s2855_s13, %s2856_s21  }
  0x77   : > { %s3447_s5 = sld [smem:[#allocation35_spill]]  ;;  %s554_s7 = scalar_lea.vmem [#allocation7], %s3031_s26 }
  0x78   : > { %s561_s1 = sshll.u32 %s554_s7, 4  ;;  %s2857_s10 = smov [#allocation7]   ;;  %s562_s1 = int_to_ptr.vmem [resolvable:$true] %s561_s1 }
  0x79   : > { %s2663_s15 = scalar_lea.vmem %s562_s1, 16  ;;  %s2668_s29 = sshll.u32 %s2857_s10, 4  ;;  %s2669_s29 = int_to_ptr.vmem [resolvable:$false] %s2668_s29 }
  0x7a   : > { %p2664_p3 = scmp.ne.s32.totalorder %s562_s1, %s2663_s15  ;;  %s2670_s28 = scalar_lea.vmem %s2669_s29, 32 }
  0x7b   : > { %p2671_p8 = scmp.lt.s32.totalorder %s562_s1, %s2669_s29  ;;  %p2672_p9 = scmp.lt.s32.totalorder %s2670_s28, %s2663_s15 }
  0x7c   : > { %p2666_p4 = pnand %p2664_p3, %p3058_p5 }
  0x7d   : > { %s559_s20 = scalar_lea.hbm %s3447_s5, %s3048_s16  ;;  %p2673_p10 = por %p2672_p9, %p2671_p8 }
  0x7e   : > { %p2667_p6 = pneg %p2666_p4 }
  0x80   : > { %p2674_p11 = pnand %p2673_p10, %p2667_p6 }
  0x82   : > { %2677 = shalt.err (!%p2674_p11)
}
  0x83   : > { %s3448_s4 = scalar_lea.sflag [#allocation6], %s3034_s27  ;;  %s3449_s8 = sld [smem:[#allocation38_spill]] }
  0x84   : > { %2382 = dma.hbm_to_vmem [thread:$0]  (!%p3040_p1), %s559_s20, 16, %s562_s1, %s3448_s4  }
  0x85   : > { %s596_s21 = scalar_lea.vmem [#allocation10], %s3031_s26  ;;  %s2858_s7 = smov [#allocation10]  }
  0x86   : > { %s603_s22 = sshll.u32 %s596_s21, 4  ;;  %s2696_s15 = sshll.u32 %s2858_s7, 4  ;;  %s604_s22 = int_to_ptr.vmem [resolvable:$true] %s603_s22  ;;  %s2697_s15 = int_to_ptr.vmem [resolvable:$false] %s2696_s15 }
  0x87   : > { %s2691_s14 = scalar_lea.vmem %s604_s22, 16  ;;  %s2698_s10 = scalar_lea.vmem %s2697_s15, 32 }
  0x88   : > { %p2692_p12 = scmp.ne.s32.totalorder %s604_s22, %s2691_s14  ;;  %p2699_p2 = scmp.lt.s32.totalorder %s604_s22, %s2697_s15 }
  0x89   : > { %s601_s13 = scalar_lea.hbm %s3449_s8, %s3048_s16  ;;  %p2700_p3 = scmp.lt.s32.totalorder %s2698_s10, %s2691_s14 }
  0x8a   : > { %p2694_p13 = pnand %p2692_p12, %p3058_p5 }
  0x8b   : > { %p2701_p4 = por %p2700_p3, %p2699_p2 }
  0x8c   : > { %p2695_p0 = pneg %p2694_p13 }
  0x8e   : > { %p2702_p6 = pnand %p2701_p4, %p2695_p0 }
  0x90   : > { %2705 = shalt.err (!%p2702_p6)
}
  0x91   : > { %s3450_s20 = scalar_lea.sflag [#allocation9], %s3034_s27  ;;  %s643_s28 = scalar_lea.hbm %s3400_s11, %s3048_s16 }
  0x92   : > { %2388 = dma.hbm_to_vmem [thread:$0]  (!%p3040_p1), %s601_s13, 16, %s604_s22, %s3450_s20  }
  0x93   : > { %s638_s4 = scalar_lea.vmem [#allocation13], %s3031_s26  ;;  %s2859_s21 = smov [#allocation13]  }
  0x94   : > { %s645_s9 = sshll.u32 %s638_s4, 4  ;;  %s2724_s14 = sshll.u32 %s2859_s21, 4  ;;  %s646_s9 = int_to_ptr.vmem [resolvable:$true] %s645_s9  ;;  %s2725_s14 = int_to_ptr.vmem [resolvable:$false] %s2724_s14 }
  0x95   : > { %s2719_s6 = scalar_lea.vmem %s646_s9, 16  ;;  %s2726_s7 = scalar_lea.vmem %s2725_s14, 32 }
  0x96   : > { %p2720_p8 = scmp.ne.s32.totalorder %s646_s9, %s2719_s6  ;;  %p2727_p11 = scmp.lt.s32.totalorder %s646_s9, %s2725_s14 }
  0x97   : > { %p2728_p12 = scmp.lt.s32.totalorder %s2726_s7, %s2719_s6 }
  0x98   : > { %p2722_p9 = pnand %p2720_p8, %p3058_p5 }
  0x99   : > { %p2729_p13 = por %p2728_p12, %p2727_p11 }
  0x9a   : > { %p2723_p10 = pneg %p2722_p9 }
  0x9c   : > { %p2730_p0 = pnand %p2729_p13, %p2723_p10 }
  0x9e   : > { %2733 = shalt.err (!%p2730_p0)
}
  0x9f   : > { %2394 = dma.hbm_to_vmem [thread:$0]  (!%p3040_p1), %s643_s28, 16, %s646_s9, %s619_s3  }
  0xa0   : > { %s660_s15 = scalar_lea.hbm %s3401_s12, %s3048_s16  ;;  %s655_s10 = scalar_lea.vmem [#allocation14], %s3031_s26 }
  0xa1   : > { %s662_s20 = sshll.u32 %s655_s10, 4  ;;  %s653_s1 = scalar_lea.sflag [#allocation15], %s3034_s27  ;;  %s663_s20 = int_to_ptr.vmem [resolvable:$true] %s662_s20 }
  0xa2   : > { %s2747_s29 = scalar_lea.vmem %s663_s20, 16  ;;  %s2860_s4 = smov [#allocation14]  }
  0xa3   : > { %p2748_p2 = scmp.ne.s32.totalorder %s663_s20, %s2747_s29  ;;  %s2752_s6 = sshll.u32 %s2860_s4, 4  ;;  %s2753_s6 = int_to_ptr.vmem [resolvable:$false] %s2752_s6 }
  0xa4   : > { %s2754_s21 = scalar_lea.vmem %s2753_s6, 32  ;;  %p2755_p6 = scmp.lt.s32.totalorder %s663_s20, %s2753_s6 }
  0xa5   : > { %p2750_p3 = pnand %p2748_p2, %p3058_p5  ;;  %p2756_p8 = scmp.lt.s32.totalorder %s2754_s21, %s2747_s29 }
  0xa7   : > { %p2751_p4 = pneg %p2750_p3  ;;  %p2757_p9 = por %p2756_p8, %p2755_p6 }
  0xa9   : > { %p2758_p10 = pnand %p2757_p9, %p2751_p4 }
  0xab   : > { %2761 = shalt.err (!%p2758_p10)
}
  0xac   : > { %2397 = dma.hbm_to_vmem [thread:$0]  (!%p3040_p1), %s660_s15, 16, %s663_s20, %s653_s1  }
  0xad   : > { %p3451_p11 = scmp.ne.s32.totalorder %s3439_s18, 0 }
  0xae   : > { %s3148_s0 = sand.u32 (!%p3451_p11), 1, %s2824_s19   ;;  %p3452_p5 = scmp.ne.s32.totalorder (!%p3451_p11), %s3438_s30, 0 }
  0xaf   : > { %671 = sbr.rel (%p3451_p11) target bundleno = 2895 (0xb4f), region = 80  ;;  %s674_s27 = scalar_lea.sflag (!%p3451_p11), [#allocation4], %s3148_s0 }
  0xb0   : > { %s2347_s26 = smul.u32 (!%p3451_p11), 3, %s3148_s0 }
  0xb2   : > { %s3152_s16 = scalar_lea.vmem (!%p3451_p11), [#allocation3], %s2347_s26 }
  0xb4   : > { %2795 = dma.done.wait (%p3452_p5), %s674_s27, 48  }
  0xb5   : > { %2797 = vsyncadd (%p3452_p5), %s674_s27, 4294967248  ;;  %s3453_s17 = sadd.s32 4294967295, %s2848_s25  }
  0xb6   : > { %s682_s18 = sand.u32 1, %s3453_s17  }
  0xb7   : > { %s683_s3 = scalar_lea.sflag [#allocation6], %s682_s18 }
  0xb8   : > { %2799 = dma.done.wait (%p3452_p5), %s683_s3, 32  }
  0xb9   : > { %2801 = vsyncadd (%p3452_p5), %s683_s3, 4294967264  ;;  %s699_s14 = scalar_lea.sflag [#allocation9], %s682_s18 }
  0xba   : > { %2803 = dma.done.wait (%p3452_p5), %s699_s14, 32  }
  0xbb   : > { %2805 = vsyncadd (%p3452_p5), %s699_s14, 4294967264  ;;  %s715_s22 = scalar_lea.sflag [#allocation12], %s682_s18 }
  0xbc   : > { %2807 = dma.done.wait (%p3452_p5), %s715_s22, 32  }
  0xbd   : > { %2809 = vsyncadd (%p3452_p5), %s715_s22, 4294967264  ;;  %s731_s20 = scalar_lea.sflag [#allocation15], %s682_s18 }
  0xbe   : > { %2811 = dma.done.wait (%p3452_p5), %s731_s20, 16  }
  0xbf   : > { %2813 = vsyncadd (%p3452_p5), %s731_s20, 4294967280 }
  0xc0   : > { %2815 = dma.done.wait (%p3011_p7), [#allocation15], 16  }
  0xc1   : > { %2817 = vsyncadd (%p3011_p7), [#allocation15], 4294967280  ;;  %s3454_s29 = sld [smem:[#allocation25_spill]] }
  0xc2   : > { %s3455_s4 = sld [smem:[#allocation24_spill]] }
  0xc3   : > { %s3456_s17 = sld [smem:[#allocation30_spill]] }
  0xc4   : > { %s3457_s24 = sld [smem:[#allocation31_spill]] }
  0xc5   : > { %s3458_s13 = sld [smem:[#allocation33_spill]] }
  0xc6   : > { %s3461_s22 = sld [smem:[#allocation43_spill]] }
  0xc7   : > { %p835_p1 = scmp.lt.s32.totalorder %s3454_s29, 1 }
  0xc8   : > { %p839_p12 = scmp.lt.s32.totalorder %s3455_s4, 1  ;;  %p2162_p7 = scmp.ne.s32.totalorder %s3455_s4, 0 }
  0xc9   : > { %s3489_s29 = smov (!%p835_p1, %s3454_s29), 1 }
  0xca   : > { %s840_s6 = scalar_select %p839_p12, %s3455_s4, 1 }
  0xcb   : > { %s2153_s21 = sshll.u32 %s3489_s29, 3  ;;  %s3459_s29 = sld [smem:[#allocation37_spill]] }
  0xcc   : > { %s838_s30 = scalar_lea.vmem %s3456_s17, %s2153_s21  ;;  %s2348_s18 = smul.u32 48, %s840_s6 }
  0xcd   : > { %s2206_s3 = sshll.u32 %s840_s6, 4  ;;  %s2208_s14 = sshll.u32 %s840_s6, 5 }
  0xce   : > { %s3197_s1 = scalar_lea.vmem %s3457_s24, %s2348_s18  ;;  %s3202_s7 = scalar_lea.vmem %s3458_s13, %s2206_s3 }
  0xcf   : > { %s3460_s17 = sld [smem:[#allocation39_spill]]  ;;  %s3217_s18 = scalar_lea.vmem %s3461_s22, %s2153_s21 }
  0xd1   : > { %s3207_s2 = scalar_lea.vmem %s3459_s29, %s2206_s3  ;;  %867 = sbr.rel (%p2162_p7) target bundleno = 216 (0xd8), region = 120 }
  0xd5   : > { %s3212_s5 = scalar_lea.vmem %s3460_s17, %s2208_s14 }
  0xd6   : > { %v868_v0 = vld [vmem:[%s838_s30] sm:$0xff]  ;;  %vm869_vm0 = vcmask 261120  }
  0xd7   : > { %870 = vst.msk [vmem:[#allocation2] sm:$0xff] %vm869_vm0, %v868_v0 }
  0xd8 PF: > { %v2476_v1 = vld [vmem:[%s3197_s1 + $0x8] sm:$0xff]   ;;  %v2861_v2 = vmov 0.0   ;;  %v2477_v3 = vld [vmem:[%s3197_s1 + $0x18] sm:$0xff]   ;;  %v2478_v4 = vld [vmem:[%s3197_s1] sm:$0xff]   ;;  %vm2862_vm1 = vmmov 0   ;;  %vm911_vm2 = vcmask 261120  }
  0xd9   : > { %2245 = vmatprep.subr.bf16.mxu0 %v2861_v2  ;;  %2253 = vmatprep.subr.bf16.mxu1 %v2861_v2  ;;  %v2479_v5 = vld [vmem:[%s3197_s1 + $0x10] sm:$0xff]   ;;  %v2480_v8 = vld [vmem:[%s3197_s1 + $0x28] sm:$0xff]   ;;  %v2481_v9 = vld [vmem:[%s3197_s1 + $0x20] sm:$0xff]   ;;  %s2863_s8 = smov 120   ;;  %vm1113_vm3 = vcmask 64512   ;;  %s2864_s28 = smov 104  }
  0xda   : > { %2246 = vmatpush3.bf16.msra.mxu0 %v2476_v1  ;;  %2249 = vmatprep.mubr.msk.bf16.mxu0 %vm2862_vm1, %v2861_v2  ;;  %v2163_v10 = vld [vmem:[%s3152_s16] ss:$0 sm:$0xff]  ;;  %v2167_v11 = vld [vmem:[%s3152_s16 + $0x1] ss:$0 sm:$0xff]  ;;  %s2865_s9 = smov 112   ;;  %vm1353_vm4 = vcmask 1043456  }
  0xdb   : > { %2254 = vmatpush3.bf16.msra.mxu1 %v2477_v3  ;;  %2247 = vmatprep.subr.bf16.mxu0 %v2861_v2  ;;  %v2171_v32 = vld [vmem:[%s3152_s16 + $0x2] ss:$0 sm:$0xff]  ;;  %s2866_s16 = smov 8   ;;  %s2867_s13 = smov 16   ;;  %vm1548_vm5 = vcmask 130048   ;;  %vm1550_vm6 = vcmask 195584  }
  0xdc   : > { %2255 = vmatprep.subr.bf16.mxu1 %v2861_v2  ;;  %2257 = vmatprep.mubr.msk.bf16.mxu1 %vm2862_vm1, %v2861_v2  ;;  %s2868_s15 = smov 24   ;;  %s3464_s10 = scalar_lea.vmem [#allocation8], %s3148_s0  ;;  %vm1753_vm7 = vcmask 523264  }
  0xdd   : > { %s3465_s1 = scalar_lea.vmem [#allocation10], %s3148_s0  ;;  %s3466_s4 = scalar_lea.vmem [#allocation11], %s3148_s0 }
  0xde   : > { %v3232_v6 = vld [vmem:[#allocation2] sm:$0xff]  ;;  %2248 = vmatpush3.bf16.msra.mxu0 %v2478_v4  ;;  %s3468_s21 = scalar_lea.vmem [#allocation14], %s3148_s0  ;;  %s3469_s30 = sld [smem:[#allocation24_spill]] }
  0xdf   : > { %v892_v7 = vpack.c.bf16 %v3232_v6, %v3232_v6  ;;  %2256 = vmatpush3.bf16.msra.mxu1 %v2479_v5  ;;  %2261 = vmatprep.subr.bf16.mxu0 %v2861_v2 }
  0xe0   : > { %2269 = vmatprep.subr.bf16.mxu1 %v2861_v2 }
  0xe1   : > { %2250 = vmatmul.mubr.msk.bf16.vlgmr.msra.gmra.mxu0 %vm911_vm2, %v892_v7 }
  0xe2   : > { %2258 = vmatmul.mubr.msk.bf16.vlgmr.msra.gmra.mxu1 %vm911_vm2, %v892_v7  ;;  %2265 = vmatprep.mubr.msk.bf16.mxu0 %vm2862_vm1, %v2861_v2 }
  0xe3   : > { %2271 = vmatprep.mubr.msk.bf16.mxu1 %vm2862_vm1, %v2861_v2  ;;  %2262 = vmatpush3.bf16.msra.mxu0 %v2480_v8 }
  0xe4   : > { %2263 = vmatprep.subr.bf16.mxu0 %v2861_v2  ;;  %p2201_p13 = scmp.ne.s32.totalorder %s3469_s30, 1 }
  0xe5   : > { %s3470_s14 = sld [smem:[#allocation41_spill]] (!%p2201_p13) }
  0xe7   : > { %2264 = vmatpush3.bf16.msra.mxu0 %v2481_v9 }
  0xe8   : > { %2275 = vmatprep.subr.bf16.mxu0 %v2861_v2 }
  0xea   : > { %2266 = vmatmul.mubr.msk.bf16.vlgmr.msra.gmra.mxu0 %vm911_vm2, %v892_v7 }
  0xeb   : > { %2277 = vmatprep.mubr.msk.bf16.mxu0 %vm2862_vm1, %v2861_v2 }
 0x1a1   : > { %v949_v12 = vpop.f32.mrf.mxu0 }
 0x1a2   : > { %v950_v13 = vadd.f32 %v2163_v10, %v949_v12  ;;  %v1007_v14 = vpop.f32.mrf.mxu1 }
 0x1a3   : > { %v1008_v15 = vadd.f32 %v2167_v11, %v1007_v14  ;;  %v2251_v16 = vpop.f32.mrf.mxu0 }
 0x1a4   : > { %v2259_v17 = vpop.f32.mrf.mxu1  ;;  %1072 = vrot.lane.b32.xlu1 %v950_v13, %s2863_s8  ;;  %v1081_v24 = vpack.c.bf16 %v950_v13, %v950_v13 }
 0x1a5   : > { %1086 = vrot.lane.b32.xlu0 %v1008_v15, %s2863_s8  ;;  %v952_v18 = vpop.f32.mrf.mxu0  ;;  %v1095_v19 = vpack.c.bf16 %v1008_v15, %v1008_v15 }
 0x1a6   : > { %v1010_v20 = vpop.f32.mrf.mxu1 }
 0x1a7   : > { %v2252_v21 = vpop.f32.mrf.mxu0  ;;  %v1118_v22 = vsel %vm1113_vm3, %v1095_v19, 0 }
 0x1a8   : > { %v2260_v23 = vpop.f32.mrf.mxu1  ;;  %2270 = vmatpush3.bf16.xpose.msra.mxu1 %v1118_v22  ;;  %1092 = vrot.lane.b32.xlu1 %v1008_v15, %s2864_s28 }
 0x1a9   : > { %1089 = vrot.lane.b32.xlu0 %v1008_v15, %s2865_s9  ;;  %2281 = vmatprep.subr.bf16.mxu1 %v2861_v2 }
 0x1aa   : > { %v1065_v25 = vpop.f32.mrf.mxu0 }
 0x1ab   : > { %v3267_v37 = vadd.f32 %v2171_v32, %v1065_v25 }
 0x1ac   : > { %1078 = vrot.lane.b32.xlu1 %v950_v13, %s2864_s28  ;;  %v2267_v26 = vpop.f32.mrf.mxu0 }
 0x1ad   : > { %1075 = vrot.lane.b32.xlu0 %v950_v13, %s2865_s9  ;;  %v1109_v41 = vpack.c.bf16 %v3267_v37, %v3267_v37 }
 0x1ae   : > { %v1068_v27 = vpop.f32.mrf.mxu0 }
 0x1af   : > { %2272 = vmatmul.mubr.msk.bf16.vlgmr.msra.gmra.mxu1 %vm1113_vm3, %v1081_v24  ;;  %v1355_v45 = vsel %vm1353_vm4, %v1109_v41, 0 }
 0x1b0   : > { %2283 = vmatprep.mubr.msk.bf16.mxu1 %vm2862_vm1, %v2861_v2  ;;  %v2268_v28 = vpop.f32.mrf.mxu0 }
 0x216   : > { %v1073_v29 = vpop.permute.xlu1 %1072 }
 0x217   : > { %v1087_v30 = vpop.permute.xlu0 %1086  ;;  %v1082_v40 = vpack.c.bf16 %v1073_v29, %v1073_v29 }
 0x218   : > { %v1096_v31 = vpack.c.bf16 %v1087_v30, %v1087_v30 }
 0x21a   : > { %v1164_v33 = vsel %vm1113_vm3, %v1096_v31, 0  ;;  %v1093_v35 = vpop.permute.xlu1 %1092 }
 0x21b   : > { %v1090_v34 = vpop.permute.xlu0 %1089  ;;  %2276 = vmatpush3.bf16.xpose.msra.mxu0 %v1164_v33  ;;  %v1098_v39 = vpack.c.bf16 %v1093_v35, %v1093_v35 }
 0x21c   : > { %v1097_v36 = vpack.c.bf16 %v1090_v34, %v1090_v34  ;;  %2287 = vmatprep.subr.bf16.mxu0 %v2861_v2 }
 0x21d   : > { %v1256_v43 = vsel %vm1113_vm3, %v1098_v39, 0 }
 0x21e   : > { %v1210_v38 = vsel %vm1113_vm3, %v1097_v36, 0  ;;  %v1079_v46 = vpop.permute.xlu1 %1078 }
 0x21f   : > { %2282 = vmatpush3.bf16.xpose.msra.mxu1 %v1210_v38  ;;  %v1076_v42 = vpop.permute.xlu0 %1075  ;;  %v1084_v47 = vpack.c.bf16 %v1079_v46, %v1079_v46 }
 0x220   : > { %2293 = vmatprep.subr.bf16.mxu1 %v2861_v2  ;;  %v1083_v44 = vpack.c.bf16 %v1076_v42, %v1076_v42 }
 0x222   : > { %2278 = vmatmul.mubr.msk.bf16.vlgmr.msra.gmra.mxu0 %vm1113_vm3, %v1082_v40 }
 0x223   : > { %2288 = vmatpush3.bf16.xpose.msra.mxu0 %v1256_v43  ;;  %2289 = vmatprep.mubr.msk.bf16.mxu0 %vm2862_vm1, %v2861_v2 }
 0x224   : > { %2299 = vmatprep.subr.bf16.mxu0 %v2861_v2 }
 0x226   : > { %2284 = vmatmul.mubr.msk.bf16.vlgmr.msra.gmra.mxu1 %vm1113_vm3, %v1083_v44 }
 0x227   : > { %2294 = vmatpush3.bf16.msra.mxu1 %v1355_v45  ;;  %2295 = vmatprep.mubr.msk.bf16.mxu1 %vm2862_vm1, %v2861_v2 }
 0x228   : > { %2305 = vmatprep.subr.bf16.mxu1 %v2861_v2 }
 0x22a   : > { %2290 = vmatmul.mubr.msk.bf16.vlgmr.msra.gmra.mxu0 %vm1113_vm3, %v1084_v47 }
 0x22b   : > { %2301 = vmatprep.mubr.msk.bf16.mxu0 %vm2862_vm1, %v2861_v2 }
 0x26f   : > { %v1154_v48 = vpop.f32.mrf.mxu1 }
 0x270   : > { %v1298_v49 = vmul.f32 0.35355338, %v1154_v48 }
 0x271   : > { %v2273_v50 = vpop.f32.mrf.mxu1 }
 0x272   : > { %v1302_v51 = vsel %vm1113_vm3, %v1298_v49, -inf }
 0x273   : > { %1303 = vmax.xlane.f32.xlu0 %v1302_v51  ;;  %v1157_v52 = vpop.f32.mrf.mxu1 }
 0x275   : > { %v2274_v53 = vpop.f32.mrf.mxu1 }
 0x2e2   : > { %v1200_v54 = vpop.f32.mrf.mxu0 }
 0x2e3   : > { %v1299_v55 = vmul.f32 0.35355338, %v1200_v54 }
 0x2e4   : > { %v2279_v56 = vpop.f32.mrf.mxu0 }
 0x2e5   : > { %v1305_v57 = vsel %vm1113_vm3, %v1299_v55, -inf }
 0x2e6   : > { %v1246_v58 = vpop.f32.mrf.mxu1  ;;  %1306 = vmax.xlane.f32.xlu1 %v1305_v57  ;;  %v1203_v59 = vpop.f32.mrf.mxu0 }
 0x2e7   : > { %v1300_v60 = vmul.f32 0.35355338, %v1246_v58  ;;  %v2482_v59 = vld [vmem:[%s3202_s7 + $0x8] sm:$0xff]  }
 0x2e8   : > { %v2280_v61 = vpop.f32.mrf.mxu0  ;;  %v2285_v62 = vpop.f32.mrf.mxu1 }
 0x2e9   : > { %v1308_v63 = vsel %vm1113_vm3, %v1300_v60, -inf }
 0x2ea   : > { %1309 = vmax.xlane.f32.xlu0 %v1308_v63  ;;  %v1249_v0 = vpop.f32.mrf.mxu1  ;;  %v1292_v1 = vpop.f32.mrf.mxu0 }
 0x2eb   : > { %v1301_v3 = vmul.f32 0.35355338, %v1292_v1 }
 0x2ec   : > { %v2286_v4 = vpop.f32.mrf.mxu1  ;;  %v2291_v5 = vpop.f32.mrf.mxu0 }
 0x2ed   : > { %v1311_v7 = vsel %vm1113_vm3, %v1301_v3, -inf }
 0x2ee   : > { %1312 = vmax.xlane.f32.xlu0 %v1311_v7  ;;  %v1295_v8 = vpop.f32.mrf.mxu0 }
 0x2f0   : > { %v2292_v9 = vpop.f32.mrf.mxu0 }
 0x2f7   : > { %1100 = vrot.lane.b32.xlu1 %v3267_v37, %s2863_s8 }
 0x2fc   : > { %v1304_v10 = vpop.xlane.xlu0 %1303 }
 0x2fd   : > { %v1314_v11 = vsub.f32 %v1298_v49, %v1304_v10 }
 0x2ff   : > { %v1318_v12 = vmul.f32 1.442695, %v1314_v11 }
 0x301   : > { %2490 = vpow2.f32 %v1318_v12 }
 0x30e   : > { %v2491_v13 = vpop.eup %2490 }
 0x30f   : > { %v1326_v14 = vsel %vm1113_vm3, %v2491_v13, 0.0 }
 0x31b   : > { %1327 = vadd.xlane.f32.xlu1 %v1326_v14 }
 0x36f   : > { %v1307_v15 = vpop.xlane.xlu1 %1306 }
 0x370   : > { %v1315_v16 = vsub.f32 %v1299_v55, %v1307_v15 }
 0x372   : > { %v1320_v17 = vmul.f32 1.442695, %v1315_v16 }
 0x373   : > { %v1310_v18 = vpop.xlane.xlu0 %1309  ;;  %v1101_v19 = vpop.permute.xlu1 %1100 }
 0x374   : > { %2492 = vpow2.f32 %v1320_v17  ;;  %v1316_v20 = vsub.f32 %v1300_v60, %v1310_v18  ;;  %v1110_v21 = vpack.c.bf16 %v1101_v19, %v1101_v19  ;;  %v2483_v60 = vld [vmem:[%s3202_s7] sm:$0xff]   ;;  %s3462_s7 = scalar_lea.vmem [#allocation5], %s3148_s0 }
 0x375   : > { %v2183_v18 = vld [vmem:[%s3462_s7] ss:$0 sm:$0xff] }
 0x376   : > { %v1322_v22 = vmul.f32 1.442695, %v1316_v20  ;;  %v1401_v23 = vsel %vm1353_vm4, %v1110_v21, 0 }
 0x377   : > { %2300 = vmatpush3.bf16.msra.mxu0 %v1401_v23  ;;  %v1313_v24 = vpop.xlane.xlu0 %1312 }
 0x378   : > { %2494 = vpow2.f32 %v1322_v22  ;;  %v1317_v25 = vsub.f32 %v1301_v3, %v1313_v24  ;;  %2311 = vmatprep.subr.bf16.mxu0 %v2861_v2 }
 0x37a   : > { %v1324_v26 = vmul.f32 1.442695, %v1317_v25 }
 0x37c   : > { %2496 = vpow2.f32 %v1324_v26 }
 0x381   : > { %v2493_v27 = vpop.eup %2492 }
 0x382   : > { %v1329_v28 = vsel %vm1113_vm3, %v2493_v27, 0.0 }
 0x383   : > { %1330 = vadd.xlane.f32.xlu0 %v1329_v28 }
 0x385   : > { %v2495_v29 = vpop.eup %2494 }
 0x386   : > { %v1332_v30 = vsel %vm1113_vm3, %v2495_v29, 0.0 }
 0x387   : > { %1333 = vadd.xlane.f32.xlu1 %v1332_v30 }
 0x389   : > { %v2497_v31 = vpop.eup %2496 }
 0x38a   : > { %v1335_v32 = vsel %vm1113_vm3, %v2497_v31, 0.0 }
 0x38b   : > { %1336 = vadd.xlane.f32.xlu0 %v1335_v32  ;;  %v2485_v32 = vld [vmem:[%s3207_s2] sm:$0xff]  }
 0x398   : > { %1106 = vrot.lane.b32.xlu1 %v3267_v37, %s2864_s28 }
 0x3a1   : > { %1103 = vrot.lane.b32.xlu0 %v3267_v37, %s2865_s9 }
 0x3a4   : > { %v1328_v33 = vpop.xlane.xlu1 %1327 }
 0x3a5   : > { %2498 = vrcp.f32 %v1328_v33  ;;  %v2487_v33 = vld [vmem:[%s3212_s5 + $0x10] sm:$0xff]  }
 0x3b2   : > { %v2499_v34 = vpop.eup %2498 }
 0x3b3   : > { %v1342_v35 = vmul.f32 %v2499_v34, %v2491_v13 }
 0x3b5   : > { %v1346_v36 = vpack.c.bf16 %v1342_v35, %v1342_v35 }
 0x3b7   : > { %2296 = vmatmul.mubr.msk.bf16.vlgmr.msra.gmra.mxu1 %vm1113_vm3, %v1346_v36 }
 0x3b8   : > { %2307 = vmatprep.mubr.msk.bf16.mxu1 %vm2862_vm1, %v2861_v2 }
 0x40c   : > { %v1331_v38 = vpop.xlane.xlu0 %1330 }
 0x40d   : > { %2500 = vrcp.f32 %v1331_v38 }
 0x410   : > { %v1334_v39 = vpop.xlane.xlu1 %1333 }
 0x411   : > { %2502 = vrcp.f32 %v1334_v39 }
 0x414   : > { %v1337_v40 = vpop.xlane.xlu0 %1336  ;;  %v1107_v41 = vpop.permute.xlu1 %1106 }
 0x415   : > { %2504 = vrcp.f32 %v1337_v40  ;;  %v1112_v44 = vpack.c.bf16 %v1107_v41, %v1107_v41  ;;  %v2188_v41 = vld [vmem:[%s3464_s10] ss:$0 sm:$0xff] }
 0x417   : > { %v1493_v49 = vsel %vm1353_vm4, %v1112_v44, 0  ;;  %v2488_v44 = vld [vmem:[%s3212_s5 + $0x8] sm:$0xff]  }
 0x418   : > { %v1104_v42 = vpop.permute.xlu0 %1103 }
 0x419   : > { %v1111_v43 = vpack.c.bf16 %v1104_v42, %v1104_v42 }
 0x41a   : > { %v2501_v37 = vpop.eup %2500 }
 0x41b   : > { %v1447_v45 = vsel %vm1353_vm4, %v1111_v43, 0  ;;  %v1343_v46 = vmul.f32 %v2501_v37, %v2493_v27 }
 0x41c   : > { %2306 = vmatpush3.bf16.msra.mxu1 %v1447_v45  ;;  %v2489_v45 = vld [vmem:[%s3212_s5] sm:$0xff]  }
 0x41d   : > { %v1347_v47 = vpack.c.bf16 %v1343_v46, %v1343_v46  ;;  %2317 = vmatprep.subr.bf16.mxu1 %v2861_v2  ;;  %v2189_v46 = vld [vmem:[%s3465_s1] ss:$0 sm:$0xff] }
 0x41e   : > { %v2503_v48 = vpop.eup %2502 }
 0x41f   : > { %2302 = vmatmul.mubr.msk.bf16.vlgmr.msra.gmra.mxu0 %vm1113_vm3, %v1347_v47  ;;  %v1344_v50 = vmul.f32 %v2503_v48, %v2495_v29 }
 0x420   : > { %2312 = vmatpush3.bf16.msra.mxu0 %v1493_v49  ;;  %2313 = vmatprep.mubr.msk.bf16.mxu0 %vm2862_vm1, %v2861_v2 }
 0x421   : > { %v1348_v51 = vpack.c.bf16 %v1344_v50, %v1344_v50  ;;  %2325 = vmatprep.subr.bf16.mxu0 %v2861_v2 }
 0x422   : > { %v2505_v52 = vpop.eup %2504 }
 0x423   : > { %2308 = vmatmul.mubr.msk.bf16.vlgmr.msra.gmra.mxu1 %vm1113_vm3, %v1348_v51  ;;  %v1345_v53 = vmul.f32 %v2505_v52, %v2497_v31  ;;  %v2484_v31 = vld [vmem:[%s3207_s2 + $0x8] sm:$0xff]   ;;  %s3463_s2 = scalar_lea.vmem [#allocation7], %s3148_s0 }
 0x424   : > { %2321 = vmatprep.mubr.msk.bf16.mxu1 %vm2862_vm1, %v2861_v2  ;;  %2318 = vmatpush3.bf16.msra.mxu1 %v2482_v59  ;;  %v2187_v39 = vld [vmem:[%s3463_s2] ss:$0 sm:$0xff] }
 0x425   : > { %v1349_v54 = vpack.c.bf16 %v1345_v53, %v1345_v53  ;;  %2319 = vmatprep.subr.bf16.mxu1 %v2861_v2 }
 0x427   : > { %2314 = vmatmul.mubr.msk.bf16.vlgmr.msra.gmra.mxu0 %vm1113_vm3, %v1349_v54  ;;  %v2193_v54 = vld [vmem:[%s3466_s4] ss:$0 sm:$0xff] }
 0x428   : > { %2329 = vmatprep.mubr.msk.bf16.mxu0 %vm2862_vm1, %v2861_v2  ;;  %2320 = vmatpush3.bf16.msra.mxu1 %v2483_v60 }
 0x429   : > { %2333 = vmatprep.subr.bf16.mxu1 %v2861_v2  ;;  %2326 = vmatpush3.bf16.msra.mxu0 %v2484_v31 }
 0x42a   : > { %2327 = vmatprep.subr.bf16.mxu0 %v2861_v2 }
 0x42d   : > { %2328 = vmatpush3.bf16.msra.mxu0 %v2485_v32 }
 0x477   : > { %v1391_v55 = vpop.f32.mrf.mxu1 }
 0x479   : > { %v2297_v56 = vpop.f32.mrf.mxu1 }
 0x47b   : > { %v1394_v57 = vpop.f32.mrf.mxu1 }
 0x47d   : > { %v2298_v58 = vpop.f32.mrf.mxu1 }
 0x4df   : > { %v1437_v61 = vpop.f32.mrf.mxu0 }
 0x4e0   : > { %1536 = vrot.lane.b32.xlu1 %v1437_v61, %s2866_s16 }
 0x4e1   : > { %v2303_v62 = vpop.f32.mrf.mxu0 }
 0x4e3   : > { %v1440_v63 = vpop.f32.mrf.mxu0  ;;  %v1483_v0 = vpop.f32.mrf.mxu1 }
 0x4e4   : > { %1540 = vrot.lane.b32.xlu0 %v1483_v0, %s2867_s13 }
 0x4e5   : > { %v2304_v1 = vpop.f32.mrf.mxu0  ;;  %v2309_v3 = vpop.f32.mrf.mxu1 }
 0x4e7   : > { %v1486_v4 = vpop.f32.mrf.mxu1  ;;  %v1529_v5 = vpop.f32.mrf.mxu0 }
 0x4e8   : > { %1544 = vrot.lane.b32.xlu1 %v1529_v5, %s2868_s15 }
 0x4e9   : > { %v2310_v7 = vpop.f32.mrf.mxu1  ;;  %v2315_v8 = vpop.f32.mrf.mxu0 }
 0x4eb   : > { %v1532_v9 = vpop.f32.mrf.mxu0 }
 0x4ed   : > { %v2316_v10 = vpop.f32.mrf.mxu0 }
 0x4ee   : > { %v2200_v10 = vld [vmem:[%s3468_s21] ss:$0 sm:$0xff] }
 0x552   : > { %v1537_v11 = vpop.permute.xlu1 %1536 }
 0x553   : > { %v1547_v13 = vsel %vm1113_vm3, %v1391_v55, %v1537_v11 }
 0x556   : > { %v1541_v12 = vpop.permute.xlu0 %1540 }
 0x557   : > { %v1549_v14 = vsel %vm1548_vm5, %v1547_v13, %v1541_v12 }
 0x55a   : > { %v1545_v15 = vpop.permute.xlu1 %1544 }
 0x55b   : > { %v1551_v16 = vsel %vm1550_vm6, %v1549_v14, %v1545_v15 }
 0x55c   : > { %v1552_v17 = vpack.c.bf16 %v1551_v16, %v1551_v16 }
 0x55e   : > { %2322 = vmatmul.mubr.msk.bf16.vlgmr.msra.gmra.mxu1 %vm911_vm2, %v1552_v17 }
 0x55f   : > { %2341 = vmatprep.mubr.msk.bf16.mxu1 %vm2862_vm1, %v2861_v2 }
 0x61e   : > { %v1608_v19 = vpop.f32.mrf.mxu1 }
 0x61f   : > { %v1609_v20 = vadd.f32 %v2183_v18, %v1608_v19 }
 0x620   : > { %v2323_v21 = vpop.f32.mrf.mxu1 }
 0x621   : > { %v1614_v22 = vadd.f32 %v1609_v20, %v3232_v6  ;;  %v2486_v6 = vld [vmem:[%s3212_s5 + $0x18] sm:$0xff]   ;;  %s3467_s5 = scalar_lea.vmem [#allocation13], %s3148_s0 }
 0x622   : > { %v1611_v23 = vpop.f32.mrf.mxu1  ;;  %2334 = vmatpush3.bf16.msra.mxu1 %v2486_v6  ;;  %v2199_v8 = vld [vmem:[%s3467_s5] ss:$0 sm:$0xff] }
 0x623   : > { %v1617_v24 = vsel %vm911_vm2, %v1614_v22, 0.0  ;;  %2335 = vmatprep.subr.bf16.mxu1 %v2861_v2 }
 0x624   : > { %1618 = vadd.xlane.f32.xlu0 %v1617_v24  ;;  %v2324_v25 = vpop.f32.mrf.mxu1 }
 0x626   : > { %2336 = vmatpush3.bf16.msra.mxu1 %v2487_v33 }
 0x627   : > { %2337 = vmatprep.subr.bf16.mxu1 %v2861_v2 }
 0x62a   : > { %2338 = vmatpush3.bf16.msra.mxu1 %v2488_v44 }
 0x62b   : > { %2339 = vmatprep.subr.bf16.mxu1 %v2861_v2 }
 0x62e   : > { %2340 = vmatpush3.bf16.msra.mxu1 %v2489_v45 }
 0x6ad   : > { %v1619_v26 = vpop.xlane.xlu0 %1618 }
 0x6ae   : > { %v1621_v27 = vmul.f32 0.03125, %v1619_v26 }
 0x6b0   : > { %v1622_v28 = vsub.f32 %v1614_v22, %v1621_v27 }
 0x6b2   : > { %v1623_v29 = vmul.f32 %v1622_v28, %v1622_v28 }
 0x6b4   : > { %v1624_v30 = vsel %vm911_vm2, %v1623_v29, 0.0 }
 0x6b5   : > { %1625 = vadd.xlane.f32.xlu1 %v1624_v30 }
 0x73e   : > { %v1626_v34 = vpop.xlane.xlu1 %1625 }
 0x73f   : > { %v1627_v35 = vmul.f32 0.03125, %v1626_v34 }
 0x741   : > { %v1628_v36 = vadd.f32 1e-05, %v1627_v35 }
 0x743   : > { %2506 = vrsqrt.f32 %v1628_v36 }
 0x750   : > { %v2507_v38 = vpop.eup %2506 }
 0x751   : > { %v1630_v40 = vmul.f32 %v2507_v38, %v1622_v28 }
 0x753   : > { %v1637_v42 = vmul.f32 %v2187_v39, %v1630_v40 }
 0x755   : > { %v1644_v43 = vadd.f32 %v2188_v41, %v1637_v42 }
 0x757   : > { %v1650_v37 = vpack.c.bf16 %v1644_v43, %v1644_v43 }
 0x759   : > { %2330 = vmatmul.mubr.msk.bf16.vlgmr.msra.gmra.mxu0 %vm911_vm2, %v1650_v37 }
 0x819   : > { %v1706_v47 = vpop.f32.mrf.mxu0 }
 0x81a   : > { %v1707_v48 = vadd.f32 %v2189_v46, %v1706_v47 }
 0x81b   : > { %v2331_v49 = vpop.f32.mrf.mxu0 }
 0x81c   : > { %v1712_v50 = vmax.f32 %v1707_v48, 0.0 }
 0x81d   : > { %v1709_v51 = vpop.f32.mrf.mxu0 }
 0x81e   : > { %v1722_v52 = vpack.c.bf16 %v1712_v50, %v1712_v50 }
 0x81f   : > { %v2332_v53 = vpop.f32.mrf.mxu0 }
 0x820   : > { %2342 = vmatmul.mubr.msk.bf16.vlgmr.msra.gmra.mxu1 %vm1753_vm7, %v1722_v52 }
 0x8e0   : > { %v1791_v55 = vpop.f32.mrf.mxu1 }
 0x8e1   : > { %v1792_v56 = vadd.f32 %v2193_v54, %v1791_v55 }
 0x8e2   : > { %v2343_v57 = vpop.f32.mrf.mxu1 }
 0x8e3   : > { %v1797_v58 = vadd.f32 %v1792_v56, %v1644_v43 }
 0x8e4   : > { %v1794_v2 = vpop.f32.mrf.mxu1 }
 0x8e5   : > { %v1800_v59 = vsel %vm911_vm2, %v1797_v58, 0.0 }
 0x8e6   : > { %1801 = vadd.xlane.f32.xlu0 %v1800_v59  ;;  %v2344_v60 = vpop.f32.mrf.mxu1 }
 0x96f   : > { %v1802_v61 = vpop.xlane.xlu0 %1801 }
 0x970   : > { %v1803_v62 = vmul.f32 0.03125, %v1802_v61 }
 0x972   : > { %v1804_v63 = vsub.f32 %v1797_v58, %v1803_v62 }
 0x974   : > { %v1805_v0 = vmul.f32 %v1804_v63, %v1804_v63 }
 0x976   : > { %v1806_v1 = vsel %vm911_vm2, %v1805_v0, 0.0 }
 0x977   : > { %1807 = vadd.xlane.f32.xlu0 %v1806_v1 }
 0xa00   : > { %v1808_v3 = vpop.xlane.xlu0 %1807 }
 0xa01   : > { %v1809_v4 = vmul.f32 0.03125, %v1808_v3 }
 0xa03   : > { %v1810_v5 = vadd.f32 1e-05, %v1809_v4 }
 0xa05   : > { %2508 = vrsqrt.f32 %v1810_v5 }
 0xa12   : > { %v2509_v7 = vpop.eup %2508 }
 0xa13   : > { %v1812_v9 = vmul.f32 %v2509_v7, %v1804_v63 }
 0xa15   : > { %v1819_v11 = vmul.f32 %v2199_v8, %v1812_v9  ;;  %1831 = sbr.rel (%p2201_p13) target bundleno = 2895 (0xb4f), region = 124 }
 0xa17   : > { %v1826_v12 = vadd.f32 %v2200_v10, %v1819_v11 }
 0xa19   : > { %1827 = vst.msk [vmem:[#allocation2] sm:$0xff] %vm911_vm2, %v1826_v12 }
 0xa1a   : > { %v1834_v13 = vsel %vm911_vm2, %v1826_v12, 0.0  ;;  %v2202_v23 = vld [vmem:[%s3470_s14] ss:$0 sm:$0xff]  ;;  %v2203_v25 = vld [vmem:[#allocation16] ss:$0 sm:$0xff] }
 0xa1b   : > { %1835 = vadd.xlane.f32.xlu0 %v1834_v13 }
 0xaa4   : > { %v1836_v14 = vpop.xlane.xlu0 %1835 }
 0xaa5   : > { %v1837_v15 = vmul.f32 0.03125, %v1836_v14 }
 0xaa7   : > { %v1838_v16 = vsub.f32 %v1826_v12, %v1837_v15 }
 0xaa9   : > { %v1839_v17 = vmul.f32 %v1838_v16, %v1838_v16 }
 0xaab   : > { %v1840_v18 = vsel %vm911_vm2, %v1839_v17, 0.0 }
 0xaac   : > { %1841 = vadd.xlane.f32.xlu0 %v1840_v18 }
 0xb35   : > { %v1842_v19 = vpop.xlane.xlu0 %1841 }
 0xb36   : > { %v1843_v20 = vmul.f32 0.03125, %v1842_v19 }
 0xb38   : > { %v1844_v21 = vadd.f32 1e-05, %v1843_v20 }
 0xb3a   : > { %2510 = vrsqrt.f32 %v1844_v21 }
 0xb47   : > { %v2511_v22 = vpop.eup %2510 }
 0xb48   : > { %v1846_v24 = vmul.f32 %v2511_v22, %v1838_v16 }
 0xb4a   : > { %v1853_v26 = vmul.f32 %v2202_v23, %v1846_v24 }
 0xb4c   : > { %v1860_v27 = vadd.f32 %v2203_v25, %v1853_v26 }
 0xb4e   : > { %1861 = vst.msk [vmem:[%s3217_s18] sm:$0xff] %vm911_vm2, %v1860_v27 }
 0xb4f PF: > { %s40_s25 = sadd.s32 1, %s2848_s25   ;;  %s3471_s20 = sld [smem:[#allocation23_spill]] }
 0xb50   : > { %p37_p0 = scmp.ge.s32.totalorder %s40_s25, 6   ;;  %s3472_s24 = sld [smem:[#allocation29_spill]] }
 0xb51   : > { %s3473_s22 = sld [smem:[#allocation26_spill]]  ;;  %s3476_s18 = smov %s2824_s19 }
 0xb52   : > { %s3474_s29 = sld [smem:[#allocation27_spill]]  ;;  %s3479_s21 = smov %s2840_s23 }
 0xb53   : > { %s3475_s26 = sld [smem:[#allocation28_spill]] }
 0xb55   : > { %s3477_s19 = smov %s3471_s20  ;;  %39 = sbr.rel (!%p37_p0) target bundleno = 28 (0x1c), region = 232 }
 0xb56   : > { %s3478_s20 = smov %s3472_s24 }
 0xb58   : > { %s3480_s23 = smov %s3474_s29 }
 0xb59   : > { %s3481_s24 = smov %s3475_s26 }
 0xb5a   :  { %1881 = vsyncpa [#allocation4], 1 }
 0xb5b   :  { %1883 = vsyncpa [#allocation4 + $0x1], 1 }
 0xb5c   :  { %1884 = vsyncpa [#allocation6], 1 }
 0xb5d   :  { %1886 = vsyncpa [#allocation6 + $0x1], 1 }
 0xb5e   :  { %1887 = vsyncpa [#allocation9], 1 }
 0xb5f   :  { %1889 = vsyncpa [#allocation9 + $0x1], 1 }
 0xb60   :  { %1890 = vsyncpa [#allocation12], 1 }
 0xb61   :  { %1892 = vsyncpa [#allocation12 + $0x1], 1 }
 0xb62   :  { %1893 = vsyncpa [#allocation15], 1 }
 0xb63   :  { %1895 = vsyncpa [#allocation15 + $0x1], 1 }

// kernel: transformer_forward.3
= control target key start
LH: loop header
LB: loop body
LE: loop exit
PB: predicated region body
PF: predicated region fallthrough
CT: control target
= control target key end

     0   :  { %s3800_s26 = smov 0   ;;  %s3802_s27 = smov 0   ;;  %s4263_s0 = inlined_call_operand.vmem [shape: f32[2,8,32], index: 0, kind: input, shape index: {}]   ;;  %s4264_s1 = inlined_call_operand.vmem [shape: f32[2,8,32], index: 1, kind: input, shape index: {}]   ;;  %s4265_s2 = inlined_call_operand.vmem [shape: bf16[2,3,32,32], index: 2, kind: input, shape index: {}]   ;;  %s4266_s3 = inlined_call_operand.vmem [shape: f32[2,3,1,32], index: 3, kind: input, shape index: {}]   ;;  %s4267_s4 = inlined_call_operand.vmem [shape: bf16[2,32,32], index: 4, kind: input, shape index: {}]   ;;  %s4268_s5 = inlined_call_operand.vmem [shape: f32[2,1,32], index: 5, kind: input, shape index: {}]   ;;  %s4269_s6 = inlined_call_operand.vmem [shape: f32[2,1,32], index: 6, kind: input, shape index: {}]   ;;  %s4270_s7 = inlined_call_operand.vmem [shape: f32[2,1,32], index: 7, kind: input, shape index: {}]   ;;  %s4271_s8 = inlined_call_operand.vmem [shape: bf16[2,3,32,32], index: 8, kind: input, shape index: {}]   ;;  %s4272_s9 = inlined_call_operand.vmem [shape: f32[2,3,1,32], index: 9, kind: input, shape index: {}]   ;;  %s4273_s10 = inlined_call_operand.vmem [shape: bf16[2,32,32], index: 10, kind: input, shape index: {}]   ;;  %s4274_s11 = inlined_call_operand.vmem [shape: f32[2,1,32], index: 11, kind: input, shape index: {}]   ;;  %s4275_s12 = inlined_call_operand.vmem [shape: f32[2,1,32], index: 12, kind: input, shape index: {}]   ;;  %s4276_s13 = inlined_call_operand.vmem [shape: f32[2,1,32], index: 13, kind: input, shape index: {}]   ;;  %s4277_s14 = inlined_call_operand.vmem [shape: bf16[2,32,64], index: 14, kind: input, shape index: {}]   ;;  %s4278_s15 = inlined_call_operand.vmem [shape: f32[2,1,64], index: 15, kind: input, shape index: {}]   ;;  %s4279_s16 = inlined_call_operand.vmem [shape: bf16[2,64,32], index: 16, kind: input, shape index: {}]   ;;  %s4280_s17 = inlined_call_operand.vmem [shape: f32[2,1,32], index: 17, kind: input, shape index: {}]   ;;  %s4281_s18 = inlined_call_operand.vmem [shape: f32[2,1,32], index: 18, kind: input, shape index: {}]   ;;  %s4282_s19 = inlined_call_operand.vmem [shape: f32[2,1,32], index: 19, kind: input, shape index: {}]   ;;  %s4283_s20 = inlined_call_operand.vmem [shape: f32[1,32], index: 20, kind: input, shape index: {}]   ;;  %s4284_s21 = inlined_call_operand.vmem [shape: f32[1,32], index: 21, kind: input, shape index: {}]   ;;  %s4285_s22 = inlined_call_operand.vmem [shape: bf16[32,128], index: 22, kind: input, shape index: {}]   ;;  %s4286_s23 = inlined_call_operand.vmem [shape: f32[1,128], index: 23, kind: input, shape index: {}]   ;;  %s4287_s24 = inlined_call_operand.vmem [shape: f32[2,8,128], index: 24, kind: output, shape index: {}]  }
   0x1   :  { %4295 = sst [smem:[#allocation11_spill]] %s4263_s0  ;;  %s3804_s28 = smov 0  }
   0x2   :  { %4296 = sst [smem:[#allocation12_spill]] %s4264_s1 }
   0x3   :  { %4297 = sst [smem:[#allocation13_spill]] %s4265_s2 }
   0x4   :  { %4298 = sst [smem:[#allocation14_spill]] %s4266_s3 }
   0x5   :  { %4299 = sst [smem:[#allocation15_spill]] %s4267_s4 }
   0x6   :  { %4300 = sst [smem:[#allocation16_spill]] %s4268_s5  ;;  %s3798_s5 = smov 0  }
   0x7   :  { %4301 = sst [smem:[#allocation17_spill]] %s4269_s6  ;;  %s3806_s6 = smov 0  }
   0x8   :  { %4302 = sst [smem:[#allocation18_spill]] %s4270_s7 }
   0x9   :  { %4303 = sst [smem:[#allocation19_spill]] %s4271_s8 }
   0xa   :  { %4304 = sst [smem:[#allocation20_spill]] %s4272_s9 }
   0xb   :  { %4305 = sst [smem:[#allocation21_spill]] %s4273_s10 }
   0xc   :  { %4306 = sst [smem:[#allocation22_spill]] %s4275_s12 }
   0xd   :  { %4307 = sst [smem:[#allocation23_spill]] %s4276_s13 }
   0xe   :  { %4308 = sst [smem:[#allocation24_spill]] %s4277_s14 }
   0xf   :  { %4309 = sst [smem:[#allocation25_spill]] %s4278_s15 }
  0x10   :  { %4310 = sst [smem:[#allocation26_spill]] %s4279_s16 }
  0x11   :  { %4311 = sst [smem:[#allocation27_spill]] %s4280_s17 }
  0x12   :  { %4312 = sst [smem:[#allocation28_spill]] %s4281_s18 }
  0x13   :  { %4313 = sst [smem:[#allocation29_spill]] %s4282_s19 }
  0x14   :  { %4314 = sst [smem:[#allocation30_spill]] %s4283_s20 }
  0x15   :  { %4315 = sst [smem:[#allocation31_spill]] %s4284_s21 }
  0x16   :  { %4316 = sst [smem:[#allocation32_spill]] %s4285_s22 }
  0x17   :  { %4317 = sst [smem:[#allocation33_spill]] %s4286_s23 }
  0x18   :  { %4318 = sst [smem:[#allocation34_spill]] %s4287_s24 }
  0x19 LB: > { %4319 = sst [smem:[#allocation3_spill]] %s3645_s5  ;;  %s43_s2 = sadd.s32 1, %s3653_s27  ;;  %s3661_s6 = sphi %s3806_s6, %s34_s6   ;;  %s3657_s28 = sphi %s3804_s28, %s4378_s28   ;;  %s3653_s27 = sphi %s3802_s27, %s4377_s27   ;;  %s3649_s26 = sphi %s3800_s26, %s4376_s26   ;;  %s3645_s5 = sphi %s3798_s5, %s4375_s5  }
  0x1a   : > { %4320 = sst [smem:[#allocation4_spill]] %s3653_s27  ;;  %s46_s29 = sadd.s32 1, %s3657_s28 }
  0x1b   : > { %4321 = sst [smem:[#allocation5_spill]] %s3657_s28  ;;  %p44_p0 = scmp.ge.s32.totalorder %s43_s2, 2 }
  0x1c   : > { %4322 = sst [smem:[#allocation6_spill]] %s3661_s6  ;;  %p3160_p1 = scmp.ge.s32.totalorder %s3661_s6, 1 }
  0x1d   : > { %p840_p2 = scmp.lt.s32.totalorder %s3661_s6, 5  ;;  %s4380_s2 = smov (%p44_p0, %s43_s2), 0 }
  0x1e   : > { %4323 = sst [smem:[#allocation7_spill]] %s4380_s2  ;;  %s4382_s29 = smov (!%p44_p0, %s46_s29), %s3657_s28 }
  0x1f   : > { %p841_p3 = pnand %p3160_p1, %p840_p2  ;;  %p48_p4 = scmp.ge.s32.totalorder %s4382_s29, 2 }
  0x21   : > { %s4384_s29 = smov (%p48_p4, %s4382_s29), 0  ;;  %844 = sbr.rel (%p841_p3) target bundleno = 4600 (0x11f8), region = 116 }
  0x22   : > { %4324 = sst [smem:[#allocation8_spill]] %s4384_s29 }
  0x26   : > { %p976_p5 = scmp.lt.s32.totalorder %s3649_s26, 1  ;;  %p984_p6 = scmp.lt.s32.totalorder %s3645_s5, 1 }
  0x27   : > { %s4325_s25 = sld [smem:[#allocation11_spill]] }
  0x28   : > { %s4386_s26 = smov (!%p976_p5, %s3649_s26), 1  ;;  %s4327_s21 = sld [smem:[#allocation15_spill]] }
  0x29   : > { %s3832_s0 = scalar_select %p984_p6, %s3645_s5, 1 }
  0x2a   : > { %s3834_s7 = sshll.u32 %s4386_s26, 3  ;;  %s4329_s3 = sld [smem:[#allocation13_spill]] }
  0x2b   : > { %s3507_s28 = smul.u32 48, %s3832_s0  ;;  %s3248_s27 = sshll.u32 %s3832_s0, 4 }
  0x2c   : > { %s3508_s6 = smul.u32 3, %s3832_s0  ;;  %s4332_s19 = sld [smem:[#allocation14_spill]] }
  0x2d   : > { %s979_s8 = scalar_lea.vmem %s4325_s25, %s3834_s7  ;;  %s4335_s5 = sld [smem:[#allocation19_spill]] }
  0x2e   : > { %s3850_s20 = scalar_lea.vmem %s4327_s21, %s3248_s27  ;;  %s4336_s9 = sld [smem:[#allocation20_spill]] }
  0x2f   : > { %4328 = sst [smem:[#allocation9_spill]] %s3850_s20  ;;  %s3251_s20 = sshll.u32 %s3832_s0, 5 }
  0x30   : > { %s3855_s25 = scalar_lea.vmem %s4329_s3, %s3507_s28  ;;  %s4337_s10 = sld [smem:[#allocation21_spill]] }
  0x31   : > { %4330 = sst [smem:[#allocation10_spill]] %s3855_s25 }
  0x32   : > { %s3864_s18 = scalar_lea.vmem %s4332_s19, %s3508_s6  ;;  %s4340_s14 = sld [smem:[#allocation24_spill]] }
  0x33   : > { %s3877_s4 = scalar_lea.vmem %s4335_s5, %s3507_s28  ;;  %s4342_s22 = sld [smem:[#allocation26_spill]] }
  0x34   : > { %s3882_s24 = scalar_lea.vmem %s4336_s9, %s3508_s6  ;;  %s4343_s16 = sld [smem:[#allocation27_spill]] }
  0x35   : > { %s4346_s25 = sld [smem:[#allocation34_spill]] }
  0x36   : > { %s3887_s23 = scalar_lea.vmem %s4337_s10, %s3248_s27  ;;  %s4344_s10 = sld [smem:[#allocation28_spill]] }
  0x37   : > { %s4347_s12 = sld [smem:[#allocation3_spill]] }
  0x38   : > { %s3904_s1 = scalar_lea.vmem %s4340_s14, %s3248_s27  ;;  %s4345_s14 = sld [smem:[#allocation29_spill]] }
  0x39   : > { %s3914_s9 = scalar_lea.vmem %s4342_s22, %s3251_s20 }
  0x3a   : > { %s1045_s17 = scalar_lea.vmem %s4343_s16, %s3832_s0 }
  0x3b   : > { %s1055_s15 = scalar_lea.vmem %s4346_s25, %s3834_s7 }
  0x3c   : > { %s1048_s29 = scalar_lea.vmem %s4344_s10, %s3832_s0 }
  0x3d   : > { %p3174_p7 = scmp.ne.s32.totalorder %s4347_s12, 0 }
  0x3e   : > { %s1051_s13 = scalar_lea.vmem %s4345_s14, %s3832_s0 }
  0x3f   : > { %1060 = sbr.rel (%p3174_p7) target bundleno = 70 (0x46), region = 120 }
  0x44   : > { %v1061_v0 = vld [vmem:[%s979_s8] sm:$0xff]  ;;  %vm1062_vm0 = vcmask 261120  }
  0x45   : > { %1063 = vst.msk [vmem:[#allocation2] sm:$0xff] %vm1062_vm0, %v1061_v0 }
  0x46 PF: > { %s4348_s20 = sld [smem:[#allocation10_spill]]  ;;  %v3663_v2 = vmov 0.0   ;;  %vm3664_vm1 = vmmov 0   ;;  %vm1105_vm2 = vcmask 261120   ;;  %v3175_v10 = vld [vmem:[%s3864_s18] ss:$0 sm:$0xff] }
  0x47   : > { %3319 = vmatprep.subr.bf16.mxu0 %v3663_v2  ;;  %3327 = vmatprep.subr.bf16.mxu1 %v3663_v2  ;;  %v3179_v11 = vld [vmem:[%s3864_s18 + $0x1] ss:$0 sm:$0xff]  ;;  %s3665_s10 = smov 120   ;;  %vm1307_vm3 = vcmask 64512   ;;  %s3666_s12 = smov 104   ;;  %vm1547_vm4 = vcmask 1043456  }
  0x48   : > { %3323 = vmatprep.mubr.msk.bf16.mxu0 %vm3664_vm1, %v3663_v2  ;;  %3331 = vmatprep.mubr.msk.bf16.mxu1 %vm3664_vm1, %v3663_v2  ;;  %s3667_s14 = smov 112   ;;  %v3183_v32 = vld [vmem:[%s3864_s18 + $0x2] ss:$0 sm:$0xff]  ;;  %s4349_s18 = sld [smem:[#allocation9_spill]]  ;;  %vm1742_vm5 = vcmask 130048   ;;  %vm1744_vm6 = vcmask 195584  }
  0x49   : > { %s3668_s8 = smov 8   ;;  %s3669_s25 = smov 16   ;;  %vm2718_vm7 = vcmask 523264  }
  0x4a   : > { %s3670_s22 = smov 24   ;;  %s4350_s21 = sld [smem:[#allocation16_spill]] }
  0x4b   : > { %s4352_s28 = sld [smem:[#allocation12_spill]] }
  0x4c   : > { %v3559_v1 = vld [vmem:[%s4348_s20 + $0x8] sm:$0xff]   ;;  %v3560_v3 = vld [vmem:[%s4348_s20 + $0x18] sm:$0xff]   ;;  %v3561_v4 = vld [vmem:[%s4348_s20] sm:$0xff]   ;;  %s4354_s2 = sld [smem:[#allocation17_spill]] }
  0x4d   : > { %3320 = vmatpush3.bf16.msra.mxu0 %v3559_v1  ;;  %3328 = vmatpush3.bf16.msra.mxu1 %v3560_v3  ;;  %v3562_v5 = vld [vmem:[%s4348_s20 + $0x10] sm:$0xff]   ;;  %v3945_v6 = vld [vmem:[#allocation2] sm:$0xff]  ;;  %v3563_v8 = vld [vmem:[%s4348_s20 + $0x28] sm:$0xff]   ;;  %s4356_s5 = sld [smem:[#allocation18_spill]] }
  0x4e   : > { %3321 = vmatprep.subr.bf16.mxu0 %v3663_v2  ;;  %3329 = vmatprep.subr.bf16.mxu1 %v3663_v2  ;;  %v1086_v7 = vpack.c.bf16 %v3945_v6, %v3945_v6  ;;  %v3564_v9 = vld [vmem:[%s4348_s20 + $0x20] sm:$0xff]  }
  0x50   : > { %s4351_s26 = scalar_lea.vmem %s4350_s21, %s3832_s0 }
  0x51   : > { %3322 = vmatpush3.bf16.msra.mxu0 %v3561_v4  ;;  %3330 = vmatpush3.bf16.msra.mxu1 %v3562_v5  ;;  %s4353_s27 = scalar_lea.vmem %s4352_s28, %s3834_s7  ;;  %s4363_s28 = sld [smem:[#allocation25_spill]] }
  0x52   : > { %3335 = vmatprep.subr.bf16.mxu0 %v3663_v2  ;;  %3343 = vmatprep.subr.bf16.mxu1 %v3663_v2  ;;  %s4355_s20 = scalar_lea.vmem %s4354_s2, %s3832_s0 }
  0x53   : > { %s4357_s21 = scalar_lea.vmem %s4356_s5, %s3832_s0 }
  0x54   : > { %3324 = vmatmul.mubr.msk.bf16.vlgmr.msra.gmra.mxu0 %vm1105_vm2, %v1086_v7  ;;  %3332 = vmatmul.mubr.msk.bf16.vlgmr.msra.gmra.mxu1 %vm1105_vm2, %v1086_v7 }
  0x55   : > { %3339 = vmatprep.mubr.msk.bf16.mxu0 %vm3664_vm1, %v3663_v2  ;;  %3345 = vmatprep.mubr.msk.bf16.mxu1 %vm3664_vm1, %v3663_v2 }
  0x56   : > { %3336 = vmatpush3.bf16.msra.mxu0 %v3563_v8 }
  0x57   : > { %3337 = vmatprep.subr.bf16.mxu0 %v3663_v2 }
  0x5a   : > { %3338 = vmatpush3.bf16.msra.mxu0 %v3564_v9 }
  0x5b   : > { %3349 = vmatprep.subr.bf16.mxu0 %v3663_v2 }
  0x5d   : > { %3340 = vmatmul.mubr.msk.bf16.vlgmr.msra.gmra.mxu0 %vm1105_vm2, %v1086_v7 }
  0x5e   : > { %3351 = vmatprep.mubr.msk.bf16.mxu0 %vm3664_vm1, %v3663_v2 }
 0x114   : > { %v1143_v12 = vpop.f32.mrf.mxu0  ;;  %v1201_v14 = vpop.f32.mrf.mxu1 }
 0x115   : > { %v1144_v13 = vadd.f32 %v3175_v10, %v1143_v12  ;;  %v1202_v15 = vadd.f32 %v3179_v11, %v1201_v14 }
 0x116   : > { %v3325_v16 = vpop.f32.mrf.mxu0  ;;  %v3333_v17 = vpop.f32.mrf.mxu1 }
 0x117   : > { %1266 = vrot.lane.b32.xlu1 %v1144_v13, %s3665_s10  ;;  %1280 = vrot.lane.b32.xlu0 %v1202_v15, %s3665_s10  ;;  %v1289_v19 = vpack.c.bf16 %v1202_v15, %v1202_v15  ;;  %v1275_v24 = vpack.c.bf16 %v1144_v13, %v1144_v13 }
 0x118   : > { %v1146_v18 = vpop.f32.mrf.mxu0  ;;  %v1204_v20 = vpop.f32.mrf.mxu1 }
 0x119   : > { %v1312_v22 = vsel %vm1307_vm3, %v1289_v19, 0 }
 0x11a   : > { %v3326_v21 = vpop.f32.mrf.mxu0  ;;  %v3334_v23 = vpop.f32.mrf.mxu1  ;;  %3344 = vmatpush3.bf16.xpose.msra.mxu1 %v1312_v22 }
 0x11b   : > { %1286 = vrot.lane.b32.xlu1 %v1202_v15, %s3666_s12  ;;  %1283 = vrot.lane.b32.xlu0 %v1202_v15, %s3667_s14 }
 0x11c   : > { %3355 = vmatprep.subr.bf16.mxu1 %v3663_v2 }
 0x11d   : > { %v1259_v25 = vpop.f32.mrf.mxu0 }
 0x11e   : > { %v3980_v37 = vadd.f32 %v3183_v32, %v1259_v25 }
 0x11f   : > { %1272 = vrot.lane.b32.xlu1 %v1144_v13, %s3666_s12  ;;  %1269 = vrot.lane.b32.xlu0 %v1144_v13, %s3667_s14  ;;  %v3341_v26 = vpop.f32.mrf.mxu0 }
 0x120   : > { %v1303_v41 = vpack.c.bf16 %v3980_v37, %v3980_v37 }
 0x121   : > { %3346 = vmatmul.mubr.msk.bf16.vlgmr.msra.gmra.mxu1 %vm1307_vm3, %v1275_v24  ;;  %v1262_v27 = vpop.f32.mrf.mxu0 }
 0x122   : > { %3357 = vmatprep.mubr.msk.bf16.mxu1 %vm3664_vm1, %v3663_v2  ;;  %v1549_v45 = vsel %vm1547_vm4, %v1303_v41, 0 }
 0x123   : > { %v3342_v28 = vpop.f32.mrf.mxu0 }
 0x189   : > { %v1267_v29 = vpop.permute.xlu1 %1266  ;;  %v1281_v30 = vpop.permute.xlu0 %1280 }
 0x18a   : > { %v1290_v31 = vpack.c.bf16 %v1281_v30, %v1281_v30  ;;  %v1276_v40 = vpack.c.bf16 %v1267_v29, %v1267_v29 }
 0x18c   : > { %v1358_v33 = vsel %vm1307_vm3, %v1290_v31, 0 }
 0x18d   : > { %v1284_v34 = vpop.permute.xlu0 %1283  ;;  %3350 = vmatpush3.bf16.xpose.msra.mxu0 %v1358_v33  ;;  %v1287_v35 = vpop.permute.xlu1 %1286 }
 0x18e   : > { %v1291_v36 = vpack.c.bf16 %v1284_v34, %v1284_v34  ;;  %3361 = vmatprep.subr.bf16.mxu0 %v3663_v2  ;;  %v1292_v39 = vpack.c.bf16 %v1287_v35, %v1287_v35 }
 0x190   : > { %v1404_v38 = vsel %vm1307_vm3, %v1291_v36, 0  ;;  %v1450_v43 = vsel %vm1307_vm3, %v1292_v39, 0 }
 0x191   : > { %3356 = vmatpush3.bf16.xpose.msra.mxu1 %v1404_v38  ;;  %v1270_v42 = vpop.permute.xlu0 %1269  ;;  %v1273_v46 = vpop.permute.xlu1 %1272 }
 0x192   : > { %3367 = vmatprep.subr.bf16.mxu1 %v3663_v2  ;;  %v1277_v44 = vpack.c.bf16 %v1270_v42, %v1270_v42  ;;  %v1278_v47 = vpack.c.bf16 %v1273_v46, %v1273_v46 }
 0x194   : > { %3352 = vmatmul.mubr.msk.bf16.vlgmr.msra.gmra.mxu0 %vm1307_vm3, %v1276_v40 }
 0x195   : > { %3362 = vmatpush3.bf16.xpose.msra.mxu0 %v1450_v43  ;;  %3363 = vmatprep.mubr.msk.bf16.mxu0 %vm3664_vm1, %v3663_v2 }
 0x196   : > { %3373 = vmatprep.subr.bf16.mxu0 %v3663_v2 }
 0x198   : > { %3358 = vmatmul.mubr.msk.bf16.vlgmr.msra.gmra.mxu1 %vm1307_vm3, %v1277_v44 }
 0x199   : > { %3368 = vmatpush3.bf16.msra.mxu1 %v1549_v45  ;;  %3369 = vmatprep.mubr.msk.bf16.mxu1 %vm3664_vm1, %v3663_v2 }
 0x19a   : > { %3379 = vmatprep.subr.bf16.mxu1 %v3663_v2 }
 0x19c   : > { %3364 = vmatmul.mubr.msk.bf16.vlgmr.msra.gmra.mxu0 %vm1307_vm3, %v1278_v47 }
 0x19d   : > { %3375 = vmatprep.mubr.msk.bf16.mxu0 %vm3664_vm1, %v3663_v2 }
 0x1e1   : > { %v1348_v48 = vpop.f32.mrf.mxu1 }
 0x1e2   : > { %v1492_v49 = vmul.f32 0.35355338, %v1348_v48 }
 0x1e3   : > { %v3347_v50 = vpop.f32.mrf.mxu1 }
 0x1e4   : > { %v1496_v51 = vsel %vm1307_vm3, %v1492_v49, -inf }
 0x1e5   : > { %1497 = vmax.xlane.f32.xlu0 %v1496_v51  ;;  %v1351_v52 = vpop.f32.mrf.mxu1 }
 0x1e7   : > { %v3348_v53 = vpop.f32.mrf.mxu1 }
 0x254   : > { %v1394_v54 = vpop.f32.mrf.mxu0 }
 0x255   : > { %v1493_v55 = vmul.f32 0.35355338, %v1394_v54 }
 0x256   : > { %v3353_v56 = vpop.f32.mrf.mxu0 }
 0x257   : > { %v1499_v57 = vsel %vm1307_vm3, %v1493_v55, -inf }
 0x258   : > { %v1440_v58 = vpop.f32.mrf.mxu1  ;;  %1500 = vmax.xlane.f32.xlu1 %v1499_v57  ;;  %v1397_v59 = vpop.f32.mrf.mxu0 }
 0x259   : > { %v1494_v60 = vmul.f32 0.35355338, %v1440_v58  ;;  %v3565_v59 = vld [vmem:[%s4349_s18 + $0x8] sm:$0xff]  }
 0x25a   : > { %v3354_v61 = vpop.f32.mrf.mxu0  ;;  %v3359_v62 = vpop.f32.mrf.mxu1 }
 0x25b   : > { %v1502_v63 = vsel %vm1307_vm3, %v1494_v60, -inf }
 0x25c   : > { %1503 = vmax.xlane.f32.xlu0 %v1502_v63  ;;  %v1443_v0 = vpop.f32.mrf.mxu1  ;;  %v1486_v1 = vpop.f32.mrf.mxu0 }
 0x25d   : > { %v1495_v3 = vmul.f32 0.35355338, %v1486_v1 }
 0x25e   : > { %v3360_v4 = vpop.f32.mrf.mxu1  ;;  %v3365_v5 = vpop.f32.mrf.mxu0 }
 0x25f   : > { %v1505_v7 = vsel %vm1307_vm3, %v1495_v3, -inf }
 0x260   : > { %1506 = vmax.xlane.f32.xlu0 %v1505_v7  ;;  %v1489_v8 = vpop.f32.mrf.mxu0 }
 0x262   : > { %v3366_v9 = vpop.f32.mrf.mxu0 }
 0x269   : > { %1294 = vrot.lane.b32.xlu1 %v3980_v37, %s3665_s10 }
 0x26e   : > { %v1498_v10 = vpop.xlane.xlu0 %1497 }
 0x26f   : > { %v1508_v11 = vsub.f32 %v1492_v49, %v1498_v10 }
 0x271   : > { %v1512_v12 = vmul.f32 1.442695, %v1508_v11 }
 0x273   : > { %3581 = vpow2.f32 %v1512_v12 }
 0x280   : > { %v3582_v13 = vpop.eup %3581 }
 0x281   : > { %v1520_v14 = vsel %vm1307_vm3, %v3582_v13, 0.0 }
 0x28d   : > { %1521 = vadd.xlane.f32.xlu1 %v1520_v14 }
 0x2e1   : > { %v1501_v15 = vpop.xlane.xlu1 %1500 }
 0x2e2   : > { %v1509_v16 = vsub.f32 %v1493_v55, %v1501_v15 }
 0x2e4   : > { %v1514_v17 = vmul.f32 1.442695, %v1509_v16 }
 0x2e5   : > { %v1504_v18 = vpop.xlane.xlu0 %1503  ;;  %v1295_v19 = vpop.permute.xlu1 %1294 }
 0x2e6   : > { %3583 = vpow2.f32 %v1514_v17  ;;  %v1510_v20 = vsub.f32 %v1494_v60, %v1504_v18  ;;  %v1304_v21 = vpack.c.bf16 %v1295_v19, %v1295_v19  ;;  %v3566_v60 = vld [vmem:[%s4349_s18] sm:$0xff]  }
 0x2e7   : > { %v3195_v18 = vld [vmem:[%s4351_s26] ss:$0 sm:$0xff] }
 0x2e8   : > { %v1516_v22 = vmul.f32 1.442695, %v1510_v20  ;;  %v1595_v23 = vsel %vm1547_vm4, %v1304_v21, 0 }
 0x2e9   : > { %3374 = vmatpush3.bf16.msra.mxu0 %v1595_v23  ;;  %v1507_v24 = vpop.xlane.xlu0 %1506 }
 0x2ea   : > { %3585 = vpow2.f32 %v1516_v22  ;;  %v1511_v25 = vsub.f32 %v1495_v3, %v1507_v24  ;;  %3385 = vmatprep.subr.bf16.mxu0 %v3663_v2 }
 0x2ec   : > { %v1518_v26 = vmul.f32 1.442695, %v1511_v25 }
 0x2ee   : > { %3587 = vpow2.f32 %v1518_v26 }
 0x2f3   : > { %v3584_v27 = vpop.eup %3583 }
 0x2f4   : > { %v1523_v28 = vsel %vm1307_vm3, %v3584_v27, 0.0 }
 0x2f5   : > { %1524 = vadd.xlane.f32.xlu0 %v1523_v28 }
 0x2f7   : > { %v3586_v29 = vpop.eup %3585 }
 0x2f8   : > { %v1526_v30 = vsel %vm1307_vm3, %v3586_v29, 0.0 }
 0x2f9   : > { %1527 = vadd.xlane.f32.xlu1 %v1526_v30 }
 0x2fb   : > { %v3588_v31 = vpop.eup %3587 }
 0x2fc   : > { %v1529_v32 = vsel %vm1307_vm3, %v3588_v31, 0.0 }
 0x2fd   : > { %1530 = vadd.xlane.f32.xlu0 %v1529_v32  ;;  %v1065_v32 = vld [vmem:[%s4353_s27] sm:$0xff]  ;;  %s4364_s27 = scalar_lea.vmem %s4363_s28, %s3832_s0 }
 0x30a   : > { %1300 = vrot.lane.b32.xlu1 %v3980_v37, %s3666_s12 }
 0x313   : > { %1297 = vrot.lane.b32.xlu0 %v3980_v37, %s3667_s14 }
 0x316   : > { %v1522_v33 = vpop.xlane.xlu1 %1521 }
 0x317   : > { %3589 = vrcp.f32 %v1522_v33  ;;  %v1860_v33 = vpack.c.bf16 %v1065_v32, %v1065_v32 }
 0x324   : > { %v3590_v34 = vpop.eup %3589 }
 0x325   : > { %v1536_v35 = vmul.f32 %v3590_v34, %v3582_v13  ;;  %v3569_v34 = vld [vmem:[%s3877_s4 + $0x8] sm:$0xff]  }
 0x327   : > { %v1540_v36 = vpack.c.bf16 %v1536_v35, %v1536_v35  ;;  %v3570_v35 = vld [vmem:[%s3877_s4] sm:$0xff]  }
 0x329   : > { %3370 = vmatmul.mubr.msk.bf16.vlgmr.msra.gmra.mxu1 %vm1307_vm3, %v1540_v36 }
 0x32a   : > { %3381 = vmatprep.mubr.msk.bf16.mxu1 %vm3664_vm1, %v3663_v2 }
 0x37e   : > { %v1525_v38 = vpop.xlane.xlu0 %1524 }
 0x37f   : > { %3591 = vrcp.f32 %v1525_v38 }
 0x382   : > { %v1528_v39 = vpop.xlane.xlu1 %1527 }
 0x383   : > { %3593 = vrcp.f32 %v1528_v39 }
 0x386   : > { %v1531_v40 = vpop.xlane.xlu0 %1530  ;;  %v1301_v41 = vpop.permute.xlu1 %1300 }
 0x387   : > { %3595 = vrcp.f32 %v1531_v40  ;;  %v1306_v44 = vpack.c.bf16 %v1301_v41, %v1301_v41  ;;  %v3199_v41 = vld [vmem:[%s4355_s20] ss:$0 sm:$0xff] }
 0x389   : > { %v1687_v49 = vsel %vm1547_vm4, %v1306_v44, 0 }
 0x38a   : > { %v1298_v42 = vpop.permute.xlu0 %1297 }
 0x38b   : > { %v1305_v43 = vpack.c.bf16 %v1298_v42, %v1298_v42 }
 0x38c   : > { %v3592_v37 = vpop.eup %3591 }
 0x38d   : > { %v1641_v45 = vsel %vm1547_vm4, %v1305_v43, 0  ;;  %v1537_v46 = vmul.f32 %v3592_v37, %v3584_v27  ;;  %v3200_v43 = vld [vmem:[%s4357_s21] ss:$0 sm:$0xff]  ;;  %s4368_s21 = sld [smem:[#allocation3_spill]] }
 0x38e   : > { %3380 = vmatpush3.bf16.msra.mxu1 %v1641_v45 }
 0x38f   : > { %v1541_v47 = vpack.c.bf16 %v1537_v46, %v1537_v46  ;;  %3391 = vmatprep.subr.bf16.mxu1 %v3663_v2  ;;  %v3205_v46 = vld [vmem:[%s3882_s24 + $0x1] ss:$0 sm:$0xff] }
 0x390   : > { %v3594_v48 = vpop.eup %3593 }
 0x391   : > { %3376 = vmatmul.mubr.msk.bf16.vlgmr.msra.gmra.mxu0 %vm1307_vm3, %v1541_v47  ;;  %v1538_v50 = vmul.f32 %v3594_v48, %v3586_v29 }
 0x392   : > { %3386 = vmatpush3.bf16.msra.mxu0 %v1687_v49  ;;  %3387 = vmatprep.mubr.msk.bf16.mxu0 %vm3664_vm1, %v3663_v2 }
 0x393   : > { %v1542_v51 = vpack.c.bf16 %v1538_v50, %v1538_v50  ;;  %3399 = vmatprep.subr.bf16.mxu0 %v3663_v2  ;;  %p3239_p8 = scmp.ne.s32.totalorder %s4368_s21, 1 }
 0x394   : > { %v3596_v52 = vpop.eup %3595 }
 0x395   : > { %3382 = vmatmul.mubr.msk.bf16.vlgmr.msra.gmra.mxu1 %vm1307_vm3, %v1542_v51  ;;  %v1539_v53 = vmul.f32 %v3596_v52, %v3588_v31  ;;  %v3567_v31 = vld [vmem:[%s3877_s4 + $0x18] sm:$0xff]  }
 0x396   : > { %3395 = vmatprep.mubr.msk.bf16.mxu1 %vm3664_vm1, %v3663_v2  ;;  %3392 = vmatpush3.bf16.msra.mxu1 %v3565_v59  ;;  %v3201_v59 = vld [vmem:[%s3882_s24] ss:$0 sm:$0xff] }
 0x397   : > { %v1543_v54 = vpack.c.bf16 %v1539_v53, %v1539_v53  ;;  %3393 = vmatprep.subr.bf16.mxu1 %v3663_v2 }
 0x399   : > { %3388 = vmatmul.mubr.msk.bf16.vlgmr.msra.gmra.mxu0 %vm1307_vm3, %v1543_v54  ;;  %v3571_v54 = vld [vmem:[%s3877_s4 + $0x28] sm:$0xff]  }
 0x39a   : > { %3403 = vmatprep.mubr.msk.bf16.mxu0 %vm3664_vm1, %v3663_v2  ;;  %3394 = vmatpush3.bf16.msra.mxu1 %v3566_v60 }
 0x39b   : > { %3407 = vmatprep.subr.bf16.mxu1 %v3663_v2  ;;  %3400 = vmatpush3.bf16.msra.mxu0 %v3569_v34 }
 0x39c   : > { %3401 = vmatprep.subr.bf16.mxu0 %v3663_v2 }
 0x39f   : > { %3402 = vmatpush3.bf16.msra.mxu0 %v3570_v35 }
 0x3a0   : > { %3415 = vmatprep.subr.bf16.mxu0 %v3663_v2 }
 0x3e9   : > { %v1585_v55 = vpop.f32.mrf.mxu1 }
 0x3eb   : > { %v3371_v56 = vpop.f32.mrf.mxu1 }
 0x3ed   : > { %v1588_v57 = vpop.f32.mrf.mxu1 }
 0x3ef   : > { %v3372_v58 = vpop.f32.mrf.mxu1 }
 0x451   : > { %v1631_v61 = vpop.f32.mrf.mxu0 }
 0x452   : > { %1730 = vrot.lane.b32.xlu1 %v1631_v61, %s3668_s8 }
 0x453   : > { %v3377_v62 = vpop.f32.mrf.mxu0 }
 0x455   : > { %v1634_v63 = vpop.f32.mrf.mxu0  ;;  %v1677_v0 = vpop.f32.mrf.mxu1 }
 0x456   : > { %1734 = vrot.lane.b32.xlu0 %v1677_v0, %s3669_s25 }
 0x457   : > { %v3378_v1 = vpop.f32.mrf.mxu0  ;;  %v3383_v3 = vpop.f32.mrf.mxu1 }
 0x459   : > { %v1680_v4 = vpop.f32.mrf.mxu1  ;;  %v1723_v5 = vpop.f32.mrf.mxu0 }
 0x45a   : > { %1738 = vrot.lane.b32.xlu1 %v1723_v5, %s3670_s22 }
 0x45b   : > { %v3384_v7 = vpop.f32.mrf.mxu1  ;;  %v3389_v8 = vpop.f32.mrf.mxu0 }
 0x45d   : > { %v1726_v9 = vpop.f32.mrf.mxu0 }
 0x45f   : > { %v3390_v10 = vpop.f32.mrf.mxu0 }
 0x4c4   : > { %v1731_v11 = vpop.permute.xlu1 %1730 }
 0x4c5   : > { %v1741_v13 = vsel %vm1307_vm3, %v1585_v55, %v1731_v11  ;;  %v3572_v55 = vld [vmem:[%s3877_s4 + $0x20] sm:$0xff]  }
 0x4c6   : > { %v3209_v11 = vld [vmem:[%s3882_s24 + $0x2] ss:$0 sm:$0xff] }
 0x4c8   : > { %v1735_v12 = vpop.permute.xlu0 %1734 }
 0x4c9   : > { %v1743_v14 = vsel %vm1742_vm5, %v1741_v13, %v1735_v12 }
 0x4cc   : > { %v1739_v15 = vpop.permute.xlu1 %1738 }
 0x4cd   : > { %v1745_v16 = vsel %vm1744_vm6, %v1743_v14, %v1739_v15 }
 0x4ce   : > { %v1746_v17 = vpack.c.bf16 %v1745_v16, %v1745_v16 }
 0x4d0   : > { %3396 = vmatmul.mubr.msk.bf16.vlgmr.msra.gmra.mxu1 %vm1105_vm2, %v1746_v17 }
 0x4d1   : > { %3411 = vmatprep.mubr.msk.bf16.mxu1 %vm3664_vm1, %v3663_v2  ;;  %3408 = vmatpush3.bf16.msra.mxu1 %v3567_v31 }
 0x4d2   : > { %3409 = vmatprep.subr.bf16.mxu1 %v3663_v2 }
 0x590   : > { %v1802_v19 = vpop.f32.mrf.mxu1 }
 0x591   : > { %v1803_v20 = vadd.f32 %v3195_v18, %v1802_v19 }
 0x592   : > { %v3397_v21 = vpop.f32.mrf.mxu1 }
 0x593   : > { %v1808_v22 = vadd.f32 %v1803_v20, %v3945_v6  ;;  %v3568_v6 = vld [vmem:[%s3877_s4 + $0x10] sm:$0xff]  }
 0x594   : > { %v1805_v23 = vpop.f32.mrf.mxu1  ;;  %3410 = vmatpush3.bf16.msra.mxu1 %v3568_v6 }
 0x595   : > { %v1811_v24 = vsel %vm1105_vm2, %v1808_v22, 0.0  ;;  %3423 = vmatprep.subr.bf16.mxu1 %v3663_v2 }
 0x596   : > { %1812 = vadd.xlane.f32.xlu0 %v1811_v24  ;;  %v3398_v25 = vpop.f32.mrf.mxu1 }
 0x597   : > { %3412 = vmatmul.mubr.msk.bf16.vlgmr.msra.gmra.mxu1 %vm1105_vm2, %v1860_v33 }
 0x598   : > { %3425 = vmatprep.mubr.msk.bf16.mxu1 %vm3664_vm1, %v3663_v2 }
 0x61f   : > { %v1813_v26 = vpop.xlane.xlu0 %1812 }
 0x620   : > { %v1815_v27 = vmul.f32 0.03125, %v1813_v26 }
 0x622   : > { %v1816_v28 = vsub.f32 %v1808_v22, %v1815_v27 }
 0x624   : > { %v1817_v29 = vmul.f32 %v1816_v28, %v1816_v28 }
 0x626   : > { %v1818_v30 = vsel %vm1105_vm2, %v1817_v29, 0.0 }
 0x627   : > { %1819 = vadd.xlane.f32.xlu1 %v1818_v30 }
 0x657   : > { %v1977_v47 = vpop.f32.mrf.mxu1 }
 0x658   : > { %v1978_v48 = vadd.f32 %v3205_v46, %v1977_v47 }
 0x659   : > { %v3413_v49 = vpop.f32.mrf.mxu1 }
 0x65a   : > { %2059 = vrot.lane.b32.xlu1 %v1978_v48, %s3667_s14  ;;  %2056 = vrot.lane.b32.xlu0 %v1978_v48, %s3665_s10  ;;  %v2065_v50 = vpack.c.bf16 %v1978_v48, %v1978_v48 }
 0x65b   : > { %v1980_v51 = vpop.f32.mrf.mxu1 }
 0x65c   : > { %v2087_v52 = vsel %vm1307_vm3, %v2065_v50, 0 }
 0x65d   : > { %v3414_v53 = vpop.f32.mrf.mxu1  ;;  %3424 = vmatpush3.bf16.xpose.msra.mxu1 %v2087_v52 }
 0x65e   : > { %2062 = vrot.lane.b32.xlu1 %v1978_v48, %s3666_s12  ;;  %3435 = vmatprep.subr.bf16.mxu1 %v3663_v2 }
 0x6b0   : > { %v1820_v36 = vpop.xlane.xlu1 %1819 }
 0x6b1   : > { %v1821_v38 = vmul.f32 0.03125, %v1820_v36 }
 0x6b3   : > { %v1822_v39 = vadd.f32 1e-05, %v1821_v38 }
 0x6b5   : > { %3597 = vrsqrt.f32 %v1822_v39 }
 0x6c2   : > { %v3598_v40 = vpop.eup %3597 }
 0x6c3   : > { %v1824_v42 = vmul.f32 %v3598_v40, %v1816_v28 }
 0x6c5   : > { %v1831_v37 = vmul.f32 %v3199_v41, %v1824_v42 }
 0x6c7   : > { %v4078_v44 = vadd.f32 %v3200_v43, %v1831_v37 }
 0x6c9   : > { %v1859_v45 = vpack.c.bf16 %v4078_v44, %v4078_v44 }
 0x6cb   : > { %3404 = vmatmul.mubr.msk.bf16.vlgmr.msra.gmra.mxu0 %vm1105_vm2, %v1859_v45 }
 0x6cc   : > { %3419 = vmatprep.mubr.msk.bf16.mxu0 %vm3664_vm1, %v3663_v2  ;;  %3416 = vmatpush3.bf16.msra.mxu0 %v3571_v54  ;;  %v2057_v56 = vpop.permute.xlu0 %2056  ;;  %v2060_v60 = vpop.permute.xlu1 %2059 }
 0x6cd   : > { %3417 = vmatprep.subr.bf16.mxu0 %v3663_v2  ;;  %v2066_v57 = vpack.c.bf16 %v2057_v56, %v2057_v56  ;;  %v2067_v61 = vpack.c.bf16 %v2060_v60, %v2060_v60 }
 0x6cf   : > { %v2133_v58 = vsel %vm1307_vm3, %v2066_v57, 0  ;;  %v2179_v3 = vsel %vm1307_vm3, %v2067_v61, 0 }
 0x6d0   : > { %3418 = vmatpush3.bf16.msra.mxu0 %v3572_v55  ;;  %v2063_v12 = vpop.permute.xlu1 %2062 }
 0x6d1   : > { %3429 = vmatprep.subr.bf16.mxu0 %v3663_v2  ;;  %v2068_v14 = vpack.c.bf16 %v2063_v12, %v2063_v12 }
 0x6d3   : > { %3420 = vmatmul.mubr.msk.bf16.vlgmr.msra.gmra.mxu0 %vm1105_vm2, %v1860_v33  ;;  %v2225_v18 = vsel %vm1307_vm3, %v2068_v14, 0 }
 0x6d4   : > { %3431 = vmatprep.mubr.msk.bf16.mxu0 %vm3664_vm1, %v3663_v2  ;;  %3430 = vmatpush3.bf16.xpose.msra.mxu0 %v2133_v58 }
 0x6d5   : > { %3441 = vmatprep.subr.bf16.mxu0 %v3663_v2 }
 0x78b   : > { %v1916_v62 = vpop.f32.mrf.mxu0 }
 0x78c   : > { %v1917_v63 = vadd.f32 %v3201_v59, %v1916_v62 }
 0x78d   : > { %v3405_v0 = vpop.f32.mrf.mxu0 }
 0x78e   : > { %v2051_v1 = vpack.c.bf16 %v1917_v63, %v1917_v63  ;;  %2048 = vrot.lane.b32.xlu1 %v1917_v63, %s3666_s12  ;;  %2042 = vrot.lane.b32.xlu0 %v1917_v63, %s3665_s10 }
 0x78f   : > { %v1919_v4 = vpop.f32.mrf.mxu0 }
 0x790   : > { %3426 = vmatmul.mubr.msk.bf16.vlgmr.msra.gmra.mxu1 %vm1307_vm3, %v2051_v1 }
 0x791   : > { %v3406_v5 = vpop.f32.mrf.mxu0  ;;  %3436 = vmatpush3.bf16.xpose.msra.mxu1 %v2179_v3  ;;  %3437 = vmatprep.mubr.msk.bf16.mxu1 %vm3664_vm1, %v3663_v2 }
 0x792   : > { %2045 = vrot.lane.b32.xlu0 %v1917_v63, %s3667_s14  ;;  %3447 = vmatprep.subr.bf16.mxu1 %v3663_v2 }
 0x793   : > { %v2035_v7 = vpop.f32.mrf.mxu0 }
 0x794   : > { %v4110_v13 = vadd.f32 %v3209_v11, %v2035_v7 }
 0x795   : > { %v3421_v8 = vpop.f32.mrf.mxu0 }
 0x796   : > { %v2079_v17 = vpack.c.bf16 %v4110_v13, %v4110_v13 }
 0x797   : > { %v2038_v9 = vpop.f32.mrf.mxu0 }
 0x798   : > { %v2323_v21 = vsel %vm1547_vm4, %v2079_v17, 0 }
 0x799   : > { %v3422_v10 = vpop.f32.mrf.mxu0 }
 0x800   : > { %v2043_v15 = vpop.permute.xlu0 %2042  ;;  %v2049_v22 = vpop.permute.xlu1 %2048 }
 0x801   : > { %v2052_v16 = vpack.c.bf16 %v2043_v15, %v2043_v15  ;;  %v2054_v23 = vpack.c.bf16 %v2049_v22, %v2049_v22 }
 0x803   : > { %3432 = vmatmul.mubr.msk.bf16.vlgmr.msra.gmra.mxu0 %vm1307_vm3, %v2052_v16 }
 0x804   : > { %3442 = vmatpush3.bf16.xpose.msra.mxu0 %v2225_v18  ;;  %v2046_v19 = vpop.permute.xlu0 %2045  ;;  %3443 = vmatprep.mubr.msk.bf16.mxu0 %vm3664_vm1, %v3663_v2 }
 0x805   : > { %v2053_v20 = vpack.c.bf16 %v2046_v19, %v2046_v19  ;;  %3453 = vmatprep.subr.bf16.mxu0 %v3663_v2 }
 0x807   : > { %3438 = vmatmul.mubr.msk.bf16.vlgmr.msra.gmra.mxu1 %vm1307_vm3, %v2053_v20 }
 0x808   : > { %3448 = vmatpush3.bf16.msra.mxu1 %v2323_v21  ;;  %3449 = vmatprep.mubr.msk.bf16.mxu1 %vm3664_vm1, %v3663_v2 }
 0x809   : > { %3459 = vmatprep.subr.bf16.mxu1 %v3663_v2 }
 0x80b   : > { %3444 = vmatmul.mubr.msk.bf16.vlgmr.msra.gmra.mxu0 %vm1307_vm3, %v2054_v23 }
 0x80c   : > { %3455 = vmatprep.mubr.msk.bf16.mxu0 %vm3664_vm1, %v3663_v2 }
 0x850   : > { %v2123_v24 = vpop.f32.mrf.mxu1 }
 0x851   : > { %v2267_v25 = vmul.f32 0.35355338, %v2123_v24 }
 0x852   : > { %v3427_v26 = vpop.f32.mrf.mxu1 }
 0x853   : > { %v2271_v27 = vsel %vm1307_vm3, %v2267_v25, -inf }
 0x854   : > { %2272 = vmax.xlane.f32.xlu0 %v2271_v27  ;;  %v2126_v28 = vpop.f32.mrf.mxu1 }
 0x856   : > { %v3428_v29 = vpop.f32.mrf.mxu1 }
 0x8c3   : > { %v2169_v30 = vpop.f32.mrf.mxu0 }
 0x8c4   : > { %v2268_v31 = vmul.f32 0.35355338, %v2169_v30 }
 0x8c5   : > { %v3433_v6 = vpop.f32.mrf.mxu0 }
 0x8c6   : > { %v2274_v32 = vsel %vm1307_vm3, %v2268_v31, -inf }
 0x8c7   : > { %v2215_v33 = vpop.f32.mrf.mxu1  ;;  %2275 = vmax.xlane.f32.xlu1 %v2274_v32  ;;  %v2172_v34 = vpop.f32.mrf.mxu0 }
 0x8c8   : > { %v2269_v35 = vmul.f32 0.35355338, %v2215_v33  ;;  %v3573_v34 = vld [vmem:[%s3887_s23 + $0x8] sm:$0xff]  }
 0x8c9   : > { %v3434_v36 = vpop.f32.mrf.mxu0  ;;  %v3439_v38 = vpop.f32.mrf.mxu1 }
 0x8ca   : > { %v2277_v39 = vsel %vm1307_vm3, %v2269_v35, -inf }
 0x8cb   : > { %2278 = vmax.xlane.f32.xlu0 %v2277_v39  ;;  %v2218_v40 = vpop.f32.mrf.mxu1  ;;  %v2261_v41 = vpop.f32.mrf.mxu0 }
 0x8cc   : > { %v2270_v42 = vmul.f32 0.35355338, %v2261_v41 }
 0x8cd   : > { %v3440_v43 = vpop.f32.mrf.mxu1  ;;  %v3445_v37 = vpop.f32.mrf.mxu0 }
 0x8ce   : > { %v2280_v45 = vsel %vm1307_vm3, %v2270_v42, -inf }
 0x8cf   : > { %2281 = vmax.xlane.f32.xlu0 %v2280_v45  ;;  %v2264_v46 = vpop.f32.mrf.mxu0 }
 0x8d1   : > { %v3446_v47 = vpop.f32.mrf.mxu0 }
 0x8d8   : > { %2070 = vrot.lane.b32.xlu1 %v4110_v13, %s3665_s10  ;;  %s4370_s10 = sld [smem:[#allocation30_spill]] (!%p3239_p8) }
 0x8dd   : > { %v2273_v48 = vpop.xlane.xlu0 %2272 }
 0x8de   : > { %v2283_v49 = vsub.f32 %v2267_v25, %v2273_v48 }
 0x8e0   : > { %v2287_v50 = vmul.f32 1.442695, %v2283_v49 }
 0x8e2   : > { %3599 = vpow2.f32 %v2287_v50 }
 0x8ef   : > { %v3600_v51 = vpop.eup %3599 }
 0x8f0   : > { %v2295_v52 = vsel %vm1307_vm3, %v3600_v51, 0.0 }
 0x8fc   : > { %2296 = vadd.xlane.f32.xlu1 %v2295_v52 }
 0x950   : > { %v2276_v53 = vpop.xlane.xlu1 %2275 }
 0x951   : > { %v2284_v54 = vsub.f32 %v2268_v31, %v2276_v53 }
 0x953   : > { %v2289_v55 = vmul.f32 1.442695, %v2284_v54 }
 0x954   : > { %v2279_v56 = vpop.xlane.xlu0 %2278  ;;  %v2071_v57 = vpop.permute.xlu1 %2070 }
 0x955   : > { %3601 = vpow2.f32 %v2289_v55  ;;  %v2285_v58 = vsub.f32 %v2269_v35, %v2279_v56  ;;  %v2080_v59 = vpack.c.bf16 %v2071_v57, %v2071_v57  ;;  %v3574_v35 = vld [vmem:[%s3887_s23] sm:$0xff]   ;;  %s4358_s23 = scalar_lea.vmem %s4274_s11, %s3832_s0 }
 0x956   : > { %v3221_v56 = vld [vmem:[%s4358_s23] ss:$0 sm:$0xff] }
 0x957   : > { %v2291_v60 = vmul.f32 1.442695, %v2285_v58  ;;  %v2369_v61 = vsel %vm1547_vm4, %v2080_v59, 0 }
 0x958   : > { %3454 = vmatpush3.bf16.msra.mxu0 %v2369_v61  ;;  %v2282_v62 = vpop.xlane.xlu0 %2281 }
 0x959   : > { %3603 = vpow2.f32 %v2291_v60  ;;  %v2286_v63 = vsub.f32 %v2270_v42, %v2282_v62  ;;  %3465 = vmatprep.subr.bf16.mxu0 %v3663_v2 }
 0x95b   : > { %v2293_v0 = vmul.f32 1.442695, %v2286_v63 }
 0x95d   : > { %3605 = vpow2.f32 %v2293_v0 }
 0x962   : > { %v3602_v1 = vpop.eup %3601 }
 0x963   : > { %v2298_v3 = vsel %vm1307_vm3, %v3602_v1, 0.0 }
 0x964   : > { %2299 = vadd.xlane.f32.xlu0 %v2298_v3 }
 0x966   : > { %v3604_v4 = vpop.eup %3603 }
 0x967   : > { %v2301_v5 = vsel %vm1307_vm3, %v3604_v4, 0.0 }
 0x968   : > { %2302 = vadd.xlane.f32.xlu1 %v2301_v5 }
 0x96a   : > { %v3606_v7 = vpop.eup %3605 }
 0x96b   : > { %v2304_v8 = vsel %vm1307_vm3, %v3606_v7, 0.0 }
 0x96c   : > { %2305 = vadd.xlane.f32.xlu0 %v2304_v8  ;;  %v3576_v8 = vld [vmem:[%s3904_s1] sm:$0xff]  }
 0x979   : > { %2076 = vrot.lane.b32.xlu1 %v4110_v13, %s3666_s12  ;;  %s4359_s12 = sld [smem:[#allocation22_spill]] }
 0x982   : > { %2073 = vrot.lane.b32.xlu0 %v4110_v13, %s3667_s14  ;;  %s4360_s14 = scalar_lea.vmem %s4359_s12, %s3832_s0 }
 0x985   : > { %v2297_v9 = vpop.xlane.xlu1 %2296 }
 0x986   : > { %3607 = vrcp.f32 %v2297_v9  ;;  %v3578_v9 = vld [vmem:[%s3914_s9 + $0x10] sm:$0xff]  }
 0x993   : > { %v3608_v10 = vpop.eup %3607 }
 0x994   : > { %v2311_v11 = vmul.f32 %v3608_v10, %v3600_v51 }
 0x996   : > { %v2315_v12 = vpack.c.bf16 %v2311_v11, %v2311_v11 }
 0x998   : > { %3450 = vmatmul.mubr.msk.bf16.vlgmr.msra.gmra.mxu1 %vm1307_vm3, %v2315_v12 }
 0x999   : > { %3461 = vmatprep.mubr.msk.bf16.mxu1 %vm3664_vm1, %v3663_v2 }
 0x9ed   : > { %v2300_v14 = vpop.xlane.xlu0 %2299 }
 0x9ee   : > { %3609 = vrcp.f32 %v2300_v14 }
 0x9f1   : > { %v2303_v15 = vpop.xlane.xlu1 %2302 }
 0x9f2   : > { %3611 = vrcp.f32 %v2303_v15  ;;  %v3225_v15 = vld [vmem:[%s4360_s14] ss:$0 sm:$0xff] }
 0x9f5   : > { %v2306_v16 = vpop.xlane.xlu0 %2305  ;;  %v2077_v17 = vpop.permute.xlu1 %2076 }
 0x9f6   : > { %3613 = vrcp.f32 %v2306_v16  ;;  %v2082_v20 = vpack.c.bf16 %v2077_v17, %v2077_v17 }
 0x9f8   : > { %v2461_v25 = vsel %vm1547_vm4, %v2082_v20, 0  ;;  %v3579_v20 = vld [vmem:[%s3914_s9 + $0x8] sm:$0xff]  }
 0x9f9   : > { %v2074_v18 = vpop.permute.xlu0 %2073 }
 0x9fa   : > { %v2081_v19 = vpack.c.bf16 %v2074_v18, %v2074_v18 }
 0x9fb   : > { %v3610_v13 = vpop.eup %3609 }
 0x9fc   : > { %v2415_v21 = vsel %vm1547_vm4, %v2081_v19, 0  ;;  %v2312_v22 = vmul.f32 %v3610_v13, %v3602_v1 }
 0x9fd   : > { %3460 = vmatpush3.bf16.msra.mxu1 %v2415_v21  ;;  %v3580_v21 = vld [vmem:[%s3914_s9] sm:$0xff]  }
 0x9fe   : > { %v2316_v23 = vpack.c.bf16 %v2312_v22, %v2312_v22  ;;  %3471 = vmatprep.subr.bf16.mxu1 %v3663_v2  ;;  %v3227_v22 = vld [vmem:[%s4364_s27] ss:$0 sm:$0xff] }
 0x9ff   : > { %v3612_v24 = vpop.eup %3611 }
 0xa00   : > { %3456 = vmatmul.mubr.msk.bf16.vlgmr.msra.gmra.mxu0 %vm1307_vm3, %v2316_v23  ;;  %v2313_v26 = vmul.f32 %v3612_v24, %v3604_v4 }
 0xa01   : > { %3466 = vmatpush3.bf16.msra.mxu0 %v2461_v25  ;;  %3467 = vmatprep.mubr.msk.bf16.mxu0 %vm3664_vm1, %v3663_v2 }
 0xa02   : > { %v2317_v27 = vpack.c.bf16 %v2313_v26, %v2313_v26  ;;  %3479 = vmatprep.subr.bf16.mxu0 %v3663_v2 }
 0xa03   : > { %v3614_v28 = vpop.eup %3613 }
 0xa04   : > { %3462 = vmatmul.mubr.msk.bf16.vlgmr.msra.gmra.mxu1 %vm1307_vm3, %v2317_v27  ;;  %v2314_v29 = vmul.f32 %v3614_v28, %v3606_v7  ;;  %v3575_v7 = vld [vmem:[%s3904_s1 + $0x8] sm:$0xff]  }
 0xa05   : > { %3475 = vmatprep.mubr.msk.bf16.mxu1 %vm3664_vm1, %v3663_v2  ;;  %3472 = vmatpush3.bf16.msra.mxu1 %v3573_v34 }
 0xa06   : > { %v2318_v30 = vpack.c.bf16 %v2314_v29, %v2314_v29  ;;  %3473 = vmatprep.subr.bf16.mxu1 %v3663_v2 }
 0xa08   : > { %3468 = vmatmul.mubr.msk.bf16.vlgmr.msra.gmra.mxu0 %vm1307_vm3, %v2318_v30 }
 0xa09   : > { %3483 = vmatprep.mubr.msk.bf16.mxu0 %vm3664_vm1, %v3663_v2  ;;  %3474 = vmatpush3.bf16.msra.mxu1 %v3574_v35 }
 0xa0a   : > { %3487 = vmatprep.subr.bf16.mxu1 %v3663_v2  ;;  %3480 = vmatpush3.bf16.msra.mxu0 %v3575_v7 }
 0xa0b   : > { %3481 = vmatprep.subr.bf16.mxu0 %v3663_v2 }
 0xa0e   : > { %3482 = vmatpush3.bf16.msra.mxu0 %v3576_v8 }
 0xa58   : > { %v2359_v31 = vpop.f32.mrf.mxu1 }
 0xa5a   : > { %v3451_v6 = vpop.f32.mrf.mxu1 }
 0xa5c   : > { %v2362_v32 = vpop.f32.mrf.mxu1 }
 0xa5e   : > { %v3452_v33 = vpop.f32.mrf.mxu1 }
 0xac0   : > { %v2405_v36 = vpop.f32.mrf.mxu0 }
 0xac1   : > { %2504 = vrot.lane.b32.xlu1 %v2405_v36, %s3668_s8  ;;  %s4371_s8 = sld [smem:[#allocation31_spill]] (!%p3239_p8) }
 0xac2   : > { %v3457_v38 = vpop.f32.mrf.mxu0 }
 0xac4   : > { %v2408_v39 = vpop.f32.mrf.mxu0  ;;  %v2451_v40 = vpop.f32.mrf.mxu1 }
 0xac5   : > { %2508 = vrot.lane.b32.xlu0 %v2451_v40, %s3669_s25 }
 0xac6   : > { %v3458_v41 = vpop.f32.mrf.mxu0  ;;  %v3463_v42 = vpop.f32.mrf.mxu1 }
 0xac8   : > { %v2454_v43 = vpop.f32.mrf.mxu1  ;;  %v2497_v37 = vpop.f32.mrf.mxu0 }
 0xac9   : > { %2512 = vrot.lane.b32.xlu1 %v2497_v37, %s3670_s22  ;;  %s4361_s22 = sld [smem:[#allocation23_spill]] }
 0xaca   : > { %v3464_v45 = vpop.f32.mrf.mxu1  ;;  %v3469_v46 = vpop.f32.mrf.mxu0 }
 0xacb   : > { %v3237_v46 = vld [vmem:[%s1048_s29] ss:$0 sm:$0xff] }
 0xacc   : > { %v2500_v47 = vpop.f32.mrf.mxu0 }
 0xace   : > { %v3470_v48 = vpop.f32.mrf.mxu0 }
 0xacf   : > { %s4362_s26 = scalar_lea.vmem %s4361_s22, %s3832_s0  ;;  %v3238_v48 = vld [vmem:[%s1051_s13] ss:$0 sm:$0xff]  ;;  %s4369_s13 = sld [smem:[#allocation32_spill]] (!%p3239_p8) }
 0xad0   : > { %v3226_v17 = vld [vmem:[%s4362_s26] ss:$0 sm:$0xff]  ;;  %s4372_s26 = sld [smem:[#allocation33_spill]] (!%p3239_p8) }
 0xb33   : > { %v2505_v49 = vpop.permute.xlu1 %2504 }
 0xb34   : > { %v2515_v51 = vsel %vm1307_vm3, %v2359_v31, %v2505_v49 }
 0xb37   : > { %v2509_v50 = vpop.permute.xlu0 %2508 }
 0xb38   : > { %v2516_v52 = vsel %vm1742_vm5, %v2515_v51, %v2509_v50 }
 0xb3b   : > { %v2513_v53 = vpop.permute.xlu1 %2512 }
 0xb3c   : > { %v2517_v54 = vsel %vm1744_vm6, %v2516_v52, %v2513_v53 }
 0xb3d   : > { %v2518_v55 = vpack.c.bf16 %v2517_v54, %v2517_v54 }
 0xb3f   : > { %3476 = vmatmul.mubr.msk.bf16.vlgmr.msra.gmra.mxu1 %vm1105_vm2, %v2518_v55 }
 0xb40   : > { %3495 = vmatprep.mubr.msk.bf16.mxu1 %vm3664_vm1, %v3663_v2 }
 0xbff   : > { %v2574_v57 = vpop.f32.mrf.mxu1 }
 0xc00   : > { %v2575_v58 = vadd.f32 %v3221_v56, %v2574_v57 }
 0xc01   : > { %v3477_v59 = vpop.f32.mrf.mxu1 }
 0xc02   : > { %v2580_v60 = vadd.f32 %v2575_v58, %v4078_v44  ;;  %v3577_v44 = vld [vmem:[%s3914_s9 + $0x18] sm:$0xff]  }
 0xc03   : > { %v2577_v61 = vpop.f32.mrf.mxu1  ;;  %3488 = vmatpush3.bf16.msra.mxu1 %v3577_v44 }
 0xc04   : > { %v2583_v62 = vsel %vm1105_vm2, %v2580_v60, 0.0  ;;  %3489 = vmatprep.subr.bf16.mxu1 %v3663_v2 }
 0xc05   : > { %2584 = vadd.xlane.f32.xlu0 %v2583_v62  ;;  %v3478_v63 = vpop.f32.mrf.mxu1 }
 0xc07   : > { %3490 = vmatpush3.bf16.msra.mxu1 %v3578_v9 }
 0xc08   : > { %3491 = vmatprep.subr.bf16.mxu1 %v3663_v2 }
 0xc0b   : > { %3492 = vmatpush3.bf16.msra.mxu1 %v3579_v20 }
 0xc0c   : > { %3493 = vmatprep.subr.bf16.mxu1 %v3663_v2  ;;  %v3231_v2 = vld [vmem:[%s1045_s17] ss:$0 sm:$0xff] }
 0xc0f   : > { %3494 = vmatpush3.bf16.msra.mxu1 %v3580_v21 }
 0xc8e   : > { %v2585_v0 = vpop.xlane.xlu0 %2584 }
 0xc8f   : > { %v2586_v1 = vmul.f32 0.03125, %v2585_v0 }
 0xc91   : > { %v2587_v3 = vsub.f32 %v2580_v60, %v2586_v1 }
 0xc93   : > { %v2588_v4 = vmul.f32 %v2587_v3, %v2587_v3 }
 0xc95   : > { %v2589_v5 = vsel %vm1105_vm2, %v2588_v4, 0.0 }
 0xc96   : > { %2590 = vadd.xlane.f32.xlu1 %v2589_v5 }
 0xd1f   : > { %v2591_v10 = vpop.xlane.xlu1 %2590 }
 0xd20   : > { %v2592_v11 = vmul.f32 0.03125, %v2591_v10 }
 0xd22   : > { %v2593_v12 = vadd.f32 1e-05, %v2592_v11 }
 0xd24   : > { %3615 = vrsqrt.f32 %v2593_v12 }
 0xd31   : > { %v3616_v14 = vpop.eup %3615 }
 0xd32   : > { %v2595_v16 = vmul.f32 %v3616_v14, %v2587_v3 }
 0xd34   : > { %v2602_v18 = vmul.f32 %v3225_v15, %v2595_v16 }
 0xd36   : > { %v2609_v19 = vadd.f32 %v3226_v17, %v2602_v18 }
 0xd38   : > { %v2615_v13 = vpack.c.bf16 %v2609_v19, %v2609_v19 }
 0xd3a   : > { %3484 = vmatmul.mubr.msk.bf16.vlgmr.msra.gmra.mxu0 %vm1105_vm2, %v2615_v13 }
 0xdfa   : > { %v2671_v23 = vpop.f32.mrf.mxu0 }
 0xdfb   : > { %v2672_v24 = vadd.f32 %v3227_v22, %v2671_v23 }
 0xdfc   : > { %v3485_v25 = vpop.f32.mrf.mxu0 }
 0xdfd   : > { %v2677_v26 = vmax.f32 %v2672_v24, 0.0 }
 0xdfe   : > { %v2674_v27 = vpop.f32.mrf.mxu0 }
 0xdff   : > { %v2687_v28 = vpack.c.bf16 %v2677_v26, %v2677_v26 }
 0xe00   : > { %v3486_v29 = vpop.f32.mrf.mxu0 }
 0xe01   : > { %3496 = vmatmul.mubr.msk.bf16.vlgmr.msra.gmra.mxu1 %vm2718_vm7, %v2687_v28 }
 0xec1   : > { %v2756_v30 = vpop.f32.mrf.mxu1 }
 0xec2   : > { %v2757_v31 = vadd.f32 %v3231_v2, %v2756_v30 }
 0xec3   : > { %v3497_v6 = vpop.f32.mrf.mxu1 }
 0xec4   : > { %v2762_v32 = vadd.f32 %v2757_v31, %v2609_v19 }
 0xec5   : > { %v2759_v33 = vpop.f32.mrf.mxu1 }
 0xec6   : > { %v2765_v34 = vsel %vm1105_vm2, %v2762_v32, 0.0 }
 0xec7   : > { %2766 = vadd.xlane.f32.xlu0 %v2765_v34  ;;  %v3498_v35 = vpop.f32.mrf.mxu1 }
 0xf50   : > { %v2767_v36 = vpop.xlane.xlu0 %2766 }
 0xf51   : > { %v2768_v38 = vmul.f32 0.03125, %v2767_v36 }
 0xf53   : > { %v2769_v39 = vsub.f32 %v2762_v32, %v2768_v38 }
 0xf55   : > { %v2770_v40 = vmul.f32 %v2769_v39, %v2769_v39 }
 0xf57   : > { %v2771_v41 = vsel %vm1105_vm2, %v2770_v40, 0.0 }
 0xf58   : > { %2772 = vadd.xlane.f32.xlu0 %v2771_v41 }
 0xfe1   : > { %v2773_v42 = vpop.xlane.xlu0 %2772 }
 0xfe2   : > { %v2774_v43 = vmul.f32 0.03125, %v2773_v42 }
 0xfe4   : > { %v2775_v37 = vadd.f32 1e-05, %v2774_v43 }
 0xfe6   : > { %3617 = vrsqrt.f32 %v2775_v37 }
 0xff3   : > { %v3618_v45 = vpop.eup %3617 }
 0xff4   : > { %v2777_v47 = vmul.f32 %v3618_v45, %v2769_v39 }
 0xff6   : > { %v2784_v49 = vmul.f32 %v3237_v46, %v2777_v47  ;;  %2796 = sbr.rel (%p3239_p8) target bundleno = 4600 (0x11f8), region = 124 }
 0xff8   : > { %v2791_v50 = vadd.f32 %v3238_v48, %v2784_v49 }
 0xffa   : > { %2792 = vst.msk [vmem:[#allocation2] sm:$0xff] %vm1105_vm2, %v2791_v50 }
 0xffb   : > { %v2799_v51 = vsel %vm1105_vm2, %v2791_v50, 0.0  ;;  %v3619_v57 = vld [vmem:[%s4369_s13 + $0x8] sm:$0xff]   ;;  %v3671_v58 = vmov 0.0   ;;  %vm3672_vm8 = vmmov 0   ;;  %v3620_v59 = vld [vmem:[%s4369_s13] sm:$0xff]  }
 0xffc   : > { %2800 = vadd.xlane.f32.xlu0 %v2799_v51  ;;  %3499 = vmatprep.subr.bf16.mxu0 %v3671_v58  ;;  %v3240_v0 = vld [vmem:[%s4370_s10] ss:$0 sm:$0xff] }
 0xffd   : > { %3503 = vmatprep.mubr.msk.bf16.mxu0 %vm3672_vm8, %v3671_v58  ;;  %3500 = vmatpush3.bf16.msra.mxu0 %v3619_v57  ;;  %v3241_v3 = vld [vmem:[%s4371_s8] ss:$0 sm:$0xff] }
 0xffe   : > { %3501 = vmatprep.subr.bf16.mxu0 %v3671_v58  ;;  %v3242_v8 = vld [vmem:[%s4372_s26] ss:$0 sm:$0xff] }
0x1001   : > { %3502 = vmatpush3.bf16.msra.mxu0 %v3620_v59 }
0x1085   : > { %v2801_v52 = vpop.xlane.xlu0 %2800 }
0x1086   : > { %v2802_v53 = vmul.f32 0.03125, %v2801_v52 }
0x1088   : > { %v2803_v54 = vsub.f32 %v2791_v50, %v2802_v53 }
0x108a   : > { %v2804_v55 = vmul.f32 %v2803_v54, %v2803_v54 }
0x108c   : > { %v2805_v56 = vsel %vm1105_vm2, %v2804_v55, 0.0 }
0x108d   : > { %2806 = vadd.xlane.f32.xlu0 %v2805_v56 }
0x1116   : > { %v2807_v60 = vpop.xlane.xlu0 %2806 }
0x1117   : > { %v2808_v61 = vmul.f32 0.03125, %v2807_v60 }
0x1119   : > { %v2809_v62 = vadd.f32 1e-05, %v2808_v61 }
0x111b   : > { %3621 = vrsqrt.f32 %v2809_v62 }
0x1128   : > { %v3622_v63 = vpop.eup %3621 }
0x1129   : > { %v2811_v1 = vmul.f32 %v3622_v63, %v2803_v54 }
0x112b   : > { %v2818_v4 = vmul.f32 %v3240_v0, %v2811_v1 }
0x112d   : > { %v2825_v5 = vadd.f32 %v3241_v3, %v2818_v4 }
0x112f   : > { %v2831_v7 = vpack.c.bf16 %v2825_v5, %v2825_v5 }
0x1131   : > { %3504 = vmatmul.mubr.msk.bf16.vlgmr.msra.gmra.mxu0 %vm1105_vm2, %v2831_v7 }
0x11f1   : > { %v2887_v44 = vpop.f32.mrf.mxu0 }
0x11f2   : > { %v2888_v9 = vadd.f32 %v3242_v8, %v2887_v44 }
0x11f3   : > { %v3505_v10 = vpop.f32.mrf.mxu0 }
0x11f4   : > { %2893 = vst [vmem:[%s1055_s15] sm:$0xff] %v2888_v9 }
0x11f5   : > { %v2890_v11 = vpop.f32.mrf.mxu0 }
0x11f7   : > { %v3506_v12 = vpop.f32.mrf.mxu0 }
0x11f8 PF: > { %s4374_s27 = sld [smem:[#allocation6_spill]] }
0x11f9   : > { %s4375_s5 = sld [smem:[#allocation4_spill]] }
0x11fa   : > { %s4376_s26 = sld [smem:[#allocation5_spill]] }
0x11fb   : > { %s4378_s28 = sld [smem:[#allocation8_spill]] }
0x11fe   : > { %s34_s6 = sadd.s32 1, %s4374_s27   ;;  %s4377_s27 = sld [smem:[#allocation7_spill]] }
0x11ff   : > { %p31_p9 = scmp.ge.s32.totalorder %s34_s6, 6  }
0x1201   :  { %33 = sbr.rel (!%p31_p9) target bundleno = 25 (0x19), region = 211 }

</bundles_post_ra>
